<compile_context>
chip_gen: v7x
topology: tpu7x:2x2x1
jax: 0.10.0
libtpu: 0.0.40
codegen_flags: <defaults>
</compile_context>

<pallas_src>
import functools

import jax
import jax.numpy as jnp
from jax.experimental import pallas as pl
from jax.experimental.pallas import tpu as pltpu

EPS = 1e-6


def _sublayer_kernel(seed_ref, x_ref, w_ref, b_ref, gamma_ref, beta_ref, o_ref,
                     *, hidden, dropout_p, training):
    # x tile: (tm, H) in f32.
    x = x_ref[...].astype(jnp.float32)

    # ---- LayerNorm (torch semantics: unbiased std, eps added to std) ----
    mean = jnp.mean(x, axis=-1, keepdims=True)
    xc = x - mean
    var_unbiased = jnp.sum(xc * xc, axis=-1, keepdims=True) * (1.0 / (hidden - 1))
    std = jnp.sqrt(var_unbiased)
    inv_std = pl.reciprocal(std + EPS, approx=True)     # EUP slot, frees the VALU
    normed = gamma_ref[...] * xc * inv_std + beta_ref[...]

    # ---- sublayer: dense projection on the MXU (bf16 operands, f32 acc) ----
    h = jnp.dot(normed.astype(jnp.bfloat16), w_ref[...],
                preferred_element_type=jnp.float32) + b_ref[...]

    # ---- dropout (inverted dropout, in-kernel PRNG) ----
    if training and dropout_p > 0.0:
        if dropout_p >= 1.0:
            h = jnp.zeros_like(h)
        else:
            # Hash-mix the tile id into the seed to decorrelate per-tile streams.
            pltpu.prng_seed(seed_ref[0] ^ (pl.program_id(0) * jnp.int32(-1640531527)))
            bits = pltpu.bitcast(pltpu.prng_random_bits(h.shape), jnp.uint32)
            threshold = jnp.uint32(min(int(dropout_p * (2 ** 32)), 2 ** 32 - 1))
            keep = bits >= threshold
            h = jnp.where(keep, h * (1.0 / (1.0 - dropout_p)), 0.0)

    # ---- residual connection ----
    o_ref[...] = (x + h).astype(o_ref.dtype)


def _choose_tm(rows, hidden, tm_max=512):
    """Largest power-of-two row tile <= tm_max that (a) doesn't blow up padding
    for small inputs, (b) leaves >=2 grid steps when possible (v7x megacore),
    and (c) keeps the double-buffered activation tiles inside a safe VMEM budget."""
    tm = tm_max
    target = max(8, pl.next_power_of_2(rows))
    while tm > 8 and tm > target:
        tm //= 2
    if rows > 8 and pl.cdiv(rows, tm) < 2 and tm > 8:
        tm //= 2
    # in + out tiles, double-buffered, f32:
    while tm > 8 and (2 * 2 * tm * hidden * 4) > (40 << 20):
        tm //= 2
    return tm


def sublayer_connection(x, w, b, gamma, beta, *, dropout_p=0.1, training=False,
                        seed=0, tm=None):
    """x: (B, S, H) float32.  Returns x + dropout(LayerNorm(x) @ W + b)."""
    B, S, H = x.shape
    rows = B * S
    if tm is None:
        tm = _choose_tm(rows, H)

    # Pad the row count up to a multiple of tm (no divisibility restriction).
    rows_p = pl.cdiv(rows, tm) * tm
    xf = x.reshape(rows, H)
    if rows_p != rows:
        xf = jnp.pad(xf, ((0, rows_p - rows), (0, 0)))
    grid = (rows_p // tm,)

    # VMEM budget: double-buffered (tm,H) f32 in/out tiles + resident bf16 W
    # + small vectors, with generous headroom but capped under v7x's 64 MiB.
    est = 2 * 2 * tm * H * 4 + 2 * H * H * 2 + 6 * H * 4
    vmem_limit = int(min(max(2 * est, 16 << 20), 64 << 20))

    kernel = functools.partial(
        _sublayer_kernel, hidden=H, dropout_p=float(dropout_p), training=bool(training)
    )

    def build(single_buffer_params):
        # Constant-index_map params don't need double buffering.
        pm = {"pipeline_mode": pl.Buffered(1)} if single_buffer_params else {}
        return pl.pallas_call(
            kernel,
            out_shape=jax.ShapeDtypeStruct((rows_p, H), x.dtype),
            grid_spec=pltpu.PrefetchScalarGridSpec(
                num_scalar_prefetch=1,                          # dropout seed in SMEM
                grid=grid,
                in_specs=[
                    pl.BlockSpec((tm, H), lambda i, seed: (i, 0)),        # x rows
                    pl.BlockSpec((H, H), lambda i, seed: (0, 0), **pm),   # W (bf16, resident)
                    pl.BlockSpec((1, H), lambda i, seed: (0, 0), **pm),   # b
                    pl.BlockSpec((1, H), lambda i, seed: (0, 0), **pm),   # gamma (a_2)
                    pl.BlockSpec((1, H), lambda i, seed: (0, 0), **pm),   # beta  (b_2)
                ],
                out_specs=pl.BlockSpec((tm, H), lambda i, seed: (i, 0)),
            ),
            # arg 0 = seed, arg 1 = xf -> alias the activation slab to the output.
            input_output_aliases={1: 0},
            compiler_params=pltpu.CompilerParams(
                dimension_semantics=("parallel",),
                vmem_limit_bytes=vmem_limit,
            ),
        )

    args = (
        jnp.array([seed], jnp.int32),
        xf,
        w.astype(jnp.bfloat16),
        b.reshape(1, H).astype(jnp.float32),
        gamma.reshape(1, H).astype(jnp.float32),
        beta.reshape(1, H).astype(jnp.float32),
    )

    try:
        out = build(True)(*args)
    except Exception:
        # Fallback for jax builds where single-buffered pipeline_mode on a
        # grid-level BlockSpec is not supported; semantics are identical.
        out = build(False)(*args)

    return out[:rows].reshape(B, S, H)


def _reference(x, w, b, gamma, beta):
    """Pure-JAX f32 reference of the eval-mode forward (dropout = identity)."""
    mean = jnp.mean(x, axis=-1, keepdims=True)
    xc = x - mean
    var_unbiased = jnp.sum(xc * xc, axis=-1, keepdims=True) / (x.shape[-1] - 1)
    std = jnp.sqrt(var_unbiased)
    normed = gamma * xc / (std + EPS) + beta
    h = jnp.einsum("bsh,hk->bsk", normed, w) + b
    return x + h


if __name__ == "__main__":
    B, S, H = 4, 128, 128
    key = jax.random.PRNGKey(0)
    kx, kw, kb = jax.random.split(key, 3)

    x = jax.random.normal(kx, (B, S, H), dtype=jnp.float32)

    # Deterministic parameter init (module __init__ shapes):
    #   LayerNorm: a_2 = ones(H), b_2 = zeros(H)
    #   sublayer (dense): W (H, H), b (H,)
    gamma = jnp.ones((H,), jnp.float32)
    beta = jnp.zeros((H,), jnp.float32)
    w = jax.random.normal(kw, (H, H), dtype=jnp.float32) * (1.0 / jnp.sqrt(H))
    b = jax.random.normal(kb, (H,), dtype=jnp.float32) * 0.01

    # Eval mode: nn.Dropout is identity, so the result is deterministic.
    out = sublayer_connection(x, w, b, gamma, beta, dropout_p=0.1, training=False)
    out = jax.block_until_ready(out)

    ref = _reference(x, w, b, gamma, beta)
    assert out.shape == (B, S, H)
    max_err = float(jnp.max(jnp.abs(out - ref)))
    # bf16 MXU operands + approx reciprocal loosen agreement vs the f32-exact
    # reference; f32 accumulation keeps the error well inside this tolerance.
    assert jnp.allclose(out, ref, atol=5e-2, rtol=5e-2), f"mismatch vs reference: {max_err}"

    print("KERNEL_OK")
</pallas_src>

<mosaic_0001>
module attributes {stable_mosaic.version = 11 : i64} {
  func.func @_sublayer_kernel(%arg0: i32, %arg1: memref<1xi32, #tpu.memory_space<smem>>, %arg2: memref<256x128xf32, #tpu.memory_space<vmem>>, %arg3: memref<128x128xbf16, #tpu.memory_space<vmem>>, %arg4: memref<1x128xf32, #tpu.memory_space<vmem>>, %arg5: memref<1x128xf32, #tpu.memory_space<vmem>>, %arg6: memref<1x128xf32, #tpu.memory_space<vmem>>, %arg7: memref<256x128xf32, #tpu.memory_space<vmem>>) attributes {dimension_semantics = [#tpu.dimension_semantics<parallel>], iteration_bounds = array<i64: 2>, scalar_prefetch = 1 : i64, scratch_operands = 0 : i64, tpu.core_type = #tpu.core_type<tc>, window_params = [{transform_indices = @transform_0, window_bounds = array<i64: 256, 128>}, {pipeline_mode = #tpu.pipeline_mode<synchronous>, transform_indices = @transform_1, window_bounds = array<i64: 128, 128>}, {pipeline_mode = #tpu.pipeline_mode<synchronous>, transform_indices = @transform_2, window_bounds = array<i64: 1, 128>}, {pipeline_mode = #tpu.pipeline_mode<synchronous>, transform_indices = @transform_3, window_bounds = array<i64: 1, 128>}, {pipeline_mode = #tpu.pipeline_mode<synchronous>, transform_indices = @transform_4, window_bounds = array<i64: 1, 128>}, {transform_indices = @transform_5, window_bounds = array<i64: 256, 128>}]} {
    %c0 = arith.constant 0 : index
    %c0_0 = arith.constant 0 : index
    %0 = vector.load %arg2[%c0, %c0_0] : memref<256x128xf32, #tpu.memory_space<vmem>>, vector<256x128xf32>
    %cst = arith.constant dense<0.000000e+00> : vector<256xf32>
    %1 = vector.multi_reduction <add>, %0, %cst [1] : vector<256x128xf32> to vector<256xf32>
    %2 = vector.shape_cast %1 : vector<256xf32> to vector<256x1xf32>
    %cst_1 = arith.constant 1.280000e+02 : f32
    %3 = vector.broadcast %cst_1 : f32 to vector<256x1xf32>
    %4 = arith.divf %2, %3 : vector<256x1xf32>
    %5 = vector.broadcast %4 : vector<256x1xf32> to vector<256x128xf32>
    %6 = arith.subf %0, %5 : vector<256x128xf32>
    %7 = arith.mulf %6, %6 : vector<256x128xf32>
    %cst_2 = arith.constant dense<0.000000e+00> : vector<256xf32>
    %8 = vector.multi_reduction <add>, %7, %cst_2 [1] : vector<256x128xf32> to vector<256xf32>
    %9 = vector.shape_cast %8 : vector<256xf32> to vector<256x1xf32>
    %cst_3 = arith.constant 0.00787401571 : f32
    %10 = vector.broadcast %cst_3 : f32 to vector<256x1xf32>
    %11 = arith.mulf %9, %10 : vector<256x1xf32>
    %12 = math.sqrt %11 : vector<256x1xf32>
    %cst_4 = arith.constant 9.99999997E-7 : f32
    %13 = vector.broadcast %cst_4 : f32 to vector<256x1xf32>
    %14 = arith.addf %12, %13 : vector<256x1xf32>
    %15 = tpu.reciprocal %14 {approx = true} : vector<256x1xf32> -> vector<256x1xf32>
    %c0_5 = arith.constant 0 : index
    %c0_6 = arith.constant 0 : index
    %16 = vector.load %arg5[%c0_5, %c0_6] : memref<1x128xf32, #tpu.memory_space<vmem>>, vector<1x128xf32>
    %17 = vector.broadcast %16 : vector<1x128xf32> to vector<256x128xf32>
    %18 = arith.mulf %17, %6 : vector<256x128xf32>
    %19 = vector.broadcast %15 : vector<256x1xf32> to vector<256x128xf32>
    %20 = arith.mulf %18, %19 : vector<256x128xf32>
    %c0_7 = arith.constant 0 : index
    %c0_8 = arith.constant 0 : index
    %21 = vector.load %arg6[%c0_7, %c0_8] : memref<1x128xf32, #tpu.memory_space<vmem>>, vector<1x128xf32>
    %22 = vector.broadcast %21 : vector<1x128xf32> to vector<256x128xf32>
    %23 = arith.addf %20, %22 : vector<256x128xf32>
    %24 = arith.truncf %23 : vector<256x128xf32> to vector<256x128xbf16>
    %c0_9 = arith.constant 0 : index
    %c0_10 = arith.constant 0 : index
    %25 = vector.load %arg3[%c0_9, %c0_10] : memref<128x128xbf16, #tpu.memory_space<vmem>>, vector<128x128xbf16>
    %cst_11 = arith.constant dense<0.000000e+00> : vector<256x128xf32>
    %26 = tpu.matmul %24, %25, %cst_11 {dimension_numbers = #tpu.dot_dimension_numbers<[1], [0], [0], [1], [0, 0, 1, 1], [], []>} : vector<256x128xbf16>, vector<128x128xbf16>, vector<256x128xf32> -> vector<256x128xf32>
    %c0_12 = arith.constant 0 : index
    %c0_13 = arith.constant 0 : index
    %27 = vector.load %arg4[%c0_12, %c0_13] : memref<1x128xf32, #tpu.memory_space<vmem>>, vector<1x128xf32>
    %28 = vector.broadcast %27 : vector<1x128xf32> to vector<256x128xf32>
    %29 = arith.addf %26, %28 : vector<256x128xf32>
    %30 = arith.addf %0, %29 : vector<256x128xf32>
    %c0_14 = arith.constant 0 : index
    %c0_15 = arith.constant 0 : index
    %31 = vector.load %arg7[%c0_14, %c0_15] : memref<256x128xf32, #tpu.memory_space<vmem>>, vector<256x128xf32>
    tpu.vector_store %arg7[%c0_14, %c0_15], %30 {strides = array<i32>} : memref<256x128xf32, #tpu.memory_space<vmem>>, vector<256x128xf32>,
    return
  }
  func.func @transform_0(%arg0: i32, %arg1: memref<1xi32, #tpu.memory_space<smem>>) -> (i32, i32) {
    %c0_i32 = arith.constant 0 : i32
    %c0_i32_0 = arith.constant 0 : i32
    return %arg0, %c0_i32 : i32, i32
  }
  func.func @transform_1(%arg0: i32, %arg1: memref<1xi32, #tpu.memory_space<smem>>) -> (i32, i32) {
    %c0_i32 = arith.constant 0 : i32
    %c0_i32_0 = arith.constant 0 : i32
    %c0_i32_1 = arith.constant 0 : i32
    return %c0_i32, %c0_i32_0 : i32, i32
  }
  func.func @transform_2(%arg0: i32, %arg1: memref<1xi32, #tpu.memory_space<smem>>) -> (i32, i32) {
    %c0_i32 = arith.constant 0 : i32
    %c0_i32_0 = arith.constant 0 : i32
    %c0_i32_1 = arith.constant 0 : i32
    return %c0_i32, %c0_i32_0 : i32, i32
  }
  func.func @transform_3(%arg0: i32, %arg1: memref<1xi32, #tpu.memory_space<smem>>) -> (i32, i32) {
    %c0_i32 = arith.constant 0 : i32
    %c0_i32_0 = arith.constant 0 : i32
    %c0_i32_1 = arith.constant 0 : i32
    return %c0_i32, %c0_i32_0 : i32, i32
  }
  func.func @transform_4(%arg0: i32, %arg1: memref<1xi32, #tpu.memory_space<smem>>) -> (i32, i32) {
    %c0_i32 = arith.constant 0 : i32
    %c0_i32_0 = arith.constant 0 : i32
    %c0_i32_1 = arith.constant 0 : i32
    return %c0_i32, %c0_i32_0 : i32, i32
  }
  func.func @transform_5(%arg0: i32, %arg1: memref<1xi32, #tpu.memory_space<smem>>) -> (i32, i32) {
    %c0_i32 = arith.constant 0 : i32
    %c0_i32_0 = arith.constant 0 : i32
    return %arg0, %c0_i32 : i32, i32
  }
}

module attributes {stable_mosaic.version = 11 : i64} {
  func.func @_sublayer_kernel(%arg0: i32, %arg1: memref<1xi32, #tpu.memory_space<smem>>, %arg2: memref<256x128xf32, #tpu.memory_space<vmem>>, %arg3: memref<128x128xbf16, #tpu.memory_space<vmem>>, %arg4: memref<1x128xf32, #tpu.memory_space<vmem>>, %arg5: memref<1x128xf32, #tpu.memory_space<vmem>>, %arg6: memref<1x128xf32, #tpu.memory_space<vmem>>, %arg7: memref<256x128xf32, #tpu.memory_space<vmem>>) attributes {dimension_semantics = [#tpu.dimension_semantics<parallel>], iteration_bounds = array<i64: 2>, scalar_prefetch = 1 : i64, scratch_operands = 0 : i64, tpu.core_type = #tpu.core_type<tc>, window_params = [{transform_indices = @transform_0, window_bounds = array<i64: 256, 128>}, {pipeline_mode = #tpu.pipeline_mode<synchronous>, transform_indices = @transform_1, window_bounds = array<i64: 128, 128>}, {pipeline_mode = #tpu.pipeline_mode<synchronous>, transform_indices = @transform_2, window_bounds = array<i64: 1, 128>}, {pipeline_mode = #tpu.pipeline_mode<synchronous>, transform_indices = @transform_3, window_bounds = array<i64: 1, 128>}, {pipeline_mode = #tpu.pipeline_mode<synchronous>, transform_indices = @transform_4, window_bounds = array<i64: 1, 128>}, {transform_indices = @transform_5, window_bounds = array<i64: 256, 128>}]} {
    %c0 = arith.constant 0 : index
    %c0_0 = arith.constant 0 : index
    %0 = vector.load %arg2[%c0, %c0_0] : memref<256x128xf32, #tpu.memory_space<vmem>>, vector<256x128xf32>
    %cst = arith.constant dense<0.000000e+00> : vector<256xf32>
    %1 = vector.multi_reduction <add>, %0, %cst [1] : vector<256x128xf32> to vector<256xf32>
    %2 = vector.shape_cast %1 : vector<256xf32> to vector<256x1xf32>
    %cst_1 = arith.constant 1.280000e+02 : f32
    %3 = vector.broadcast %cst_1 : f32 to vector<256x1xf32>
    %4 = arith.divf %2, %3 : vector<256x1xf32>
    %5 = vector.broadcast %4 : vector<256x1xf32> to vector<256x128xf32>
    %6 = arith.subf %0, %5 : vector<256x128xf32>
    %7 = arith.mulf %6, %6 : vector<256x128xf32>
    %cst_2 = arith.constant dense<0.000000e+00> : vector<256xf32>
    %8 = vector.multi_reduction <add>, %7, %cst_2 [1] : vector<256x128xf32> to vector<256xf32>
    %9 = vector.shape_cast %8 : vector<256xf32> to vector<256x1xf32>
    %cst_3 = arith.constant 0.00787401571 : f32
    %10 = vector.broadcast %cst_3 : f32 to vector<256x1xf32>
    %11 = arith.mulf %9, %10 : vector<256x1xf32>
    %12 = math.sqrt %11 : vector<256x1xf32>
    %cst_4 = arith.constant 9.99999997E-7 : f32
    %13 = vector.broadcast %cst_4 : f32 to vector<256x1xf32>
    %14 = arith.addf %12, %13 : vector<256x1xf32>
    %15 = tpu.reciprocal %14 {approx = true} : vector<256x1xf32> -> vector<256x1xf32>
    %c0_5 = arith.constant 0 : index
    %c0_6 = arith.constant 0 : index
    %16 = vector.load %arg5[%c0_5, %c0_6] : memref<1x128xf32, #tpu.memory_space<vmem>>, vector<1x128xf32>
    %17 = vector.broadcast %16 : vector<1x128xf32> to vector<256x128xf32>
    %18 = arith.mulf %17, %6 : vector<256x128xf32>
    %19 = vector.broadcast %15 : vector<256x1xf32> to vector<256x128xf32>
    %20 = arith.mulf %18, %19 : vector<256x128xf32>
    %c0_7 = arith.constant 0 : index
    %c0_8 = arith.constant 0 : index
    %21 = vector.load %arg6[%c0_7, %c0_8] : memref<1x128xf32, #tpu.memory_space<vmem>>, vector<1x128xf32>
    %22 = vector.broadcast %21 : vector<1x128xf32> to vector<256x128xf32>
    %23 = arith.addf %20, %22 : vector<256x128xf32>
    %24 = arith.truncf %23 : vector<256x128xf32> to vector<256x128xbf16>
    %c0_9 = arith.constant 0 : index
    %c0_10 = arith.constant 0 : index
    %25 = vector.load %arg3[%c0_9, %c0_10] : memref<128x128xbf16, #tpu.memory_space<vmem>>, vector<128x128xbf16>
    %cst_11 = arith.constant dense<0.000000e+00> : vector<256x128xf32>
    %26 = tpu.matmul %24, %25, %cst_11 {dimension_numbers = #tpu.dot_dimension_numbers<[1], [0], [0], [1], [0, 0, 1, 1], [], []>} : vector<256x128xbf16>, vector<128x128xbf16>, vector<256x128xf32> -> vector<256x128xf32>
    %c0_12 = arith.constant 0 : index
    %c0_13 = arith.constant 0 : index
    %27 = vector.load %arg4[%c0_12, %c0_13] : memref<1x128xf32, #tpu.memory_space<vmem>>, vector<1x128xf32>
    %28 = vector.broadcast %27 : vector<1x128xf32> to vector<256x128xf32>
    %29 = arith.addf %26, %28 : vector<256x128xf32>
    %30 = arith.addf %0, %29 : vector<256x128xf32>
    %c0_14 = arith.constant 0 : index
    %c0_15 = arith.constant 0 : index
    %31 = vector.load %arg7[%c0_14, %c0_15] : memref<256x128xf32, #tpu.memory_space<vmem>>, vector<256x128xf32>
    tpu.vector_store %arg7[%c0_14, %c0_15], %30 {strides = array<i32>} : memref<256x128xf32, #tpu.memory_space<vmem>>, vector<256x128xf32>,
    return
  }
  func.func @transform_0(%arg0: i32, %arg1: memref<1xi32, #tpu.memory_space<smem>>) -> (i32, i32) {
    %c0_i32 = arith.constant 0 : i32
    %c0_i32_0 = arith.constant 0 : i32
    return %arg0, %c0_i32 : i32, i32
  }
  func.func @transform_1(%arg0: i32, %arg1: memref<1xi32, #tpu.memory_space<smem>>) -> (i32, i32) {
    %c0_i32 = arith.constant 0 : i32
    %c0_i32_0 = arith.constant 0 : i32
    %c0_i32_1 = arith.constant 0 : i32
    return %c0_i32, %c0_i32_0 : i32, i32
  }
  func.func @transform_2(%arg0: i32, %arg1: memref<1xi32, #tpu.memory_space<smem>>) -> (i32, i32) {
    %c0_i32 = arith.constant 0 : i32
    %c0_i32_0 = arith.constant 0 : i32
    %c0_i32_1 = arith.constant 0 : i32
    return %c0_i32, %c0_i32_0 : i32, i32
  }
  func.func @transform_3(%arg0: i32, %arg1: memref<1xi32, #tpu.memory_space<smem>>) -> (i32, i32) {
    %c0_i32 = arith.constant 0 : i32
    %c0_i32_0 = arith.constant 0 : i32
    %c0_i32_1 = arith.constant 0 : i32
    return %c0_i32, %c0_i32_0 : i32, i32
  }
  func.func @transform_4(%arg0: i32, %arg1: memref<1xi32, #tpu.memory_space<smem>>) -> (i32, i32) {
    %c0_i32 = arith.constant 0 : i32
    %c0_i32_0 = arith.constant 0 : i32
    %c0_i32_1 = arith.constant 0 : i32
    return %c0_i32, %c0_i32_0 : i32, i32
  }
  func.func @transform_5(%arg0: i32, %arg1: memref<1xi32, #tpu.memory_space<smem>>) -> (i32, i32) {
    %c0_i32 = arith.constant 0 : i32
    %c0_i32_0 = arith.constant 0 : i32
    return %arg0, %c0_i32 : i32, i32
  }
}

</mosaic_0001>

<bundles_post_ra>
// kernel: tpu_custom_call.1
= control target key start
LH: loop header
LB: loop body
LE: loop exit
PB: predicated region body
PF: predicated region fallthrough
CT: control target
= control target key end

     0   :  { %12 = vsyncpa [#allocation5], 0  ;;  %s3057_s0 = inlined_call_operand.<no memory space> [shape: s32[1], index: 0, kind: input, shape index: {}]   ;;  %s3058_s1 = inlined_call_operand.hbm [shape: f32[512,128], index: 1, kind: input, shape index: {}, may-alias: {1,6}]   ;;  %s3059_s2 = inlined_call_operand.vmem [shape: bf16[128,128], index: 2, kind: input, shape index: {}]   ;;  %s3060_s3 = inlined_call_operand.vmem [shape: f32[1,128], index: 3, kind: input, shape index: {}]   ;;  %s3061_s4 = inlined_call_operand.vmem [shape: f32[1,128], index: 4, kind: input, shape index: {}]   ;;  %s3062_s5 = inlined_call_operand.vmem [shape: f32[1,128], index: 5, kind: input, shape index: {}]   ;;  %s3063_s6 = inlined_call_operand.hbm [shape: f32[512,128], index: 6, kind: output, shape index: {}, may-alias: {1,6}]  }
   0x1   :  { %14 = vsyncpa [#allocation5 + $0x1], 0 }
   0x2   :  { %15 = vsyncpa [#allocation6], 0 }
   0x3   :  { %17 = vsyncpa [#allocation6 + $0x1], 0  ;;  %s1807_s0 = smov 0   ;;  %s1809_s21 = smov 0  }
   0x4   :  { %s1811_s22 = smov 0   ;;  %s1813_s23 = smov 0  }
   0x5 LB: > { %s1828_s24 = sadd.s32 4294967295, %s1764_s23   ;;  %s1334_s25 = sadd.s32 4294967294, %s1764_s23   ;;  %s1764_s23 = sphi %s1813_s23, %s3136_s23   ;;  %s1760_s22 = sphi %s1811_s22, %s3135_s22   ;;  %s1756_s21 = sphi %s1809_s21, %s3134_s21   ;;  %s1752_s0 = sphi %s1807_s0, %s3133_s0  }
   0x6   : > { %s1832_s26 = sadd.s32 1, %s1764_s23   ;;  %s30_s27 = sadd.s32 1, %s1760_s22 }
   0x7   : > { %s27_s28 = ssub.s32 %s1764_s23, %s1832_s26  ;;  %p37_p0 = scmp.ne.s32.totalorder %s1760_s22, %s1756_s21 }
   0x8   : > { %p28_p1 = scmp.eq.s32.totalorder %s27_s28, 0  ;;  %p38_p2 = scmp.eq.s32.totalorder %s1764_s23, 0 }
   0x9   : > { %p43_p3 = scmp.ne.s32.totalorder %s1756_s21, %s1752_s0  ;;  %p44_p4 = scmp.eq.s32.totalorder %s1828_s24, 0 }
   0xa   : > { %s1844_s29 = scalar_select %p28_p1, %s1760_s22, %s30_s27  }
   0xb   : > { %p1846_p5 = por %p38_p2, %p37_p0  ;;  %p1850_p6 = por %p44_p4, %p43_p3 }
   0xc   : > { %p151_p7 = scmp.eq.s32.totalorder %s1828_s24, 1  ;;  %p157_p8 = scmp.eq.s32.totalorder %s1334_s25, 1 }
   0xd   : > { %p1461_p10 = scmp.lt.s32.totalorder %s1764_s23, 2  ;;  %s189_s10 = sand.u32 1, %s1760_s22  }
   0xe   : > { %p1857_p11 = por %p151_p7, %p37_p0  ;;  %p1861_p12 = por %p157_p8, %p43_p3 }
   0xf   : > { %s1359_s11 = sshll.u32 %s1764_s23, 12  ;;  %s1337_s12 = sshll.u32 %s189_s10, 8 }
  0x10   : > { %s3069_s8 = scalar_select %p1857_p11, 1, 0 }
  0x11   : > { %s3070_s9 = scalar_select %p1861_p12, 1, 0 }
  0x12   : > { %s1870_s15 = scalar_lea.hbm %s3058_s1, %s1359_s11  ;;  %s193_s16 = scalar_lea.vmem [#allocation4], %s1337_s12 }
  0x13   : > { %s200_s17 = sshll.u32 %s193_s16, 4  ;;  %p1874_p13 = pnand %p1461_p10, %p1846_p5  ;;  %s1878_s17 = int_to_ptr.vmem [resolvable:$true] %s200_s17 }
  0x14   : > { %s1880_s19 = scalar_lea.sflag [#allocation5], %s189_s10  ;;  %s1668_s20 = scalar_lea.hbm %s1870_s15, 4096 }
  0x15   : > { %p1669_p0 = scmp.ne.s32.totalorder %s1870_s15, %s1668_s20  ;;  %p1670_p1 = pneg %p1874_p13 }
  0x16   : > { %s1673_s28 = scalar_lea.hbm %s3058_s1, 8192  ;;  %p1674_p4 = scmp.lt.u32.totalorder %s1870_s15, %s3058_s1 }
  0x17   : > { %p1671_p2 = pnand %p1670_p1, %p1669_p0  ;;  %p1675_p5 = scmp.lt.u32.totalorder %s1673_s28, %s1668_s20 }
  0x18   : > { %p1677_p8 = scmp.lt.u32.totalorder %s1668_s20, %s1870_s15 }
  0x19   : > { %p1672_p3 = pneg %p1671_p2  ;;  %p1676_p7 = por %p1675_p5, %p1674_p4 }
  0x1b   : > { %p1678_p10 = por %p1677_p8, %p1676_p7 }
  0x1d   : > { %p1679_p9 = pnand %p1678_p10, %p1672_p3 }
  0x1f   : > { %1682 = shalt.err (!%p1679_p9)
}
  0x20   : > { %s1683_s10 = scalar_lea.vmem %s1878_s17, 4096  ;;  %s1766_s12 = smov [#allocation4]  }
  0x21   : > { %p1684_p0 = scmp.ne.s32.totalorder %s1878_s17, %s1683_s10  ;;  %s1688_s13 = sshll.u32 %s1766_s12, 4  ;;  %s1689_s13 = int_to_ptr.vmem [resolvable:$false] %s1688_s13 }
  0x22   : > { %s1690_s14 = scalar_lea.vmem %s1689_s13, 8192  ;;  %p1691_p11 = scmp.lt.s32.totalorder %s1878_s17, %s1689_s13 }
  0x23   : > { %p1686_p2 = pnand %p1684_p0, %p1670_p1  ;;  %p1692_p4 = scmp.lt.s32.totalorder %s1690_s14, %s1683_s10 }
  0x25   : > { %p1687_p12 = pneg %p1686_p2  ;;  %p1693_p5 = por %p1692_p4, %p1691_p11 }
  0x27   : > { %p1694_p7 = pnand %p1693_p5, %p1687_p12 }
  0x29   : > { %1697 = shalt.err (!%p1694_p7)
}
  0x2a   : > { %s1767_s16 = smov 128   ;;  %s1768_s20 = smov 8  }
  0x2b   : > { %1456 = dma.hbm_to_vmem [thread:$0]  (!%p1874_p13), %s1870_s15, 4096, %s1878_s17, %s1880_s19, %s1767_s16, %s1767_s16, %s1768_s20  }
  0x2c   : > { %p1340_p9 = scmp.ge.s32.totalorder %s1764_s23, 1  ;;  %p208_p1 = scmp.lt.s32.totalorder %s1764_s23, 3 }
  0x2e   : > { %p209_p3 = pnand %p1340_p9, %p208_p1 }
  0x30   : > { %212 = sbr.rel (%p209_p3) target bundleno = 710 (0x2c6), region = 40 }
  0x37   : > { %s1911_s25 = sand.u32 1, %s1756_s21  }
  0x38   : > { %s1341_s27 = sshll.u32 %s1911_s25, 8  ;;  %s215_s28 = scalar_lea.sflag [#allocation5], %s1911_s25 }
  0x39   : > { %s1917_s30 = scalar_lea.vmem [#allocation4], %s1341_s27 }
  0x3a   : > { %1743 = dma.done.wait (%p1850_p6), %s215_s28, 4096  }
  0x3b   : > { %1745 = vsyncadd (%p1850_p6), %s215_s28, 4294963200  ;;  %v1924_v0 = vld [vmem:[%s1917_s30] sm:$0xff]  ;;  %v1932_v2 = vld [vmem:[%s1917_s30 + $0x8] sm:$0xff]  ;;  %s2914_s20 = scalar_lea.vmem [#allocation7], %s1341_s27  ;;  %s1360_s27 = sshll.u32 %s1828_s24, 12 }
  0x3c   : > { %v1927_v1 = vld [vmem:[%s1917_s30 + $0x80] sm:$0xff]  ;;  %280 = vadd.xlane.f32.xlu0 %v1924_v0  ;;  %v1935_v3 = vld [vmem:[%s1917_s30 + $0x88] sm:$0xff]  ;;  %v1940_v4 = vld [vmem:[%s1917_s30 + $0x10] sm:$0xff]  ;;  %s1261_s28 = sshll.u32 %s2914_s20, 4  ;;  %s3007_s15 = scalar_lea.hbm %s3063_s6, %s1360_s27  ;;  %s3009_s28 = int_to_ptr.vmem [resolvable:$true] %s1261_s28 }
  0x3d   : > { %312 = vadd.xlane.f32.xlu1 %v1927_v1  ;;  %v1943_v5 = vld [vmem:[%s1917_s30 + $0x18] sm:$0xff]  ;;  %v1948_v6 = vld [vmem:[%s1917_s30 + $0x90] sm:$0xff]  ;;  %v1954_v8 = vld [vmem:[%s1917_s30 + $0x20] sm:$0xff]  ;;  %s1248_s17 = scalar_lea.sflag [#allocation6], %s1911_s25  ;;  %s1698_s18 = scalar_lea.vmem %s3009_s28, 4096 }
  0x3e   : > { %v1951_v7 = vld [vmem:[%s1917_s30 + $0x98] sm:$0xff]  ;;  %v1957_v9 = vld [vmem:[%s1917_s30 + $0x28] sm:$0xff]  ;;  %v1964_v10 = vld [vmem:[%s1917_s30 + $0xa0] sm:$0xff]  ;;  %p1699_p6 = scmp.ne.s32.totalorder %s3009_s28, %s1698_s18  ;;  %p3130_p11 = scmp.ne.s32.totalorder %s3069_s8, 0 }
  0x3f   : > { %v1967_v11 = vld [vmem:[%s1917_s30 + $0xa8] sm:$0xff]  ;;  %v1972_v12 = vld [vmem:[%s1917_s30 + $0x30] sm:$0xff]  ;;  %v1975_v13 = vld [vmem:[%s1917_s30 + $0x38] sm:$0xff]  ;;  %s1769_s19 = smov [#allocation7]  }
  0x40   : > { %282 = vadd.xlane.f32.xlu0 %v1932_v2  ;;  %v1980_v14 = vld [vmem:[%s1917_s30 + $0xb0] sm:$0xff]  ;;  %v1983_v15 = vld [vmem:[%s1917_s30 + $0xb8] sm:$0xff]  ;;  %v1988_v16 = vld [vmem:[%s1917_s30 + $0x40] sm:$0xff]  ;;  %p1700_p12 = pnand %p1699_p6, %p3130_p11  ;;  %s1702_s11 = sshll.u32 %s1769_s19, 4  ;;  %s1703_s11 = int_to_ptr.vmem [resolvable:$false] %s1702_s11 }
  0x41   : > { %314 = vadd.xlane.f32.xlu1 %v1935_v3  ;;  %v1991_v17 = vld [vmem:[%s1917_s30 + $0x48] sm:$0xff]  ;;  %v1996_v18 = vld [vmem:[%s1917_s30 + $0xc0] sm:$0xff]  ;;  %v2004_v20 = vld [vmem:[%s1917_s30 + $0x50] sm:$0xff]  ;;  %s1704_s10 = scalar_lea.vmem %s1703_s11, 8192  ;;  %p1705_p8 = scmp.lt.s32.totalorder %s3009_s28, %s1703_s11 }
  0x42   : > { %v1999_v19 = vld [vmem:[%s1917_s30 + $0xc8] sm:$0xff]  ;;  %v2007_v21 = vld [vmem:[%s1917_s30 + $0x58] sm:$0xff]  ;;  %v2012_v22 = vld [vmem:[%s1917_s30 + $0xd0] sm:$0xff]  ;;  %p1701_p13 = pneg %p1700_p12  ;;  %p1706_p10 = scmp.lt.s32.totalorder %s1704_s10, %s1698_s18 }
  0x43   : > { %v2015_v23 = vld [vmem:[%s1917_s30 + $0xd8] sm:$0xff]  ;;  %v2020_v24 = vld [vmem:[%s1917_s30 + $0x60] sm:$0xff]  ;;  %v2023_v25 = vld [vmem:[%s1917_s30 + $0x68] sm:$0xff] }
  0x44   : > { %284 = vadd.xlane.f32.xlu0 %v1940_v4  ;;  %v2028_v26 = vld [vmem:[%s1917_s30 + $0xe0] sm:$0xff]  ;;  %v2031_v27 = vld [vmem:[%s1917_s30 + $0xe8] sm:$0xff]  ;;  %v2036_v28 = vld [vmem:[%s1917_s30 + $0x70] sm:$0xff]  ;;  %p1707_p0 = por %p1706_p10, %p1705_p8 }
  0x45   : > { %286 = vadd.xlane.f32.xlu1 %v1943_v5  ;;  %v2039_v29 = vld [vmem:[%s1917_s30 + $0x78] sm:$0xff]  ;;  %v2044_v30 = vld [vmem:[%s1917_s30 + $0xf0] sm:$0xff] }
  0x46   : > { %v2047_v31 = vld [vmem:[%s1917_s30 + $0xf8] sm:$0xff]  ;;  %p1708_p2 = pnand %p1707_p0, %p1701_p13 }
  0x48   : > { %316 = vadd.xlane.f32.xlu0 %v1948_v6 }
  0x49   : > { %318 = vadd.xlane.f32.xlu1 %v1951_v7 }
  0x4c   : > { %288 = vadd.xlane.f32.xlu0 %v1954_v8 }
  0x4d   : > { %290 = vadd.xlane.f32.xlu1 %v1957_v9 }
  0x50   : > { %320 = vadd.xlane.f32.xlu0 %v1964_v10 }
  0x51   : > { %322 = vadd.xlane.f32.xlu1 %v1967_v11 }
  0x54   : > { %292 = vadd.xlane.f32.xlu0 %v1972_v12 }
  0x55   : > { %294 = vadd.xlane.f32.xlu1 %v1975_v13 }
  0x58   : > { %324 = vadd.xlane.f32.xlu0 %v1980_v14 }
  0x59   : > { %326 = vadd.xlane.f32.xlu1 %v1983_v15 }
  0x5c   : > { %296 = vadd.xlane.f32.xlu0 %v1988_v16 }
  0x5d   : > { %298 = vadd.xlane.f32.xlu1 %v1991_v17 }
  0x60   : > { %328 = vadd.xlane.f32.xlu0 %v1996_v18 }
  0x61   : > { %330 = vadd.xlane.f32.xlu1 %v1999_v19 }
  0x64   : > { %300 = vadd.xlane.f32.xlu0 %v2004_v20 }
  0x65   : > { %302 = vadd.xlane.f32.xlu1 %v2007_v21 }
  0x68   : > { %332 = vadd.xlane.f32.xlu0 %v2012_v22 }
  0x69   : > { %334 = vadd.xlane.f32.xlu1 %v2015_v23 }
  0x6c   : > { %304 = vadd.xlane.f32.xlu0 %v2020_v24 }
  0x6d   : > { %306 = vadd.xlane.f32.xlu1 %v2023_v25 }
  0x70   : > { %336 = vadd.xlane.f32.xlu0 %v2028_v26 }
  0x71   : > { %338 = vadd.xlane.f32.xlu1 %v2031_v27 }
  0x74   : > { %308 = vadd.xlane.f32.xlu0 %v2036_v28 }
  0x75   : > { %310 = vadd.xlane.f32.xlu1 %v2039_v29 }
  0x78   : > { %340 = vadd.xlane.f32.xlu0 %v2044_v30 }
  0x79   : > { %342 = vadd.xlane.f32.xlu1 %v2047_v31 }
  0xc9   : > { %v281_v32 = vpop.xlane.xlu0 %280 }
  0xca   : > { %v313_v33 = vpop.xlane.xlu1 %312  ;;  %v345_v34 = vmul.f32 0.0078125, %v281_v32 }
  0xcb   : > { %v361_v35 = vmul.f32 0.0078125, %v313_v33 }
  0xcc   : > { %v2052_v36 = vsub.f32 %v1924_v0, %v345_v34 }
  0xcd   : > { %v2055_v37 = vsub.f32 %v1927_v1, %v361_v35  ;;  %v283_v38 = vpop.xlane.xlu0 %282 }
  0xce   : > { %v315_v39 = vpop.xlane.xlu1 %314  ;;  %v346_v40 = vmul.f32 0.0078125, %v283_v38  ;;  %v409_v41 = vmul.f32 %v2052_v36, %v2052_v36 }
  0xcf   : > { %v362_v42 = vmul.f32 0.0078125, %v315_v39  ;;  %v425_v44 = vmul.f32 %v2055_v37, %v2055_v37 }
  0xd0   : > { %v2060_v43 = vsub.f32 %v1932_v2, %v346_v40  ;;  %441 = vadd.xlane.f32.xlu0 %v409_v41 }
  0xd1   : > { %v2065_v45 = vsub.f32 %v1935_v3, %v362_v42  ;;  %v285_v46 = vpop.xlane.xlu0 %284 }
  0xd2   : > { %v287_v47 = vpop.xlane.xlu1 %286  ;;  %v347_v48 = vmul.f32 0.0078125, %v285_v46  ;;  %v410_v49 = vmul.f32 %v2060_v43, %v2060_v43 }
  0xd3   : > { %v348_v50 = vmul.f32 0.0078125, %v287_v47  ;;  %v426_v53 = vmul.f32 %v2065_v45, %v2065_v45 }
  0xd4   : > { %v2070_v51 = vsub.f32 %v1940_v4, %v347_v48  ;;  %473 = vadd.xlane.f32.xlu0 %v425_v44  ;;  %443 = vadd.xlane.f32.xlu1 %v410_v49 }
  0xd5   : > { %v2073_v52 = vsub.f32 %v1943_v5, %v348_v50  ;;  %v317_v54 = vpop.xlane.xlu0 %316 }
  0xd6   : > { %v319_v55 = vpop.xlane.xlu1 %318  ;;  %v363_v56 = vmul.f32 0.0078125, %v317_v54  ;;  %v411_v57 = vmul.f32 %v2070_v51, %v2070_v51 }
  0xd7   : > { %v364_v58 = vmul.f32 0.0078125, %v319_v55  ;;  %v412_v60 = vmul.f32 %v2073_v52, %v2073_v52 }
  0xd8   : > { %v2080_v59 = vsub.f32 %v1948_v6, %v363_v56  ;;  %475 = vadd.xlane.f32.xlu1 %v426_v53  ;;  %445 = vadd.xlane.f32.xlu0 %v411_v57 }
  0xd9   : > { %v2085_v61 = vsub.f32 %v1951_v7, %v364_v58  ;;  %v289_v62 = vpop.xlane.xlu0 %288 }
  0xda   : > { %v291_v63 = vpop.xlane.xlu1 %290  ;;  %v349_v0 = vmul.f32 0.0078125, %v289_v62  ;;  %v427_v1 = vmul.f32 %v2080_v59, %v2080_v59 }
  0xdb   : > { %v350_v2 = vmul.f32 0.0078125, %v291_v63  ;;  %v428_v5 = vmul.f32 %v2085_v61, %v2085_v61 }
  0xdc   : > { %v2090_v3 = vsub.f32 %v1954_v8, %v349_v0  ;;  %447 = vadd.xlane.f32.xlu1 %v412_v60  ;;  %477 = vadd.xlane.f32.xlu0 %v427_v1  ;;  %v1499_v0 = vld [vmem:[%s3059_s2] sm:$0xff]  }
  0xdd   : > { %v2093_v4 = vsub.f32 %v1957_v9, %v350_v2  ;;  %v321_v6 = vpop.xlane.xlu0 %320  ;;  %1385 = vmatprep.subr.bf16.mxu0 %v1499_v0  ;;  %1433 = vmatprep.subr.bf16.mxu1 %v1499_v0 }
  0xde   : > { %v323_v7 = vpop.xlane.xlu1 %322  ;;  %v365_v32 = vmul.f32 0.0078125, %v321_v6  ;;  %v413_v33 = vmul.f32 %v2090_v3, %v2090_v3  ;;  %1386 = vmatpush3.bf16.msra.mxu0 %v1499_v0  ;;  %1441 = vmatpush3.bf16.msra.mxu1 %v1499_v0 }
  0xdf   : > { %v366_v34 = vmul.f32 0.0078125, %v323_v7  ;;  %v414_v8 = vmul.f32 %v2093_v4, %v2093_v4 }
  0xe0   : > { %v2100_v35 = vsub.f32 %v1964_v10, %v365_v32  ;;  %479 = vadd.xlane.f32.xlu1 %v428_v5  ;;  %449 = vadd.xlane.f32.xlu0 %v413_v33  ;;  %v1500_v33 = vld [vmem:[%s3059_s2 + $0x8] sm:$0xff]  }
  0xe1   : > { %v2105_v9 = vsub.f32 %v1967_v11, %v366_v34  ;;  %v293_v38 = vpop.xlane.xlu0 %292  ;;  %1387 = vmatprep.subr.bf16.mxu0 %v1500_v33  ;;  %1434 = vmatprep.subr.bf16.mxu1 %v1500_v33 }
  0xe2   : > { %v295_v39 = vpop.xlane.xlu1 %294  ;;  %v351_v40 = vmul.f32 0.0078125, %v293_v38  ;;  %v429_v41 = vmul.f32 %v2100_v35, %v2100_v35  ;;  %1388 = vmatpush3.bf16.msra.mxu0 %v1500_v33  ;;  %1442 = vmatpush3.bf16.msra.mxu1 %v1500_v33 }
  0xe3   : > { %v352_v42 = vmul.f32 0.0078125, %v295_v39  ;;  %v430_v46 = vmul.f32 %v2105_v9, %v2105_v9 }
  0xe4   : > { %v2110_v44 = vsub.f32 %v1972_v12, %v351_v40  ;;  %451 = vadd.xlane.f32.xlu1 %v414_v8  ;;  %481 = vadd.xlane.f32.xlu0 %v429_v41 }
  0xe5   : > { %v2113_v10 = vsub.f32 %v1975_v13, %v352_v42  ;;  %v325_v11 = vpop.xlane.xlu0 %324  ;;  %v1501_v42 = vld [vmem:[%s3059_s2 + $0x10] sm:$0xff]  }
  0xe6   : > { %v327_v47 = vpop.xlane.xlu1 %326  ;;  %v367_v48 = vmul.f32 0.0078125, %v325_v11  ;;  %v415_v49 = vmul.f32 %v2110_v44, %v2110_v44  ;;  %1389 = vmatprep.subr.bf16.mxu0 %v1501_v42  ;;  %1435 = vmatprep.subr.bf16.mxu1 %v1501_v42 }
  0xe7   : > { %v368_v50 = vmul.f32 0.0078125, %v327_v47  ;;  %v416_v12 = vmul.f32 %v2113_v10, %v2113_v10  ;;  %1390 = vmatpush3.bf16.msra.mxu0 %v1501_v42  ;;  %1443 = vmatpush3.bf16.msra.mxu1 %v1501_v42 }
  0xe8   : > { %v2120_v53 = vsub.f32 %v1980_v14, %v367_v48  ;;  %483 = vadd.xlane.f32.xlu1 %v430_v46  ;;  %453 = vadd.xlane.f32.xlu0 %v415_v49 }
  0xe9   : > { %v2125_v13 = vsub.f32 %v1983_v15, %v368_v50  ;;  %v297_v54 = vpop.xlane.xlu0 %296 }
  0xea   : > { %v299_v55 = vpop.xlane.xlu1 %298  ;;  %v353_v56 = vmul.f32 0.0078125, %v297_v54  ;;  %v431_v57 = vmul.f32 %v2120_v53, %v2120_v53 }
  0xeb   : > { %v354_v58 = vmul.f32 0.0078125, %v299_v55  ;;  %v432_v62 = vmul.f32 %v2125_v13, %v2125_v13 }
  0xec   : > { %v2130_v60 = vsub.f32 %v1988_v16, %v353_v56  ;;  %455 = vadd.xlane.f32.xlu1 %v416_v12  ;;  %485 = vadd.xlane.f32.xlu0 %v431_v57  ;;  %v1502_v12 = vld [vmem:[%s3059_s2 + $0x18] sm:$0xff]  }
  0xed   : > { %v2133_v14 = vsub.f32 %v1991_v17, %v354_v58  ;;  %v329_v15 = vpop.xlane.xlu0 %328  ;;  %1391 = vmatprep.subr.bf16.mxu0 %v1502_v12  ;;  %1436 = vmatprep.subr.bf16.mxu1 %v1502_v12 }
  0xee   : > { %v331_v63 = vpop.xlane.xlu1 %330  ;;  %v369_v1 = vmul.f32 0.0078125, %v329_v15  ;;  %v417_v2 = vmul.f32 %v2130_v60, %v2130_v60  ;;  %1392 = vmatpush3.bf16.msra.mxu0 %v1502_v12  ;;  %v1503_v15 = vld [vmem:[%s3059_s2 + $0x20] sm:$0xff]   ;;  %1444 = vmatpush3.bf16.msra.mxu1 %v1502_v12 }
  0xef   : > { %v370_v16 = vmul.f32 0.0078125, %v331_v63  ;;  %v418_v17 = vmul.f32 %v2133_v14, %v2133_v14  ;;  %1393 = vmatprep.subr.bf16.mxu0 %v1503_v15  ;;  %1437 = vmatprep.subr.bf16.mxu1 %v1503_v15 }
  0xf0   : > { %v2143_v5 = vsub.f32 %v1996_v18, %v369_v1  ;;  %487 = vadd.xlane.f32.xlu1 %v432_v62  ;;  %457 = vadd.xlane.f32.xlu0 %v417_v2  ;;  %v2200_v2 = vld [vmem:[%s3061_s4] ss:$0 sm:$0xff] }
  0xf1   : > { %v2148_v6 = vsub.f32 %v1999_v19, %v370_v16  ;;  %v301_v7 = vpop.xlane.xlu0 %300 }
  0xf2   : > { %v303_v32 = vpop.xlane.xlu1 %302  ;;  %v355_v34 = vmul.f32 0.0078125, %v301_v7  ;;  %v433_v18 = vmul.f32 %v2143_v5, %v2143_v5  ;;  %1394 = vmatpush3.bf16.msra.mxu0 %v1503_v15  ;;  %1445 = vmatpush3.bf16.msra.mxu1 %v1503_v15 }
  0xf3   : > { %v356_v8 = vmul.f32 0.0078125, %v303_v32  ;;  %v434_v39 = vmul.f32 %v2148_v6, %v2148_v6  ;;  %v1504_v32 = vld [vmem:[%s3059_s2 + $0x28] sm:$0xff]  }
  0xf4   : > { %v2156_v38 = vsub.f32 %v2004_v20, %v355_v34  ;;  %459 = vadd.xlane.f32.xlu1 %v418_v17  ;;  %489 = vadd.xlane.f32.xlu0 %v433_v18 }
  0xf5   : > { %v2159_v19 = vsub.f32 %v2007_v21, %v356_v8  ;;  %v333_v40 = vpop.xlane.xlu0 %332  ;;  %1395 = vmatprep.subr.bf16.mxu0 %v1504_v32  ;;  %1438 = vmatprep.subr.bf16.mxu1 %v1504_v32 }
  0xf6   : > { %v335_v41 = vpop.xlane.xlu1 %334  ;;  %v371_v46 = vmul.f32 0.0078125, %v333_v40  ;;  %v419_v20 = vmul.f32 %v2156_v38, %v2156_v38  ;;  %1396 = vmatpush3.bf16.msra.mxu0 %v1504_v32  ;;  %1446 = vmatpush3.bf16.msra.mxu1 %v1504_v32  ;;  %v2240_v32 = vmul.f32 %v2200_v2, %v2055_v37 }
  0xf7   : > { %v372_v11 = vmul.f32 0.0078125, %v335_v41  ;;  %v420_v47 = vmul.f32 %v2159_v19, %v2159_v19 }
  0xf8   : > { %v2169_v21 = vsub.f32 %v2012_v22, %v371_v46  ;;  %491 = vadd.xlane.f32.xlu1 %v434_v39  ;;  %461 = vadd.xlane.f32.xlu0 %v419_v20  ;;  %v1505_v46 = vld [vmem:[%s3059_s2 + $0x30] sm:$0xff]  }
  0xf9   : > { %v2174_v48 = vsub.f32 %v2015_v23, %v372_v11  ;;  %v305_v49 = vpop.xlane.xlu0 %304  ;;  %1397 = vmatprep.subr.bf16.mxu0 %v1505_v46  ;;  %1439 = vmatprep.subr.bf16.mxu1 %v1505_v46 }
  0xfa   : > { %v307_v50 = vpop.xlane.xlu1 %306  ;;  %v357_v54 = vmul.f32 0.0078125, %v305_v49  ;;  %v435_v22 = vmul.f32 %v2169_v21, %v2169_v21  ;;  %1398 = vmatpush3.bf16.msra.mxu0 %v1505_v46  ;;  %1447 = vmatpush3.bf16.msra.mxu1 %v1505_v46 }
  0xfb   : > { %v358_v55 = vmul.f32 0.0078125, %v307_v50  ;;  %v436_v57 = vmul.f32 %v2174_v48, %v2174_v48 }
  0xfc   : > { %v2182_v56 = vsub.f32 %v2020_v24, %v357_v54  ;;  %463 = vadd.xlane.f32.xlu1 %v420_v47  ;;  %493 = vadd.xlane.f32.xlu0 %v435_v22 }
  0xfd   : > { %v2185_v23 = vsub.f32 %v2023_v25, %v358_v55  ;;  %v337_v58 = vpop.xlane.xlu0 %336 }
  0xfe   : > { %3072 = vst [vmem:[#allocation10_spill] sm:$0xff] %v2182_v56  ;;  %v339_v62 = vpop.xlane.xlu1 %338  ;;  %v373_v63 = vmul.f32 0.0078125, %v337_v58  ;;  %v421_v24 = vmul.f32 %v2182_v56, %v2182_v56 }
  0xff   : > { %3073 = vst [vmem:[#allocation11_spill] sm:$0xff] %v2185_v23  ;;  %v374_v0 = vmul.f32 0.0078125, %v339_v62  ;;  %v422_v1 = vmul.f32 %v2185_v23, %v2185_v23 }
 0x100   : > { %v405_v25 = vsub.f32 %v2028_v26, %v373_v63  ;;  %495 = vadd.xlane.f32.xlu1 %v436_v57  ;;  %465 = vadd.xlane.f32.xlu0 %v421_v24 }
 0x101   : > { %v406_v16 = vsub.f32 %v2031_v27, %v374_v0  ;;  %v309_v17 = vpop.xlane.xlu0 %308 }
 0x102   : > { %v311_v7 = vpop.xlane.xlu1 %310  ;;  %v2207_v26 = vmul.f32 %v2200_v2, %v405_v25  ;;  %v359_v33 = vmul.f32 0.0078125, %v309_v17  ;;  %v437_v34 = vmul.f32 %v405_v25, %v405_v25 }
 0x103   : > { %v360_v18 = vmul.f32 0.0078125, %v311_v7  ;;  %v2210_v8 = vmul.f32 %v2200_v2, %v406_v16  ;;  %v438_v40 = vmul.f32 %v406_v16, %v406_v16  ;;  %v2236_v7 = vmul.f32 %v2200_v2, %v2052_v36 }
 0x104   : > { %3074 = vst [vmem:[#allocation12_spill] sm:$0xff] %v2207_v26  ;;  %v391_v27 = vsub.f32 %v2036_v28, %v359_v33  ;;  %467 = vadd.xlane.f32.xlu1 %v422_v1  ;;  %497 = vadd.xlane.f32.xlu0 %v437_v34  ;;  %v2244_v33 = vmul.f32 %v2200_v2, %v2060_v43 }
 0x105   : > { %3075 = vst [vmem:[#allocation13_spill] sm:$0xff] %v2210_v8  ;;  %v392_v39 = vsub.f32 %v2039_v29, %v360_v18  ;;  %v341_v41 = vpop.xlane.xlu0 %340  ;;  %v2250_v18 = vmul.f32 %v2200_v2, %v2065_v45  ;;  %v2258_v36 = vmul.f32 %v2200_v2, %v2073_v52  ;;  %v2268_v45 = vmul.f32 %v2200_v2, %v2085_v61 }
 0x106   : > { %v343_v42 = vpop.xlane.xlu1 %342  ;;  %v2218_v20 = vmul.f32 %v2200_v2, %v391_v27  ;;  %v375_v28 = vmul.f32 0.0078125, %v341_v41  ;;  %v423_v47 = vmul.f32 %v391_v27, %v391_v27  ;;  %v2254_v27 = vmul.f32 %v2200_v2, %v2070_v51 }
 0x107   : > { %v2221_v11 = vmul.f32 %v2200_v2, %v392_v39  ;;  %v376_v49 = vmul.f32 0.0078125, %v343_v42  ;;  %v424_v50 = vmul.f32 %v392_v39, %v392_v39  ;;  %v2264_v41 = vmul.f32 %v2200_v2, %v2080_v59 }
 0x108   : > { %3076 = vst [vmem:[#allocation14_spill] sm:$0xff] %v2218_v20  ;;  %v407_v29 = vsub.f32 %v2044_v30, %v375_v28  ;;  %499 = vadd.xlane.f32.xlu1 %v438_v40  ;;  %469 = vadd.xlane.f32.xlu0 %v423_v47  ;;  %v1506_v30 = vld [vmem:[%s3059_s2 + $0x38] sm:$0xff]   ;;  %v2274_v52 = vmul.f32 %v2200_v2, %v2090_v3 }
 0x109   : > { %3077 = vst [vmem:[#allocation15_spill] sm:$0xff] %v2221_v11  ;;  %v408_v12 = vsub.f32 %v2047_v31, %v376_v49  ;;  %1399 = vmatprep.subr.bf16.mxu0 %v1506_v30  ;;  %1440 = vmatprep.subr.bf16.mxu1 %v1506_v30  ;;  %v2280_v47 = vmul.f32 %v2200_v2, %v2093_v4 }
 0x10a   : > { %v2226_v54 = vmul.f32 %v2200_v2, %v407_v29  ;;  %v439_v22 = vmul.f32 %v407_v29, %v407_v29  ;;  %1400 = vmatpush3.bf16.msra.mxu0 %v1506_v30  ;;  %1448 = vmatpush3.bf16.msra.mxu1 %v1506_v30  ;;  %v2291_v4 = vmul.f32 %v2200_v2, %v2100_v35 }
 0x10b   : > { %v2229_v55 = vmul.f32 %v2200_v2, %v408_v12  ;;  %v440_v57 = vmul.f32 %v408_v12, %v408_v12  ;;  %v2298_v30 = vmul.f32 %v2200_v2, %v2105_v9  ;;  %v2309_v35 = vmul.f32 %v2200_v2, %v2113_v10 }
 0x10c   : > { %3078 = vst [vmem:[#allocation16_spill] sm:$0xff] %v2226_v54  ;;  %471 = vadd.xlane.f32.xlu1 %v424_v50  ;;  %501 = vadd.xlane.f32.xlu0 %v439_v22  ;;  %v2330_v10 = vmul.f32 %v2200_v2, %v2143_v5  ;;  %v2350_v5 = vmul.f32 %v2200_v2, %v2169_v21 }
 0x10d   : > { %3079 = vst [vmem:[#allocation17_spill] sm:$0xff] %v2229_v55 }
 0x10e   : > { %3083 = vst [vmem:[#allocation21_spill] sm:$0xff] %v2330_v10  ;;  %3087 = vst [vmem:[#allocation25_spill] sm:$0xff] %v2350_v5 }
 0x110   : > { %503 = vadd.xlane.f32.xlu1 %v440_v57 }
 0x15d   : > { %v442_v31 = vpop.xlane.xlu0 %441 }
 0x15e   : > { %v505_v58 = vmul.f32 0.007874016, %v442_v31 }
 0x160   : > { %1507 = vrsqrt.f32 %v505_v58  ;;  %vm539_vm0 = vcmp.eq.f32.partialorder %v505_v58, inf  ;;  %v542_v59 = vand.u32 2147483648, %v505_v58  ;;  %vm541_vm2 = vcmp.eq.f32.partialorder %v505_v58, 0.0 }
 0x161   : > { %v444_v62 = vpop.xlane.xlu1 %443  ;;  %v474_v15 = vpop.xlane.xlu0 %473 }
 0x162   : > { %v506_v63 = vmul.f32 0.007874016, %v444_v62  ;;  %v2246_v34 = vmul.f32 0.007874016, %v474_v15  ;;  %v2305_v62 = vmul.f32 %v2200_v2, %v2110_v44  ;;  %v2313_v15 = vmul.f32 %v2200_v2, %v2120_v53 }
 0x163   : > { %v2325_v44 = vmul.f32 %v2200_v2, %v2133_v14  ;;  %v2334_v53 = vmul.f32 %v2200_v2, %v2148_v6  ;;  %v2343_v14 = vmul.f32 %v2200_v2, %v2159_v19  ;;  %v2354_v6 = vmul.f32 %v2200_v2, %v2174_v48 }
 0x164   : > { %1509 = vrsqrt.f32 %v506_v63  ;;  %vm546_vm1 = vcmp.eq.f32.partialorder %v506_v63, inf  ;;  %v549_v49 = vand.u32 2147483648, %v506_v63  ;;  %vm548_vm3 = vcmp.eq.f32.partialorder %v506_v63, 0.0 }
 0x165   : > { %v476_v24 = vpop.xlane.xlu1 %475  ;;  %v446_v0 = vpop.xlane.xlu0 %445  ;;  %1511 = vrsqrt.f32 %v2246_v34  ;;  %3082 = vst [vmem:[#allocation20_spill] sm:$0xff] %v2325_v44  ;;  %3084 = vst [vmem:[#allocation22_spill] sm:$0xff] %v2334_v53  ;;  %vm651_vm4 = vcmp.eq.f32.partialorder %v2246_v34, inf  ;;  %v654_v19 = vand.u32 2147483648, %v2246_v34  ;;  %vm653_vm7 = vcmp.eq.f32.partialorder %v2246_v34, 0.0 }
 0x166   : > { %v2260_v37 = vmul.f32 0.007874016, %v476_v24  ;;  %v2270_v51 = vmul.f32 0.007874016, %v446_v0  ;;  %v2317_v0 = vmul.f32 %v2200_v2, %v2125_v13  ;;  %3086 = vst [vmem:[#allocation24_spill] sm:$0xff] %v2343_v14  ;;  %3088 = vst [vmem:[#allocation26_spill] sm:$0xff] %v2354_v6 }
 0x168   : > { %1513 = vrsqrt.f32 %v2260_v37  ;;  %3080 = vst [vmem:[#allocation18_spill] sm:$0xff] %v2317_v0  ;;  %vm658_vm5 = vcmp.eq.f32.partialorder %v2260_v37, inf  ;;  %vm553_vm6 = vcmp.eq.f32.partialorder %v2270_v51, inf  ;;  %vm660_vm9 = vcmp.eq.f32.partialorder %v2260_v37, 0.0 }
 0x169   : > { %v448_v25 = vpop.xlane.xlu1 %447  ;;  %v478_v1 = vpop.xlane.xlu0 %477  ;;  %1515 = vrsqrt.f32 %v2270_v51  ;;  %vm555_vm14 = vcmp.eq.f32.partialorder %v2270_v51, 0.0 }
 0x16a   : > { %v1508_v16 = vpop.eup %1507  ;;  %v2276_v46 = vmul.f32 0.007874016, %v448_v25  ;;  %v2283_v61 = vmul.f32 0.007874016, %v478_v1  ;;  %v2321_v25 = vmul.f32 %v2200_v2, %v2130_v60  ;;  %v2339_v60 = vmul.f32 %v2200_v2, %v2156_v38 }
 0x16b   : > { %v538_v17 = vmul.f32 %v1508_v16, %v505_v58 }
 0x16c   : > { %1517 = vrsqrt.f32 %v2276_v46  ;;  %3081 = vst [vmem:[#allocation19_spill] sm:$0xff] %v2321_v25  ;;  %3085 = vst [vmem:[#allocation23_spill] sm:$0xff] %v2339_v60  ;;  %vm560_vm8 = vcmp.eq.f32.partialorder %v2276_v46, inf  ;;  %vm665_vm10 = vcmp.eq.f32.partialorder %v2283_v61, inf }
 0x16d   : > { %v480_v39 = vpop.xlane.xlu1 %479  ;;  %v450_v40 = vpop.xlane.xlu0 %449  ;;  %v540_v28 = vsel %vm539_vm0, %v505_v58, %v538_v17  ;;  %1519 = vrsqrt.f32 %v2283_v61 }
 0x16e   : > { %v1510_v43 = vpop.eup %1509  ;;  %v2287_v50 = vmul.f32 0.007874016, %v480_v39  ;;  %v543_v12 = vsel %vm541_vm2, %v542_v59, %v540_v28  ;;  %v2294_v57 = vmul.f32 0.007874016, %v450_v40 }
 0x16f   : > { %v545_v42 = vmul.f32 %v1510_v43, %v506_v63  ;;  %v761_v24 = vadd.f32 1e-06, %v543_v12  ;;  %v1512_v17 = vpop.eup %1511 }
 0x170   : > { %1521 = vrsqrt.f32 %v2287_v50  ;;  %v650_v59 = vmul.f32 %v1512_v17, %v2246_v34  ;;  %vm672_vm11 = vcmp.eq.f32.partialorder %v2287_v50, inf  ;;  %vm567_vm12 = vcmp.eq.f32.partialorder %v2294_v57, inf }
 0x171   : > { %v452_v29 = vpop.xlane.xlu1 %451  ;;  %v482_v3 = vpop.xlane.xlu0 %481  ;;  %v547_v22 = vsel %vm546_vm1, %v506_v63, %v545_v42  ;;  %1523 = vrsqrt.f32 %v2294_v57  ;;  %vm562_vm1 = vcmp.eq.f32.partialorder %v2276_v46, 0.0 }
 0x172   : > { %v2301_v31 = vmul.f32 0.007874016, %v452_v29  ;;  %v550_v58 = vsel %vm548_vm3, %v549_v49, %v547_v22  ;;  %v2346_v1 = vmul.f32 0.007874016, %v482_v3  ;;  %v1514_v21 = vpop.eup %1513  ;;  %v652_v49 = vsel %vm651_vm4, %v2246_v34, %v650_v59 }
 0x173   : > { %v762_v13 = vadd.f32 1e-06, %v550_v58  ;;  %v1516_v43 = vpop.eup %1515  ;;  %v657_v58 = vmul.f32 %v1514_v21, %v2260_v37 }
 0x174   : > { %1525 = vrsqrt.f32 %v2301_v31  ;;  %vm574_vm13 = vcmp.eq.f32.partialorder %v2301_v31, inf  ;;  %vm679_vm15 = vcmp.eq.f32.partialorder %v2346_v1, inf }
 0x175   : > { %v484_v63 = vpop.xlane.xlu1 %483  ;;  %v454_v9 = vpop.xlane.xlu0 %453  ;;  %1527 = vrcp.f32 %v761_v24  ;;  %v552_v24 = vmul.f32 %v1516_v43, %v2270_v51 }
 0x176   : > { %v2360_v40 = vmul.f32 0.007874016, %v484_v63  ;;  %v2364_v2 = vmul.f32 0.007874016, %v454_v9  ;;  %1529 = vrcp.f32 %v762_v13  ;;  %v1518_v28 = vpop.eup %1517 }
 0x177   : > { %1531 = vrsqrt.f32 %v2346_v1  ;;  %v1520_v22 = vpop.eup %1519  ;;  %v2407_v48 = vsel %vm553_vm6, %v2270_v51, %v552_v24  ;;  %v655_v24 = vsel %vm653_vm7, %v654_v19, %v652_v49  ;;  %vm667_vm7 = vcmp.eq.f32.partialorder %v2283_v61, 0.0 }
 0x178   : > { %1533 = vrsqrt.f32 %v2360_v40  ;;  %vm686_vm0 = vcmp.eq.f32.partialorder %v2360_v40, inf  ;;  %vm581_vm2 = vcmp.eq.f32.partialorder %v2364_v2, inf }
 0x179   : > { %v456_v38 = vpop.xlane.xlu1 %455  ;;  %v486_v16 = vpop.xlane.xlu0 %485  ;;  %1535 = vrsqrt.f32 %v2364_v2 }
 0x17a   : > { %v2369_v42 = vmul.f32 0.007874016, %v456_v38  ;;  %v2375_v29 = vmul.f32 0.007874016, %v486_v16  ;;  %v1522_v38 = vpop.eup %1521  ;;  %v559_v16 = vmul.f32 %v1518_v28, %v2276_v46 }
 0x17b   : > { %v1524_v21 = vpop.eup %1523 }
 0x17c   : > { %1537 = vrsqrt.f32 %v2369_v42  ;;  %v566_v59 = vmul.f32 %v1524_v21, %v2294_v57  ;;  %vm588_vm3 = vcmp.eq.f32.partialorder %v2369_v42, inf  ;;  %vm693_vm4 = vcmp.eq.f32.partialorder %v2375_v29, inf }
 0x17d   : > { %v488_v3 = vpop.xlane.xlu1 %487  ;;  %v458_v12 = vpop.xlane.xlu0 %457  ;;  %1539 = vrsqrt.f32 %v2375_v29 }
 0x17e   : > { %v2380_v9 = vmul.f32 0.007874016, %v488_v3  ;;  %v2389_v17 = vmul.f32 0.007874016, %v458_v12  ;;  %v664_v3 = vmul.f32 %v1520_v22, %v2283_v61  ;;  %v1526_v28 = vpop.eup %1525  ;;  %v659_v22 = vsel %vm658_vm5, %v2260_v37, %v657_v58 }
 0x17f   : > { %v1528_v43 = vpop.eup %1527  ;;  %v671_v58 = vmul.f32 %v1522_v38, %v2287_v50  ;;  %v3089_v38 = vand.u32 2147483648, %v2260_v37  ;;  %v573_v34 = vmul.f32 %v1526_v28, %v2301_v31  ;;  %v777_v28 = vadd.f32 1e-06, %v655_v24 }
 0x180   : > { %1541 = vrsqrt.f32 %v2380_v9  ;;  %v1530_v39 = vpop.eup %1529  ;;  %v864_v49 = vmul.f32 %v1528_v43, %v2236_v7  ;;  %vm700_vm5 = vcmp.eq.f32.partialorder %v2380_v9, inf  ;;  %vm595_vm6 = vcmp.eq.f32.partialorder %v2389_v17, inf }
 0x181   : > { %v460_v63 = vpop.xlane.xlu1 %459  ;;  %v490_v13 = vpop.xlane.xlu0 %489  ;;  %1543 = vrsqrt.f32 %v2389_v17  ;;  %v662_v20 = vsel %vm660_vm9, %v3089_v38, %v659_v22  ;;  %v865_v37 = vmul.f32 %v1530_v39, %v2244_v33  ;;  %v2462_v39 = vsel %vm567_vm12, %v2294_v57, %v566_v59 }
 0x182   : > { %v2399_v12 = vmul.f32 0.007874016, %v460_v63  ;;  %v2411_v55 = vmul.f32 0.007874016, %v490_v13  ;;  %v2417_v63 = vsel %vm560_vm8, %v2276_v46, %v559_v16  ;;  %v2427_v13 = vsel %vm665_vm10, %v2283_v61, %v664_v3  ;;  %v1532_v8 = vpop.eup %1531  ;;  %v2449_v3 = vld [vmem:[%s3062_s5] ss:$0 sm:$0xff] }
 0x183   : > { %v1534_v22 = vpop.eup %1533  ;;  %v778_v43 = vadd.f32 1e-06, %v662_v20  ;;  %v678_v24 = vmul.f32 %v1532_v8, %v2346_v1  ;;  %v2472_v20 = vsel %vm574_vm13, %v2301_v31, %v573_v34  ;;  %v903_v8 = vadd.f32 %v2449_v3, %v864_v49 }
 0x184   : > { %1545 = vrsqrt.f32 %v2399_v12  ;;  %v1536_v33 = vpop.eup %1535  ;;  %v904_v59 = vadd.f32 %v2449_v3, %v865_v37  ;;  %vm674_vm8 = vcmp.eq.f32.partialorder %v2287_v50, 0.0  ;;  %vm602_vm9 = vcmp.eq.f32.partialorder %v2399_v12, inf }
 0x185   : > { %v492_v54 = vpop.xlane.xlu1 %491  ;;  %v462_v11 = vpop.xlane.xlu0 %461  ;;  %1547 = vrsqrt.f32 %v2411_v55  ;;  %v2489_v49 = vsel %vm679_vm15, %v2346_v1, %v678_v24  ;;  %v580_v37 = vmul.f32 %v1536_v33, %v2364_v2  ;;  %vm707_vm10 = vcmp.eq.f32.partialorder %v2411_v55, inf }
 0x186   : > { %v2438_v19 = vmul.f32 0.007874016, %v492_v54  ;;  %v2443_v21 = vmul.f32 0.007874016, %v462_v11  ;;  %v2454_v54 = vsel %vm672_vm11, %v2287_v50, %v671_v58  ;;  %v1538_v11 = vpop.eup %1537  ;;  %v685_v58 = vmul.f32 %v1534_v22, %v2360_v40 }
 0x187   : > { %v1540_v16 = vpop.eup %1539  ;;  %v935_v5 = vpack.c.bf16 %v904_v59, %v903_v8  ;;  %v587_v8 = vmul.f32 %v1538_v11, %v2369_v42  ;;  %vm569_vm12 = vcmp.eq.f32.partialorder %v2294_v57, 0.0 }
 0x188   : > { %1549 = vrsqrt.f32 %v2438_v19  ;;  %v692_v24 = vmul.f32 %v1540_v16, %v2375_v29  ;;  %v2506_v33 = vsel %vm686_vm0, %v2360_v40, %v685_v58  ;;  %vm714_vm11 = vcmp.eq.f32.partialorder %v2438_v19, inf }
 0x189   : > { %v464_v38 = vpop.xlane.xlu1 %463  ;;  %v494_v7 = vpop.xlane.xlu0 %493  ;;  %1551 = vrsqrt.f32 %v2443_v21  ;;  %1401 = vmatprep.mubr.bf16.mxu0 %v935_v5  ;;  %v3091_v5 = vand.u32 2147483648, %v2276_v46  ;;  %v2532_v46 = vsel %vm588_vm3, %v2369_v42, %v587_v8  ;;  %vm609_vm13 = vcmp.eq.f32.partialorder %v2443_v21, inf }
 0x18a   : > { %v2479_v26 = vmul.f32 0.007874016, %v464_v38  ;;  %v2481_v23 = vmul.f32 0.007874016, %v494_v7  ;;  %1553 = vrcp.f32 %v777_v28  ;;  %v1542_v6 = vpop.eup %1541  ;;  %v3090_v7 = vand.u32 2147483648, %v2270_v51 }
 0x18b   : > { %1555 = vrcp.f32 %v778_v43  ;;  %v1544_v43 = vpop.eup %1543  ;;  %v699_v51 = vmul.f32 %v1542_v6, %v2380_v9  ;;  %v564_v58 = vsel %vm562_vm1, %v3091_v5, %v2417_v63  ;;  %v2524_v6 = vsel %vm581_vm2, %v2364_v2, %v580_v37 }
 0x18c   : > { %1557 = vrsqrt.f32 %v2479_v26  ;;  %v557_v38 = vsel %vm555_vm14, %v3090_v7, %v2407_v48  ;;  %v2537_v63 = vsel %vm693_vm4, %v2375_v29, %v692_v24  ;;  %v764_v5 = vadd.f32 1e-06, %v564_v58 }
 0x18d   : > { %v496_v22 = vpop.xlane.xlu1 %495  ;;  %v466_v28 = vpop.xlane.xlu0 %465  ;;  %1559 = vrsqrt.f32 %v2481_v23  ;;  %v763_v59 = vadd.f32 1e-06, %v557_v38  ;;  %vm616_vm14 = vcmp.eq.f32.partialorder %v2479_v26, inf  ;;  %vm721_vm15 = vcmp.eq.f32.partialorder %v2481_v23, inf }
 0x18e   : > { %v2511_v7 = vmul.f32 0.007874016, %v496_v22  ;;  %v1546_v11 = vpop.eup %1545  ;;  %v2514_v16 = vmul.f32 0.007874016, %v466_v28  ;;  %v594_v22 = vmul.f32 %v1544_v43, %v2389_v17  ;;  %v2546_v43 = vsel %vm700_vm5, %v2380_v9, %v699_v51 }
 0x18f   : > { %v1548_v34 = vpop.eup %1547  ;;  %v601_v8 = vmul.f32 %v1546_v11, %v2399_v12  ;;  %vm576_vm0 = vcmp.eq.f32.partialorder %v2301_v31, 0.0  ;;  %vm681_vm1 = vcmp.eq.f32.partialorder %v2346_v1, 0.0  ;;  %vm688_vm4 = vcmp.eq.f32.partialorder %v2360_v40, 0.0 }
 0x190   : > { %1561 = vrsqrt.f32 %v2511_v7  ;;  %v706_v37 = vmul.f32 %v1548_v34, %v2411_v55  ;;  %v2559_v51 = vsel %vm595_vm6, %v2389_v17, %v594_v22  ;;  %v3093_v34 = vand.u32 2147483648, %v2287_v50 }
 0x191   : > { %v468_v28 = vpop.xlane.xlu1 %467  ;;  %v498_v56 = vpop.xlane.xlu0 %497  ;;  %1563 = vrsqrt.f32 %v2514_v16  ;;  %vm728_vm2 = vcmp.eq.f32.partialorder %v2511_v7, inf  ;;  %vm623_vm3 = vcmp.eq.f32.partialorder %v2514_v16, inf  ;;  %vm583_vm6 = vcmp.eq.f32.partialorder %v2364_v2, 0.0 }
 0x192   : > { %v1550_v38 = vpop.eup %1549  ;;  %1565 = vrcp.f32 %v763_v59  ;;  %v2552_v14 = vmul.f32 0.007874016, %v468_v28  ;;  %v2554_v60 = vmul.f32 0.007874016, %v498_v56  ;;  %v3092_v59 = vand.u32 2147483648, %v2283_v61 }
 0x193   : > { %v1552_v48 = vpop.eup %1551  ;;  %1567 = vrcp.f32 %v764_v5  ;;  %v713_v11 = vmul.f32 %v1550_v38, %v2438_v19  ;;  %v2584_v61 = vsel %vm602_vm9, %v2399_v12, %v601_v8 }
 0x194   : > { %v1554_v53 = vpop.eup %1553  ;;  %1569 = vrsqrt.f32 %v2552_v14  ;;  %v669_v22 = vsel %vm667_vm7, %v3092_v59, %v2427_v13  ;;  %v608_v13 = vmul.f32 %v1552_v48, %v2443_v21  ;;  %vm630_vm5 = vcmp.eq.f32.partialorder %v2552_v14, inf }
 0x195   : > { %v1556_v58 = vpop.eup %1555  ;;  %v880_v56 = vmul.f32 %v1554_v53, %v2240_v32  ;;  %1571 = vrsqrt.f32 %v2554_v60  ;;  %v676_v32 = vsel %vm674_vm8, %v3093_v34, %v2454_v54  ;;  %v500_v53 = vpop.xlane.xlu1 %499  ;;  %v779_v34 = vadd.f32 1e-06, %v669_v22 }
 0x196   : > { %v1558_v28 = vpop.eup %1557  ;;  %v881_v5 = vmul.f32 %v1556_v58, %v2250_v18  ;;  %v470_v24 = vpop.xlane.xlu0 %469  ;;  %v2589_v18 = vsel %vm707_vm10, %v2411_v55, %v706_v37  ;;  %v780_v59 = vadd.f32 1e-06, %v676_v32  ;;  %v2599_v37 = vmul.f32 0.007874016, %v500_v53 }
 0x197   : > { %v1560_v10 = vpop.eup %1559  ;;  %v615_v50 = vmul.f32 %v1558_v28, %v2479_v26  ;;  %v919_v54 = vadd.f32 %v2449_v3, %v880_v56  ;;  %v2601_v44 = vmul.f32 0.007874016, %v470_v24  ;;  %v2606_v38 = vsel %vm714_vm11, %v2438_v19, %v713_v11 }
 0x198   : > { %v920_v58 = vadd.f32 %v2449_v3, %v881_v5  ;;  %v720_v8 = vmul.f32 %v1560_v10, %v2481_v23  ;;  %1573 = vrcp.f32 %v779_v34  ;;  %v2614_v24 = vsel %vm609_vm13, %v2443_v21, %v608_v13 }
 0x199   : > { %1575 = vrcp.f32 %v780_v59  ;;  %v3094_v11 = vand.u32 2147483648, %v2294_v57  ;;  %vm735_vm7 = vcmp.eq.f32.partialorder %v2554_v60, inf  ;;  %v472_v53 = vpop.xlane.xlu1 %471  ;;  %vm590_vm8 = vcmp.eq.f32.partialorder %v2369_v42, 0.0 }
 0x19a   : > { %v1562_v48 = vpop.eup %1561  ;;  %v943_v28 = vpack.c.bf16 %v920_v58, %v919_v54  ;;  %1577 = vrsqrt.f32 %v2599_v37  ;;  %v502_v13 = vpop.xlane.xlu0 %501  ;;  %v2631_v57 = vsel %vm616_vm14, %v2479_v26, %v615_v50  ;;  %v2648_v25 = vmul.f32 0.007874016, %v472_v53 }
 0x19b   : > { %v1564_v10 = vpop.eup %1563  ;;  %v571_v22 = vsel %vm569_vm12, %v3094_v11, %v2462_v39  ;;  %v2636_v39 = vsel %vm721_vm15, %v2481_v23, %v720_v8  ;;  %v727_v58 = vmul.f32 %v1562_v48, %v2511_v7  ;;  %1579 = vrsqrt.f32 %v2601_v44 }
 0x19c   : > { %1417 = vmatprep.mubr.bf16.mxu1 %v943_v28  ;;  %v1566_v54 = vpop.eup %1565  ;;  %v622_v59 = vmul.f32 %v1564_v10, %v2514_v16  ;;  %v3095_v11 = vand.u32 2147483648, %v2301_v31  ;;  %v765_v32 = vadd.f32 1e-06, %v571_v22  ;;  %v2650_v48 = vmul.f32 0.007874016, %v502_v13 }
 0x19d   : > { %v1568_v34 = vpop.eup %1567  ;;  %v866_v28 = vmul.f32 %v1566_v54, %v2254_v27  ;;  %vm742_vm9 = vcmp.eq.f32.partialorder %v2599_v37, inf  ;;  %v745_v54 = vand.u32 2147483648, %v2599_v37  ;;  %vm695_vm10 = vcmp.eq.f32.partialorder %v2375_v29, 0.0  ;;  %v504_v53 = vpop.xlane.xlu1 %503 }
 0x19e   : > { %v578_v50 = vsel %vm576_vm0, %v3095_v11, %v2472_v20  ;;  %v1570_v5 = vpop.eup %1569  ;;  %v867_v8 = vmul.f32 %v1568_v34, %v2258_v36  ;;  %1581 = vrcp.f32 %v765_v32  ;;  %vm702_vm11 = vcmp.eq.f32.partialorder %v2380_v9, 0.0 }
 0x19f   : > { %v766_v56 = vadd.f32 1e-06, %v578_v50  ;;  %v1572_v0 = vpop.eup %1571  ;;  %v905_v10 = vadd.f32 %v2449_v3, %v866_v28  ;;  %v629_v27 = vmul.f32 %v1570_v5, %v2552_v14  ;;  %v3096_v20 = vand.u32 2147483648, %v2346_v1 }
 0x1a0   : > { %v906_v36 = vadd.f32 %v2449_v3, %v867_v8  ;;  %v734_v31 = vmul.f32 %v1572_v0, %v2554_v60  ;;  %v2668_v5 = vsel %vm728_vm2, %v2511_v7, %v727_v58  ;;  %vm637_vm12 = vcmp.eq.f32.partialorder %v2601_v44, inf }
 0x1a1   : > { %1583 = vrcp.f32 %v766_v56  ;;  %v683_v22 = vsel %vm681_vm1, %v3096_v20, %v2489_v49  ;;  %v640_v32 = vand.u32 2147483648, %v2601_v44  ;;  %vm597_vm13 = vcmp.eq.f32.partialorder %v2389_v17, 0.0 }
 0x1a2   : > { %1585 = vrsqrt.f32 %v2648_v25  ;;  %vm604_vm14 = vcmp.eq.f32.partialorder %v2399_v12, 0.0  ;;  %vm709_vm15 = vcmp.eq.f32.partialorder %v2411_v55, 0.0  ;;  %v2679_v0 = vsel %vm623_vm3, %v2514_v16, %v622_v59  ;;  %v1574_v56 = vpop.eup %1573 }
 0x1a3   : > { %v936_v1 = vpack.c.bf16 %v906_v36, %v905_v10  ;;  %v2684_v49 = vsel %vm630_vm5, %v2552_v14, %v629_v27  ;;  %1587 = vrsqrt.f32 %v2650_v48  ;;  %v2690_v13 = vsel %vm735_vm7, %v2554_v60, %v734_v31  ;;  %v1576_v11 = vpop.eup %1575 }
 0x1a4   : > { %v647_v58 = vand.u32 2147483648, %v2648_v25  ;;  %v3097_v34 = vand.u32 2147483648, %v2360_v40  ;;  %v781_v28 = vadd.f32 1e-06, %v683_v22  ;;  %v882_v50 = vmul.f32 %v1574_v56, %v2264_v41  ;;  %v1578_v31 = vpop.eup %1577 }
 0x1a5   : > { %1402 = vmatmul.mubr.bf16.vlgmr.msra.gmra.mrb[0].mxu0 %v936_v1  ;;  %v2699_v10 = vmul.f32 0.007874016, %v504_v53  ;;  %v3098_v27 = vand.u32 2147483648, %v2364_v2  ;;  %vm716_vm0 = vcmp.eq.f32.partialorder %v2438_v19, 0.0  ;;  %v883_v40 = vmul.f32 %v1576_v11, %v2268_v45  ;;  %v1580_v22 = vpop.eup %1579 }
 0x1a6   : > { %v690_v59 = vsel %vm688_vm4, %v3097_v34, %v2506_v33  ;;  %vm644_vm1 = vcmp.eq.f32.partialorder %v2648_v25, inf  ;;  %1589 = vrcp.f32 %v781_v28  ;;  %v3099_v41 = vand.u32 2147483648, %v2369_v42 }
 0x1a7   : > { %v782_v8 = vadd.f32 1e-06, %v690_v59  ;;  %v585_v36 = vsel %vm583_vm6, %v3098_v27, %v2524_v6  ;;  %v741_v53 = vmul.f32 %v1578_v31, %v2599_v37  ;;  %vm749_vm2 = vcmp.eq.f32.partialorder %v2650_v48, inf }
 0x1a8   : > { %v592_v33 = vsel %vm590_vm8, %v3099_v41, %v2532_v46  ;;  %v767_v20 = vadd.f32 1e-06, %v585_v36  ;;  %v752_v2 = vand.u32 2147483648, %v2650_v48  ;;  %vm611_vm3 = vcmp.eq.f32.partialorder %v2443_v21, 0.0  ;;  %v1582_v34 = vpop.eup %1581 }
 0x1a9   : > { %1591 = vrcp.f32 %v782_v8  ;;  %vm618_vm4 = vcmp.eq.f32.partialorder %v2479_v26, 0.0  ;;  %v921_v45 = vadd.f32 %v2449_v3, %v882_v50  ;;  %v922_v6 = vadd.f32 %v2449_v3, %v883_v40 }
 0x1aa   : > { %v636_v42 = vmul.f32 %v1580_v22, %v2601_v44  ;;  %1593 = vrsqrt.f32 %v2699_v10  ;;  %v2726_v46 = vsel %vm742_vm9, %v2599_v37, %v741_v53  ;;  %v759_v1 = vand.u32 2147483648, %v2699_v10 }
 0x1ab   : > { %v768_v56 = vadd.f32 1e-06, %v592_v33  ;;  %1595 = vrcp.f32 %v767_v20  ;;  %vm723_vm5 = vcmp.eq.f32.partialorder %v2481_v23, 0.0  ;;  %vm730_vm6 = vcmp.eq.f32.partialorder %v2511_v7, 0.0  ;;  %v1584_v36 = vpop.eup %1583 }
 0x1ac   : > { %v944_v59 = vpack.c.bf16 %v922_v6, %v921_v45  ;;  %v2734_v28 = vsel %vm637_vm12, %v2601_v44, %v636_v42  ;;  %v3100_v11 = vand.u32 2147483648, %v2375_v29  ;;  %v3101_v8 = vand.u32 2147483648, %v2380_v9  ;;  %v1586_v33 = vpop.eup %1585 }
 0x1ad   : > { %v868_v31 = vmul.f32 %v1582_v34, %v2274_v52  ;;  %1597 = vrcp.f32 %v768_v56  ;;  %vm625_vm7 = vcmp.eq.f32.partialorder %v2514_v16, 0.0  ;;  %v869_v20 = vmul.f32 %v1584_v36, %v2280_v47  ;;  %v1588_v22 = vpop.eup %1587 }
 0x1ae   : > { %v697_v50 = vsel %vm695_vm10, %v3100_v11, %v2537_v63  ;;  %v704_v27 = vsel %vm702_vm11, %v3101_v8, %v2546_v43  ;;  %1418 = vmatmul.mubr.bf16.vlgmr.msra.gmra.mrb[0].mxu1 %v944_v59  ;;  %vm756_vm8 = vcmp.eq.f32.partialorder %v2699_v10, inf  ;;  %v3102_v29 = vand.u32 2147483648, %v2389_v17 }
 0x1af   : > { %v783_v40 = vadd.f32 1e-06, %v697_v50  ;;  %v784_v41 = vadd.f32 1e-06, %v704_v27  ;;  %v3103_v52 = vand.u32 2147483648, %v2399_v12  ;;  %v3104_v43 = vand.u32 2147483648, %v2411_v55 }
 0x1b0   : > { %v599_v9 = vsel %vm597_vm13, %v3102_v29, %v2559_v51  ;;  %v907_v53 = vadd.f32 %v2449_v3, %v868_v31  ;;  %v643_v45 = vmul.f32 %v1586_v33, %v2648_v25  ;;  %vm632_vm9 = vcmp.eq.f32.partialorder %v2552_v14, 0.0  ;;  %v1590_v56 = vpop.eup %1589 }
 0x1b1   : > { %v606_v63 = vsel %vm604_vm14, %v3103_v52, %v2584_v61  ;;  %v711_v47 = vsel %vm709_vm15, %v3104_v43, %v2589_v18  ;;  %1599 = vrcp.f32 %v783_v40  ;;  %v769_v17 = vadd.f32 1e-06, %v599_v9 }
 0x1b2   : > { %vm737_vm10 = vcmp.eq.f32.partialorder %v2554_v60, 0.0  ;;  %v908_v12 = vadd.f32 %v2449_v3, %v869_v20  ;;  %v748_v51 = vmul.f32 %v1588_v22, %v2650_v48  ;;  %1601 = vrcp.f32 %v784_v41 }
 0x1b3   : > { %v770_v61 = vadd.f32 1e-06, %v606_v63  ;;  %vm744_vm11 = vcmp.eq.f32.partialorder %v2599_v37, 0.0  ;;  %v2775_v55 = vsel %vm644_vm1, %v2648_v25, %v643_v45  ;;  %1603 = vrcp.f32 %v769_v17  ;;  %v1592_v50 = vpop.eup %1591 }
 0x1b4   : > { %v3105_v18 = vand.u32 2147483648, %v2438_v19  ;;  %v785_v42 = vadd.f32 1e-06, %v711_v47  ;;  %v937_v34 = vpack.c.bf16 %v908_v12, %v907_v53  ;;  %v2785_v59 = vsel %vm749_vm2, %v2650_v48, %v748_v51  ;;  %v1594_v31 = vpop.eup %1593 }
 0x1b5   : > { %1605 = vrcp.f32 %v770_v61  ;;  %v884_v8 = vmul.f32 %v1590_v56, %v2291_v4  ;;  %v3106_v27 = vand.u32 2147483648, %v2443_v21  ;;  %vm639_vm12 = vcmp.eq.f32.partialorder %v2601_v44, 0.0  ;;  %v1596_v33 = vpop.eup %1595 }
 0x1b6   : > { %v718_v6 = vsel %vm716_vm0, %v3105_v18, %v2606_v38  ;;  %1607 = vrcp.f32 %v785_v42  ;;  %v3107_v38 = vand.u32 2147483648, %v2479_v26  ;;  %1405 = vmatprep.mubr.bf16.mxu0 %v937_v34  ;;  %v885_v40 = vmul.f32 %v1592_v50, %v2298_v30  ;;  %v3113_v18 = vld [vmem:[#allocation18_spill] sm:$0xff] }
 0x1b7   : > { %v786_v11 = vadd.f32 1e-06, %v718_v6  ;;  %v613_v19 = vsel %vm611_vm3, %v3106_v27, %v2614_v24  ;;  %vm646_vm13 = vcmp.eq.f32.partialorder %v2648_v25, 0.0  ;;  %v923_v21 = vadd.f32 %v2449_v3, %v884_v8  ;;  %v1598_v63 = vpop.eup %1597  ;;  %v3115_v27 = vld [vmem:[#allocation20_spill] sm:$0xff] }
 0x1b8   : > { %v620_v36 = vsel %vm618_vm4, %v3107_v38, %v2631_v57  ;;  %v771_v4 = vadd.f32 1e-06, %v613_v19  ;;  %v755_v24 = vmul.f32 %v1594_v31, %v2699_v10  ;;  %v3108_v26 = vand.u32 2147483648, %v2481_v23  ;;  %v3116_v38 = vld [vmem:[#allocation21_spill] sm:$0xff] }
 0x1b9   : > { %1609 = vrcp.f32 %v786_v11  ;;  %v772_v41 = vadd.f32 1e-06, %v620_v36  ;;  %v3109_v20 = vand.u32 2147483648, %v2511_v7  ;;  %v924_v29 = vadd.f32 %v2449_v3, %v885_v40  ;;  %v3114_v11 = vld [vmem:[#allocation19_spill] sm:$0xff] }
 0x1ba   : > { %v725_v57 = vsel %vm723_vm5, %v3108_v26, %v2636_v39  ;;  %v870_v9 = vmul.f32 %v1596_v33, %v2305_v62  ;;  %1611 = vrcp.f32 %v771_v4  ;;  %vm751_vm14 = vcmp.eq.f32.partialorder %v2650_v48, 0.0 }
 0x1bb   : > { %v732_v30 = vsel %vm730_vm6, %v3109_v20, %v2668_v5  ;;  %v787_v52 = vadd.f32 1e-06, %v725_v57  ;;  %v757_v23 = vsel %vm756_vm8, %v2699_v10, %v755_v24  ;;  %vm758_vm15 = vcmp.eq.f32.partialorder %v2699_v10, 0.0  ;;  %v1600_v22 = vpop.eup %1599  ;;  %v3118_v57 = vld [vmem:[#allocation23_spill] sm:$0xff]  ;;  %v1635_v10 = vld [vmem:[%s3061_s4] ss:$0 sm:$0xff] }
 0x1bc   : > { %1613 = vrcp.f32 %v772_v41  ;;  %v788_v39 = vadd.f32 1e-06, %v732_v30  ;;  %v3110_v7 = vand.u32 2147483648, %v2514_v16  ;;  %v945_v62 = vpack.c.bf16 %v924_v29, %v923_v21  ;;  %v3117_v41 = vld [vmem:[#allocation22_spill] sm:$0xff]  ;;  %v3119_v29 = vld [vmem:[#allocation24_spill] sm:$0xff] }
 0x1bd   : > { %v871_v43 = vmul.f32 %v1598_v63, %v2309_v35  ;;  %v909_v47 = vadd.f32 %v2449_v3, %v870_v9  ;;  %1615 = vrcp.f32 %v787_v52  ;;  %v3111_v53 = vand.u32 2147483648, %v2552_v14 }
 0x1be   : > { %v627_v5 = vsel %vm625_vm7, %v3110_v7, %v2679_v0  ;;  %1617 = vrcp.f32 %v788_v39  ;;  %v3112_v12 = vand.u32 2147483648, %v2554_v60  ;;  %v1602_v0 = vpop.eup %1601  ;;  %1421 = vmatprep.mubr.bf16.mxu1 %v945_v62  ;;  %v886_v51 = vmul.f32 %v1600_v22, %v2313_v15  ;;  %v3122_v62 = vld [vmem:[#allocation26_spill] sm:$0xff]  ;;  %v3123_v22 = vld [vmem:[#allocation11_spill] sm:$0xff] }
 0x1bf   : > { %v634_v45 = vsel %vm632_vm9, %v3111_v53, %v2684_v49  ;;  %v773_v17 = vadd.f32 1e-06, %v627_v5  ;;  %v910_v35 = vadd.f32 %v2449_v3, %v871_v43  ;;  %v746_v14 = vsel %vm744_vm11, %v745_v54, %v2726_v46  ;;  %v1604_v49 = vpop.eup %1603 }
 0x1c0   : > { %v739_v16 = vsel %vm737_vm10, %v3112_v12, %v2690_v13  ;;  %v774_v61 = vadd.f32 1e-06, %v634_v45  ;;  %v887_v6 = vmul.f32 %v1602_v0, %v3113_v18  ;;  %v790_v60 = vadd.f32 1e-06, %v746_v14  ;;  %v1606_v13 = vpop.eup %1605 }
 0x1c1   : > { %1619 = vrcp.f32 %v773_v17  ;;  %v789_v42 = vadd.f32 1e-06, %v739_v16  ;;  %v938_v56 = vpack.c.bf16 %v910_v35, %v909_v47  ;;  %v925_v34 = vadd.f32 %v2449_v3, %v886_v51  ;;  %v1608_v15 = vpop.eup %1607 }
 0x1c2   : > { %v872_v50 = vmul.f32 %v1604_v49, %v3114_v11  ;;  %1621 = vrcp.f32 %v774_v61  ;;  %v926_v8 = vadd.f32 %v2449_v3, %v887_v6  ;;  %v873_v19 = vmul.f32 %v1606_v13, %v3115_v27  ;;  %v3124_v49 = vld [vmem:[#allocation12_spill] sm:$0xff] }
 0x1c3   : > { %1623 = vrcp.f32 %v789_v42  ;;  %v641_v37 = vsel %vm639_vm12, %v640_v32, %v2734_v28  ;;  %v1610_v54 = vpop.eup %1609  ;;  %1406 = vmatmul.mubr.bf16.gmra.mrb[4].mxu0 %v938_v56  ;;  %v888_v36 = vmul.f32 %v1608_v15, %v3116_v38  ;;  %v648_v31 = vsel %vm646_vm13, %v647_v58, %v2775_v55 }
 0x1c4   : > { %v911_v46 = vadd.f32 %v2449_v3, %v872_v50  ;;  %1625 = vrcp.f32 %v790_v60  ;;  %v946_v40 = vpack.c.bf16 %v926_v8, %v925_v34  ;;  %v912_v4 = vadd.f32 %v2449_v3, %v873_v19  ;;  %v1612_v32 = vpop.eup %1611  ;;  %v3125_v60 = vld [vmem:[#allocation13_spill] sm:$0xff]  ;;  %v3126_v8 = vld [vmem:[#allocation14_spill] sm:$0xff] }
 0x1c5   : > { %v889_v33 = vmul.f32 %v1610_v54, %v3117_v41  ;;  %v775_v44 = vadd.f32 1e-06, %v641_v37  ;;  %v927_v28 = vadd.f32 %v2449_v3, %v888_v36  ;;  %v776_v21 = vadd.f32 1e-06, %v648_v31  ;;  %v3127_v37 = vld [vmem:[#allocation15_spill] sm:$0xff]  ;;  %v3129_v41 = vld [vmem:[#allocation17_spill] sm:$0xff] }
 0x1c6   : > { %v753_v24 = vsel %vm751_vm14, %v752_v2, %v2785_v59  ;;  %v760_v25 = vsel %vm758_vm15, %v759_v1, %v757_v23  ;;  %v1614_v58 = vpop.eup %1613  ;;  %1422 = vmatmul.mubr.bf16.gmra.mrb[4].mxu1 %v946_v40  ;;  %v939_v55 = vpack.c.bf16 %v912_v4, %v911_v46  ;;  %v874_v20 = vmul.f32 %v1612_v32, %v3118_v57  ;;  %v3120_v1 = vld [vmem:[#allocation10_spill] sm:$0xff]  ;;  %v3121_v23 = vld [vmem:[#allocation25_spill] sm:$0xff]  ;;  %v3128_v40 = vld [vmem:[#allocation16_spill] sm:$0xff] }
 0x1c7   : > { %v928_v26 = vadd.f32 %v2449_v3, %v889_v33  ;;  %1627 = vrcp.f32 %v775_v44  ;;  %v1616_v30 = vpop.eup %1615  ;;  %v875_v9 = vmul.f32 %v1614_v58, %v3119_v29  ;;  %v791_v52 = vadd.f32 1e-06, %v753_v24  ;;  %v2904_v24 = vld [vmem:[%s3060_s3] ss:$0 sm:$0xff] }
 0x1c8   : > { %1629 = vrcp.f32 %v776_v21  ;;  %v792_v48 = vadd.f32 1e-06, %v760_v25  ;;  %v1618_v2 = vpop.eup %1617  ;;  %v844_v59 = vmul.f32 %v1635_v10, %v3120_v1  ;;  %1409 = vmatprep.mubr.bf16.mxu0 %v939_v55  ;;  %v890_v39 = vmul.f32 %v1616_v30, %v3121_v23  ;;  %v1639_v1 = vld [vmem:[%s1917_s30 + $0x8] sm:$0xff] }
 0x1c9   : > { %v947_v63 = vpack.c.bf16 %v928_v26, %v927_v28  ;;  %v913_v7 = vadd.f32 %v2449_v3, %v874_v20  ;;  %v914_v5 = vadd.f32 %v2449_v3, %v875_v9  ;;  %v891_v43 = vmul.f32 %v1618_v2, %v3122_v62  ;;  %v1636_v20 = vld [vmem:[%s1917_s30 + $0x10] sm:$0xff]  ;;  %v1637_v9 = vld [vmem:[%s1917_s30] sm:$0xff]  ;;  %v1638_v2 = vld [vmem:[%s1917_s30 + $0x18] sm:$0xff] }
 0x1ca   : > { %1631 = vrcp.f32 %v791_v52  ;;  %v845_v53 = vmul.f32 %v1635_v10, %v3123_v22  ;;  %v929_v12 = vadd.f32 %v2449_v3, %v890_v39  ;;  %v1640_v62 = vld [vmem:[%s1917_s30 + $0x90] sm:$0xff] }
 0x1cb   : > { %v1620_v47 = vpop.eup %1619  ;;  %1425 = vmatprep.mubr.bf16.mxu1 %v947_v63  ;;  %1633 = vrcp.f32 %v792_v48  ;;  %v940_v17 = vpack.c.bf16 %v914_v5, %v913_v7  ;;  %v930_v16 = vadd.f32 %v2449_v3, %v891_v43 }
 0x1cc   : > { %v1622_v45 = vpop.eup %1621  ;;  %v876_v0 = vmul.f32 %v1620_v47, %v844_v59 }
 0x1cd   : > { %v1624_v35 = vpop.eup %1623  ;;  %v877_v51 = vmul.f32 %v1622_v45, %v845_v53  ;;  %1410 = vmatmul.mubr.bf16.gmra.mrb[8].mxu0 %v940_v17  ;;  %v948_v14 = vpack.c.bf16 %v930_v16, %v929_v12  ;;  %v1641_v53 = vld [vmem:[%s1917_s30 + $0x80] sm:$0xff]  ;;  %v1642_v12 = vld [vmem:[%s1917_s30 + $0x98] sm:$0xff] }
 0x1ce   : > { %v1626_v61 = vpop.eup %1625  ;;  %v892_v18 = vmul.f32 %v1624_v35, %v3124_v49  ;;  %v915_v6 = vadd.f32 %v2449_v3, %v876_v0  ;;  %v1643_v0 = vld [vmem:[%s1917_s30 + $0x88] sm:$0xff] }
 0x1cf   : > { %v916_v42 = vadd.f32 %v2449_v3, %v877_v51  ;;  %v893_v13 = vmul.f32 %v1626_v61, %v3125_v60  ;;  %1426 = vmatmul.mubr.bf16.gmra.mrb[8].mxu1 %v948_v14 }
 0x1d0   : > { %v931_v11 = vadd.f32 %v2449_v3, %v892_v18 }
 0x1d1   : > { %v1628_v56 = vpop.eup %1627  ;;  %v941_v34 = vpack.c.bf16 %v916_v42, %v915_v6  ;;  %v932_v50 = vadd.f32 %v2449_v3, %v893_v13  ;;  %v1644_v6 = vld [vmem:[%s1917_s30 + $0x30] sm:$0xff] }
 0x1d2   : > { %v1630_v15 = vpop.eup %1629  ;;  %v878_v27 = vmul.f32 %v1628_v56, %v3126_v8 }
 0x1d3   : > { %1413 = vmatprep.mubr.bf16.mxu0 %v941_v34  ;;  %v949_v19 = vpack.c.bf16 %v932_v50, %v931_v11  ;;  %v879_v54 = vmul.f32 %v1630_v15, %v3127_v37  ;;  %v1645_v34 = vld [vmem:[%s1917_s30 + $0x20] sm:$0xff] }
 0x1d4   : > { %v1632_v46 = vpop.eup %1631  ;;  %v917_v36 = vadd.f32 %v2449_v3, %v878_v27  ;;  %v1646_v27 = vld [vmem:[%s1917_s30 + $0x38] sm:$0xff] }
 0x1d5   : > { %v1634_v38 = vpop.eup %1633  ;;  %1429 = vmatprep.mubr.bf16.mxu1 %v949_v19  ;;  %v918_v31 = vadd.f32 %v2449_v3, %v879_v54  ;;  %v894_v4 = vmul.f32 %v1632_v46, %v3128_v40  ;;  %v1647_v46 = vld [vmem:[%s1917_s30 + $0x28] sm:$0xff] }
 0x1d6   : > { %v895_v33 = vmul.f32 %v1634_v38, %v3129_v41  ;;  %v1649_v41 = vld [vmem:[%s1917_s30 + $0xa0] sm:$0xff] }
 0x1d7   : > { %v942_v44 = vpack.c.bf16 %v918_v31, %v917_v36  ;;  %v933_v32 = vadd.f32 %v2449_v3, %v894_v4  ;;  %v1648_v36 = vld [vmem:[%s1917_s30 + $0xb0] sm:$0xff] }
 0x1d8   : > { %v934_v28 = vadd.f32 %v2449_v3, %v895_v33 }
 0x1d9   : > { %1414 = vmatmul.mubr.bf16.gmra.mrb[12].mxu0 %v942_v44 }
 0x1da   : > { %v950_v21 = vpack.c.bf16 %v934_v28, %v933_v32  ;;  %v1650_v32 = vld [vmem:[%s1917_s30 + $0xb8] sm:$0xff] }
 0x1dc   : > { %1430 = vmatmul.mubr.bf16.gmra.mrb[12].mxu1 %v950_v21  ;;  %v1651_v21 = vld [vmem:[%s1917_s30 + $0xa8] sm:$0xff] }
 0x278   : > { %v1403_v25 = vpop.f32.mrb[0].mxu0 }
 0x279   : > { %v1065_v58 = vadd.f32 %v1403_v25, %v2904_v24  ;;  %v1056_v55 = vpop.f32.mrb[1].mxu0 }
 0x27a   : > { %v1057_v26 = vadd.f32 %v2904_v24, %v1056_v55  ;;  %v1404_v57 = vpop.f32.mrb[2].mxu0 }
 0x27b   : > { %v1185_v3 = vadd.f32 %v1636_v20, %v1065_v58  ;;  %v1068_v30 = vadd.f32 %v1404_v57, %v2904_v24  ;;  %v1059_v29 = vpop.f32.mrb[3].mxu0 }
 0x27c   : > { %v1183_v52 = vadd.f32 %v1637_v9, %v1057_v26  ;;  %v1060_v48 = vadd.f32 %v2904_v24, %v1059_v29 }
 0x27d   : > { %1217 = vst [vmem:[%s2914_s20 + $0x10] sm:$0xff] %v1185_v3  ;;  %v1186_v10 = vadd.f32 %v1638_v2, %v1068_v30  ;;  %v1652_v30 = vld [vmem:[%s1917_s30 + $0x50] sm:$0xff] }
 0x27e   : > { %1215 = vst [vmem:[%s2914_s20] sm:$0xff] %v1183_v52  ;;  %v1184_v59 = vadd.f32 %v1639_v1, %v1060_v48 }
 0x27f   : > { %1218 = vst [vmem:[%s2914_s20 + $0x18] sm:$0xff] %v1186_v10  ;;  %v1653_v10 = vld [vmem:[%s1917_s30 + $0x40] sm:$0xff] }
 0x280   : > { %1216 = vst [vmem:[%s2914_s20 + $0x8] sm:$0xff] %v1184_v59 }
 0x281   : > { %v1419_v63 = vpop.f32.mrb[0].mxu1 }
 0x282   : > { %v1129_v23 = vadd.f32 %v1419_v63, %v2904_v24  ;;  %v1120_v39 = vpop.f32.mrb[1].mxu1 }
 0x283   : > { %v1121_v7 = vadd.f32 %v2904_v24, %v1120_v39  ;;  %v1420_v5 = vpop.f32.mrb[2].mxu1  ;;  %v1654_v39 = vld [vmem:[%s1917_s30 + $0x58] sm:$0xff] }
 0x284   : > { %v1201_v43 = vadd.f32 %v1640_v62, %v1129_v23  ;;  %v1132_v47 = vadd.f32 %v1420_v5, %v2904_v24  ;;  %v1123_v22 = vpop.f32.mrb[3].mxu1  ;;  %v1655_v5 = vld [vmem:[%s1917_s30 + $0xd0] sm:$0xff] }
 0x285   : > { %v1199_v45 = vadd.f32 %v1641_v53, %v1121_v7  ;;  %v1124_v17 = vadd.f32 %v2904_v24, %v1123_v22  ;;  %v1656_v22 = vld [vmem:[%s1917_s30 + $0x48] sm:$0xff] }
 0x286   : > { %1233 = vst [vmem:[%s2914_s20 + $0x90] sm:$0xff] %v1201_v43  ;;  %v1202_v16 = vadd.f32 %v1642_v12, %v1132_v47 }
 0x287   : > { %1231 = vst [vmem:[%s2914_s20 + $0x80] sm:$0xff] %v1199_v45  ;;  %v1200_v35 = vadd.f32 %v1643_v0, %v1124_v17  ;;  %v1657_v45 = vld [vmem:[%s1917_s30 + $0xc0] sm:$0xff] }
 0x288   : > { %1234 = vst [vmem:[%s2914_s20 + $0x98] sm:$0xff] %v1202_v16  ;;  %v1658_v16 = vld [vmem:[%s1917_s30 + $0xd8] sm:$0xff] }
 0x289   : > { %1232 = vst [vmem:[%s2914_s20 + $0x88] sm:$0xff] %v1200_v35  ;;  %v1659_v35 = vld [vmem:[%s1917_s30 + $0xc8] sm:$0xff] }
 0x296   : > { %v1407_v51 = vpop.f32.mrb[4].mxu0 }
 0x297   : > { %v1081_v61 = vadd.f32 %v1407_v51, %v2904_v24  ;;  %v1072_v14 = vpop.f32.mrb[5].mxu0 }
 0x298   : > { %v1073_v49 = vadd.f32 %v2904_v24, %v1072_v14  ;;  %v1408_v18 = vpop.f32.mrb[6].mxu0 }
 0x299   : > { %v1189_v42 = vadd.f32 %v1644_v6, %v1081_v61  ;;  %v1084_v60 = vadd.f32 %v1408_v18, %v2904_v24  ;;  %v1075_v13 = vpop.f32.mrb[7].mxu0  ;;  %v1423_v56 = vpop.f32.mrb[4].mxu1 }
 0x29a   : > { %v1187_v11 = vadd.f32 %v1645_v34, %v1073_v49  ;;  %v1076_v50 = vadd.f32 %v2904_v24, %v1075_v13  ;;  %v1145_v15 = vadd.f32 %v1423_v56, %v2904_v24  ;;  %v1136_v8 = vpop.f32.mrb[5].mxu1 }
 0x29b   : > { %1221 = vst [vmem:[%s2914_s20 + $0x30] sm:$0xff] %v1189_v42  ;;  %v1190_v19 = vadd.f32 %v1646_v27, %v1084_v60  ;;  %v1137_v37 = vadd.f32 %v2904_v24, %v1136_v8  ;;  %v1424_v54 = vpop.f32.mrb[6].mxu1  ;;  %v1660_v42 = vld [vmem:[%s1917_s30 + $0x70] sm:$0xff] }
 0x29c   : > { %1219 = vst [vmem:[%s2914_s20 + $0x20] sm:$0xff] %v1187_v11  ;;  %v1188_v38 = vadd.f32 %v1647_v46, %v1076_v50  ;;  %v1205_v31 = vadd.f32 %v1648_v36, %v1145_v15  ;;  %v1148_v40 = vadd.f32 %v1424_v54, %v2904_v24  ;;  %v1139_v4 = vpop.f32.mrb[7].mxu1  ;;  %v1661_v11 = vld [vmem:[%s1917_s30 + $0x60] sm:$0xff] }
 0x29d   : > { %1222 = vst [vmem:[%s2914_s20 + $0x38] sm:$0xff] %v1190_v19  ;;  %v1203_v33 = vadd.f32 %v1649_v41, %v1137_v37  ;;  %v1140_v44 = vadd.f32 %v2904_v24, %v1139_v4  ;;  %v1662_v19 = vld [vmem:[%s1917_s30 + $0x78] sm:$0xff] }
 0x29e   : > { %1220 = vst [vmem:[%s2914_s20 + $0x28] sm:$0xff] %v1188_v38  ;;  %1237 = vst [vmem:[%s2914_s20 + $0xb0] sm:$0xff] %v1205_v31  ;;  %v1206_v28 = vadd.f32 %v1650_v32, %v1148_v40  ;;  %v1663_v38 = vld [vmem:[%s1917_s30 + $0x68] sm:$0xff]  ;;  %v1664_v31 = vld [vmem:[%s1917_s30 + $0xf0] sm:$0xff] }
 0x29f   : > { %1235 = vst [vmem:[%s2914_s20 + $0xa0] sm:$0xff] %v1203_v33  ;;  %v1204_v25 = vadd.f32 %v1651_v21, %v1140_v44  ;;  %v1665_v33 = vld [vmem:[%s1917_s30 + $0xe0] sm:$0xff] }
 0x2a0   : > { %1238 = vst [vmem:[%s2914_s20 + $0xb8] sm:$0xff] %v1206_v28  ;;  %v1411_v58 = vpop.f32.mrb[8].mxu0  ;;  %v1666_v28 = vld [vmem:[%s1917_s30 + $0xf8] sm:$0xff] }
 0x2a1   : > { %1236 = vst [vmem:[%s2914_s20 + $0xa8] sm:$0xff] %v1204_v25  ;;  %v1097_v55 = vadd.f32 %v1411_v58, %v2904_v24  ;;  %v1088_v26 = vpop.f32.mrb[9].mxu0  ;;  %v1667_v25 = vld [vmem:[%s1917_s30 + $0xe8] sm:$0xff] }
 0x2a2   : > { %v1089_v57 = vadd.f32 %v2904_v24, %v1088_v26  ;;  %v1412_v20 = vpop.f32.mrb[10].mxu0  ;;  %v1427_v3 = vpop.f32.mrb[8].mxu1 }
 0x2a3   : > { %v1193_v29 = vadd.f32 %v1652_v30, %v1097_v55  ;;  %v1100_v9 = vadd.f32 %v1412_v20, %v2904_v24  ;;  %v1091_v52 = vpop.f32.mrb[11].mxu0  ;;  %v1161_v48 = vadd.f32 %v1427_v3, %v2904_v24  ;;  %v1152_v2 = vpop.f32.mrb[9].mxu1 }
 0x2a4   : > { %v1191_v1 = vadd.f32 %v1653_v10, %v1089_v57  ;;  %v1092_v59 = vadd.f32 %v2904_v24, %v1091_v52  ;;  %v1153_v63 = vadd.f32 %v2904_v24, %v1152_v2  ;;  %v1428_v23 = vpop.f32.mrb[10].mxu1 }
 0x2a5   : > { %1225 = vst [vmem:[%s2914_s20 + $0x50] sm:$0xff] %v1193_v29  ;;  %v1194_v7 = vadd.f32 %v1654_v39, %v1100_v9  ;;  %v1209_v62 = vadd.f32 %v1655_v5, %v1161_v48  ;;  %v1164_v43 = vadd.f32 %v1428_v23, %v2904_v24  ;;  %v1155_v47 = vpop.f32.mrb[11].mxu1 }
 0x2a6   : > { %1223 = vst [vmem:[%s2914_s20 + $0x40] sm:$0xff] %v1191_v1  ;;  %v1192_v53 = vadd.f32 %v1656_v22, %v1092_v59  ;;  %v1207_v17 = vadd.f32 %v1657_v45, %v1153_v63  ;;  %v1156_v12 = vadd.f32 %v2904_v24, %v1155_v47 }
 0x2a7   : > { %1226 = vst [vmem:[%s2914_s20 + $0x58] sm:$0xff] %v1194_v7  ;;  %1241 = vst [vmem:[%s2914_s20 + $0xd0] sm:$0xff] %v1209_v62  ;;  %v1210_v0 = vadd.f32 %v1658_v16, %v1164_v43 }
 0x2a8   : > { %1224 = vst [vmem:[%s2914_s20 + $0x48] sm:$0xff] %v1192_v53  ;;  %1239 = vst [vmem:[%s2914_s20 + $0xc0] sm:$0xff] %v1207_v17  ;;  %v1208_v51 = vadd.f32 %v1659_v35, %v1156_v12 }
 0x2a9   : > { %1242 = vst [vmem:[%s2914_s20 + $0xd8] sm:$0xff] %v1210_v0 }
 0x2aa   : > { %1240 = vst [vmem:[%s2914_s20 + $0xc8] sm:$0xff] %v1208_v51 }
 0x2ac   : > { %v1415_v61 = vpop.f32.mrb[12].mxu0 }
 0x2ad   : > { %v1113_v14 = vadd.f32 %v1415_v61, %v2904_v24  ;;  %v1104_v49 = vpop.f32.mrb[13].mxu0 }
 0x2ae   : > { %v1105_v18 = vadd.f32 %v2904_v24, %v1104_v49  ;;  %v1416_v6 = vpop.f32.mrb[14].mxu0 }
 0x2af   : > { %v1197_v60 = vadd.f32 %v1660_v42, %v1113_v14  ;;  %v1116_v13 = vadd.f32 %v1416_v6, %v2904_v24  ;;  %v1107_v56 = vpop.f32.mrb[15].mxu0  ;;  %v1431_v34 = vpop.f32.mrb[12].mxu1 }
 0x2b0   : > { %v1195_v50 = vadd.f32 %v1661_v11, %v1105_v18  ;;  %v1108_v15 = vadd.f32 %v2904_v24, %v1107_v56  ;;  %v1177_v8 = vadd.f32 %v1431_v34, %v2904_v24  ;;  %v1168_v27 = vpop.f32.mrb[13].mxu1 }
 0x2b1   : > { %1229 = vst [vmem:[%s2914_s20 + $0x70] sm:$0xff] %v1197_v60  ;;  %v1198_v37 = vadd.f32 %v1662_v19, %v1116_v13  ;;  %v1169_v54 = vadd.f32 %v2904_v24, %v1168_v27  ;;  %v1432_v46 = vpop.f32.mrb[14].mxu1 }
 0x2b2   : > { %1227 = vst [vmem:[%s2914_s20 + $0x60] sm:$0xff] %v1195_v50  ;;  %v1196_v36 = vadd.f32 %v1663_v38, %v1108_v15  ;;  %v1213_v40 = vadd.f32 %v1664_v31, %v1177_v8  ;;  %v1180_v4 = vadd.f32 %v1432_v46, %v2904_v24  ;;  %v1171_v41 = vpop.f32.mrb[15].mxu1 }
 0x2b3   : > { %1230 = vst [vmem:[%s2914_s20 + $0x78] sm:$0xff] %v1198_v37  ;;  %v1211_v44 = vadd.f32 %v1665_v33, %v1169_v54  ;;  %v1172_v32 = vadd.f32 %v2904_v24, %v1171_v41 }
 0x2b4   : > { %1228 = vst [vmem:[%s2914_s20 + $0x68] sm:$0xff] %v1196_v36  ;;  %1245 = vst [vmem:[%s2914_s20 + $0xf0] sm:$0xff] %v1213_v40  ;;  %v1214_v21 = vadd.f32 %v1666_v28, %v1180_v4 }
 0x2b5   : > { %1243 = vst [vmem:[%s2914_s20 + $0xe0] sm:$0xff] %v1211_v44  ;;  %v1212_v58 = vadd.f32 %v1667_v25, %v1172_v32 }
 0x2b6   : > { %1246 = vst [vmem:[%s2914_s20 + $0xf8] sm:$0xff] %v1214_v21 }
 0x2b7   : > { %1244 = vst [vmem:[%s2914_s20 + $0xe8] sm:$0xff] %v1212_v58 }
 0x2b8   : > { %1711 = shalt.err (!%p1708_p2)
}
 0x2b9   : > { %s1712_s30 = scalar_lea.hbm %s3007_s15, 4096  ;;  %s1716_s14 = scalar_lea.hbm %s3063_s6, 8192 }
 0x2ba   : > { %p1713_p4 = scmp.ne.s32.totalorder %s3007_s15, %s1712_s30  ;;  %p1717_p9 = scmp.lt.u32.totalorder %s3007_s15, %s3063_s6 }
 0x2bb   : > { %p1718_p1 = scmp.lt.u32.totalorder %s1716_s14, %s1712_s30  ;;  %p1720_p6 = scmp.lt.u32.totalorder %s1712_s30, %s3007_s15 }
 0x2bc   : > { %p1714_p5 = pnand %p1713_p4, %p3130_p11 }
 0x2bd   : > { %p1719_p3 = por %p1718_p1, %p1717_p9 }
 0x2be   : > { %p1715_p7 = pneg %p1714_p5 }
 0x2bf   : > { %p1721_p12 = por %p1720_p6, %p1719_p3 }
 0x2c1   : > { %p1722_p13 = pnand %p1721_p12, %p1715_p7 }
 0x2c3   : > { %1725 = shalt.err (!%p1722_p13)
}
 0x2c4   : > { %s1770_s27 = smov 128   ;;  %s1771_s24 = smov 8  }
 0x2c5   : > { %1451 = dma.vmem_to_hbm [thread:$0]  (%p3130_p11), %s3009_s28, 4096, %s3007_s15, %s1248_s17, %s1770_s27, %s1770_s27, %s1771_s24  }
 0x2c6 PF: > { %s1276_s7 = sand.u32 1, %s1752_s0   ;;  %p3131_p8 = scmp.ne.s32.totalorder %s3070_s9, 0 }
 0x2c7   : > { %p3132_p10 = scmp.ge.s32.totalorder %s1764_s23, 2  ;;  %s1277_s18 = scalar_lea.sflag [#allocation6], %s1276_s7 }
 0x2c9   : > { %p1458_p0 = pnand %p3132_p10, %p3131_p8 }
 0x2cb   : > { %1747 = dma.done.wait (!%p1458_p0), %s1277_s18, 4096  }
 0x2cc   : > { %1749 = vsyncadd (!%p1458_p0), %s1277_s18, 4294963200  ;;  %p20_p2 = scmp.ge.s32.totalorder %s1832_s26, 4   ;;  %s3133_s0 = smov %s1756_s21 }
 0x2cd   : > { %s3134_s21 = smov %s1760_s22  ;;  %s3135_s22 = smov %s1844_s29 }
 0x2ce   : > { %s3136_s23 = smov %s1832_s26  ;;  %22 = sbr.rel (!%p20_p2) target bundleno = 5 (0x5), region = 85 }
 0x2d5   :  { %1282 = vsyncpa [#allocation5], 1 }
 0x2d6   :  { %1284 = vsyncpa [#allocation5 + $0x1], 1 }
 0x2d7   :  { %1285 = vsyncpa [#allocation6], 1 }
 0x2d8   :  { %1287 = vsyncpa [#allocation6 + $0x1], 1 }

// kernel: tpu_custom_call.1
= control target key start
LH: loop header
LB: loop body
LE: loop exit
PB: predicated region body
PF: predicated region fallthrough
CT: control target
= control target key end

     0   :  { %12 = vsyncpa [#allocation5], 0  ;;  %s3057_s0 = inlined_call_operand.<no memory space> [shape: s32[1], index: 0, kind: input, shape index: {}]   ;;  %s3058_s1 = inlined_call_operand.hbm [shape: f32[512,128], index: 1, kind: input, shape index: {}, may-alias: {1,6}]   ;;  %s3059_s2 = inlined_call_operand.vmem [shape: bf16[128,128], index: 2, kind: input, shape index: {}]   ;;  %s3060_s3 = inlined_call_operand.vmem [shape: f32[1,128], index: 3, kind: input, shape index: {}]   ;;  %s3061_s4 = inlined_call_operand.vmem [shape: f32[1,128], index: 4, kind: input, shape index: {}]   ;;  %s3062_s5 = inlined_call_operand.vmem [shape: f32[1,128], index: 5, kind: input, shape index: {}]   ;;  %s3063_s6 = inlined_call_operand.hbm [shape: f32[512,128], index: 6, kind: output, shape index: {}, may-alias: {1,6}]  }
   0x1   :  { %14 = vsyncpa [#allocation5 + $0x1], 0 }
   0x2   :  { %15 = vsyncpa [#allocation6], 0 }
   0x3   :  { %17 = vsyncpa [#allocation6 + $0x1], 0  ;;  %s1807_s0 = smov 0   ;;  %s1809_s21 = smov 0  }
   0x4   :  { %s1811_s22 = smov 0   ;;  %s1813_s23 = smov 0  }
   0x5 LB: > { %s1828_s24 = sadd.s32 4294967295, %s1764_s23   ;;  %s1334_s25 = sadd.s32 4294967294, %s1764_s23   ;;  %s1764_s23 = sphi %s1813_s23, %s3136_s23   ;;  %s1760_s22 = sphi %s1811_s22, %s3135_s22   ;;  %s1756_s21 = sphi %s1809_s21, %s3134_s21   ;;  %s1752_s0 = sphi %s1807_s0, %s3133_s0  }
   0x6   : > { %s1832_s26 = sadd.s32 1, %s1764_s23   ;;  %s30_s27 = sadd.s32 1, %s1760_s22 }
   0x7   : > { %s27_s28 = ssub.s32 %s1764_s23, %s1832_s26  ;;  %p37_p0 = scmp.ne.s32.totalorder %s1760_s22, %s1756_s21 }
   0x8   : > { %p28_p1 = scmp.eq.s32.totalorder %s27_s28, 0  ;;  %p38_p2 = scmp.eq.s32.totalorder %s1764_s23, 0 }
   0x9   : > { %p43_p3 = scmp.ne.s32.totalorder %s1756_s21, %s1752_s0  ;;  %p44_p4 = scmp.eq.s32.totalorder %s1828_s24, 0 }
   0xa   : > { %s1844_s29 = scalar_select %p28_p1, %s1760_s22, %s30_s27  }
   0xb   : > { %p1846_p5 = por %p38_p2, %p37_p0  ;;  %p1850_p6 = por %p44_p4, %p43_p3 }
   0xc   : > { %p151_p7 = scmp.eq.s32.totalorder %s1828_s24, 1  ;;  %p157_p8 = scmp.eq.s32.totalorder %s1334_s25, 1 }
   0xd   : > { %p1461_p10 = scmp.lt.s32.totalorder %s1764_s23, 2  ;;  %s189_s10 = sand.u32 1, %s1760_s22  }
   0xe   : > { %p1857_p11 = por %p151_p7, %p37_p0  ;;  %p1861_p12 = por %p157_p8, %p43_p3 }
   0xf   : > { %s1359_s11 = sshll.u32 %s1764_s23, 12  ;;  %s1337_s12 = sshll.u32 %s189_s10, 8 }
  0x10   : > { %s3069_s8 = scalar_select %p1857_p11, 1, 0 }
  0x11   : > { %s3070_s9 = scalar_select %p1861_p12, 1, 0 }
  0x12   : > { %s1870_s15 = scalar_lea.hbm %s3058_s1, %s1359_s11  ;;  %s193_s16 = scalar_lea.vmem [#allocation4], %s1337_s12 }
  0x13   : > { %s200_s17 = sshll.u32 %s193_s16, 4  ;;  %p1874_p13 = pnand %p1461_p10, %p1846_p5  ;;  %s1878_s17 = int_to_ptr.vmem [resolvable:$true] %s200_s17 }
  0x14   : > { %s1880_s19 = scalar_lea.sflag [#allocation5], %s189_s10  ;;  %s1668_s20 = scalar_lea.hbm %s1870_s15, 4096 }
  0x15   : > { %p1669_p0 = scmp.ne.s32.totalorder %s1870_s15, %s1668_s20  ;;  %p1670_p1 = pneg %p1874_p13 }
  0x16   : > { %s1673_s28 = scalar_lea.hbm %s3058_s1, 8192  ;;  %p1674_p4 = scmp.lt.u32.totalorder %s1870_s15, %s3058_s1 }
  0x17   : > { %p1671_p2 = pnand %p1670_p1, %p1669_p0  ;;  %p1675_p5 = scmp.lt.u32.totalorder %s1673_s28, %s1668_s20 }
  0x18   : > { %p1677_p8 = scmp.lt.u32.totalorder %s1668_s20, %s1870_s15 }
  0x19   : > { %p1672_p3 = pneg %p1671_p2  ;;  %p1676_p7 = por %p1675_p5, %p1674_p4 }
  0x1b   : > { %p1678_p10 = por %p1677_p8, %p1676_p7 }
  0x1d   : > { %p1679_p9 = pnand %p1678_p10, %p1672_p3 }
  0x1f   : > { %1682 = shalt.err (!%p1679_p9)
}
  0x20   : > { %s1683_s10 = scalar_lea.vmem %s1878_s17, 4096  ;;  %s1766_s12 = smov [#allocation4]  }
  0x21   : > { %p1684_p0 = scmp.ne.s32.totalorder %s1878_s17, %s1683_s10  ;;  %s1688_s13 = sshll.u32 %s1766_s12, 4  ;;  %s1689_s13 = int_to_ptr.vmem [resolvable:$false] %s1688_s13 }
  0x22   : > { %s1690_s14 = scalar_lea.vmem %s1689_s13, 8192  ;;  %p1691_p11 = scmp.lt.s32.totalorder %s1878_s17, %s1689_s13 }
  0x23   : > { %p1686_p2 = pnand %p1684_p0, %p1670_p1  ;;  %p1692_p4 = scmp.lt.s32.totalorder %s1690_s14, %s1683_s10 }
  0x25   : > { %p1687_p12 = pneg %p1686_p2  ;;  %p1693_p5 = por %p1692_p4, %p1691_p11 }
  0x27   : > { %p1694_p7 = pnand %p1693_p5, %p1687_p12 }
  0x29   : > { %1697 = shalt.err (!%p1694_p7)
}
  0x2a   : > { %s1767_s16 = smov 128   ;;  %s1768_s20 = smov 8  }
  0x2b   : > { %1456 = dma.hbm_to_vmem [thread:$0]  (!%p1874_p13), %s1870_s15, 4096, %s1878_s17, %s1880_s19, %s1767_s16, %s1767_s16, %s1768_s20  }
  0x2c   : > { %p1340_p9 = scmp.ge.s32.totalorder %s1764_s23, 1  ;;  %p208_p1 = scmp.lt.s32.totalorder %s1764_s23, 3 }
  0x2e   : > { %p209_p3 = pnand %p1340_p9, %p208_p1 }
  0x30   : > { %212 = sbr.rel (%p209_p3) target bundleno = 710 (0x2c6), region = 40 }
  0x37   : > { %s1911_s25 = sand.u32 1, %s1756_s21  }
  0x38   : > { %s1341_s27 = sshll.u32 %s1911_s25, 8  ;;  %s215_s28 = scalar_lea.sflag [#allocation5], %s1911_s25 }
  0x39   : > { %s1917_s30 = scalar_lea.vmem [#allocation4], %s1341_s27 }
  0x3a   : > { %1743 = dma.done.wait (%p1850_p6), %s215_s28, 4096  }
  0x3b   : > { %1745 = vsyncadd (%p1850_p6), %s215_s28, 4294963200  ;;  %v1924_v0 = vld [vmem:[%s1917_s30] sm:$0xff]  ;;  %v1932_v2 = vld [vmem:[%s1917_s30 + $0x8] sm:$0xff]  ;;  %s2914_s20 = scalar_lea.vmem [#allocation7], %s1341_s27  ;;  %s1360_s27 = sshll.u32 %s1828_s24, 12 }
  0x3c   : > { %v1927_v1 = vld [vmem:[%s1917_s30 + $0x80] sm:$0xff]  ;;  %280 = vadd.xlane.f32.xlu0 %v1924_v0  ;;  %v1935_v3 = vld [vmem:[%s1917_s30 + $0x88] sm:$0xff]  ;;  %v1940_v4 = vld [vmem:[%s1917_s30 + $0x10] sm:$0xff]  ;;  %s1261_s28 = sshll.u32 %s2914_s20, 4  ;;  %s3007_s15 = scalar_lea.hbm %s3063_s6, %s1360_s27  ;;  %s3009_s28 = int_to_ptr.vmem [resolvable:$true] %s1261_s28 }
  0x3d   : > { %312 = vadd.xlane.f32.xlu1 %v1927_v1  ;;  %v1943_v5 = vld [vmem:[%s1917_s30 + $0x18] sm:$0xff]  ;;  %v1948_v6 = vld [vmem:[%s1917_s30 + $0x90] sm:$0xff]  ;;  %v1954_v8 = vld [vmem:[%s1917_s30 + $0x20] sm:$0xff]  ;;  %s1248_s17 = scalar_lea.sflag [#allocation6], %s1911_s25  ;;  %s1698_s18 = scalar_lea.vmem %s3009_s28, 4096 }
  0x3e   : > { %v1951_v7 = vld [vmem:[%s1917_s30 + $0x98] sm:$0xff]  ;;  %v1957_v9 = vld [vmem:[%s1917_s30 + $0x28] sm:$0xff]  ;;  %v1964_v10 = vld [vmem:[%s1917_s30 + $0xa0] sm:$0xff]  ;;  %p1699_p6 = scmp.ne.s32.totalorder %s3009_s28, %s1698_s18  ;;  %p3130_p11 = scmp.ne.s32.totalorder %s3069_s8, 0 }
  0x3f   : > { %v1967_v11 = vld [vmem:[%s1917_s30 + $0xa8] sm:$0xff]  ;;  %v1972_v12 = vld [vmem:[%s1917_s30 + $0x30] sm:$0xff]  ;;  %v1975_v13 = vld [vmem:[%s1917_s30 + $0x38] sm:$0xff]  ;;  %s1769_s19 = smov [#allocation7]  }
  0x40   : > { %282 = vadd.xlane.f32.xlu0 %v1932_v2  ;;  %v1980_v14 = vld [vmem:[%s1917_s30 + $0xb0] sm:$0xff]  ;;  %v1983_v15 = vld [vmem:[%s1917_s30 + $0xb8] sm:$0xff]  ;;  %v1988_v16 = vld [vmem:[%s1917_s30 + $0x40] sm:$0xff]  ;;  %p1700_p12 = pnand %p1699_p6, %p3130_p11  ;;  %s1702_s11 = sshll.u32 %s1769_s19, 4  ;;  %s1703_s11 = int_to_ptr.vmem [resolvable:$false] %s1702_s11 }
  0x41   : > { %314 = vadd.xlane.f32.xlu1 %v1935_v3  ;;  %v1991_v17 = vld [vmem:[%s1917_s30 + $0x48] sm:$0xff]  ;;  %v1996_v18 = vld [vmem:[%s1917_s30 + $0xc0] sm:$0xff]  ;;  %v2004_v20 = vld [vmem:[%s1917_s30 + $0x50] sm:$0xff]  ;;  %s1704_s10 = scalar_lea.vmem %s1703_s11, 8192  ;;  %p1705_p8 = scmp.lt.s32.totalorder %s3009_s28, %s1703_s11 }
  0x42   : > { %v1999_v19 = vld [vmem:[%s1917_s30 + $0xc8] sm:$0xff]  ;;  %v2007_v21 = vld [vmem:[%s1917_s30 + $0x58] sm:$0xff]  ;;  %v2012_v22 = vld [vmem:[%s1917_s30 + $0xd0] sm:$0xff]  ;;  %p1701_p13 = pneg %p1700_p12  ;;  %p1706_p10 = scmp.lt.s32.totalorder %s1704_s10, %s1698_s18 }
  0x43   : > { %v2015_v23 = vld [vmem:[%s1917_s30 + $0xd8] sm:$0xff]  ;;  %v2020_v24 = vld [vmem:[%s1917_s30 + $0x60] sm:$0xff]  ;;  %v2023_v25 = vld [vmem:[%s1917_s30 + $0x68] sm:$0xff] }
  0x44   : > { %284 = vadd.xlane.f32.xlu0 %v1940_v4  ;;  %v2028_v26 = vld [vmem:[%s1917_s30 + $0xe0] sm:$0xff]  ;;  %v2031_v27 = vld [vmem:[%s1917_s30 + $0xe8] sm:$0xff]  ;;  %v2036_v28 = vld [vmem:[%s1917_s30 + $0x70] sm:$0xff]  ;;  %p1707_p0 = por %p1706_p10, %p1705_p8 }
  0x45   : > { %286 = vadd.xlane.f32.xlu1 %v1943_v5  ;;  %v2039_v29 = vld [vmem:[%s1917_s30 + $0x78] sm:$0xff]  ;;  %v2044_v30 = vld [vmem:[%s1917_s30 + $0xf0] sm:$0xff] }
  0x46   : > { %v2047_v31 = vld [vmem:[%s1917_s30 + $0xf8] sm:$0xff]  ;;  %p1708_p2 = pnand %p1707_p0, %p1701_p13 }
  0x48   : > { %316 = vadd.xlane.f32.xlu0 %v1948_v6 }
  0x49   : > { %318 = vadd.xlane.f32.xlu1 %v1951_v7 }
  0x4c   : > { %288 = vadd.xlane.f32.xlu0 %v1954_v8 }
  0x4d   : > { %290 = vadd.xlane.f32.xlu1 %v1957_v9 }
  0x50   : > { %320 = vadd.xlane.f32.xlu0 %v1964_v10 }
  0x51   : > { %322 = vadd.xlane.f32.xlu1 %v1967_v11 }
  0x54   : > { %292 = vadd.xlane.f32.xlu0 %v1972_v12 }
  0x55   : > { %294 = vadd.xlane.f32.xlu1 %v1975_v13 }
  0x58   : > { %324 = vadd.xlane.f32.xlu0 %v1980_v14 }
  0x59   : > { %326 = vadd.xlane.f32.xlu1 %v1983_v15 }
  0x5c   : > { %296 = vadd.xlane.f32.xlu0 %v1988_v16 }
  0x5d   : > { %298 = vadd.xlane.f32.xlu1 %v1991_v17 }
  0x60   : > { %328 = vadd.xlane.f32.xlu0 %v1996_v18 }
  0x61   : > { %330 = vadd.xlane.f32.xlu1 %v1999_v19 }
  0x64   : > { %300 = vadd.xlane.f32.xlu0 %v2004_v20 }
  0x65   : > { %302 = vadd.xlane.f32.xlu1 %v2007_v21 }
  0x68   : > { %332 = vadd.xlane.f32.xlu0 %v2012_v22 }
  0x69   : > { %334 = vadd.xlane.f32.xlu1 %v2015_v23 }
  0x6c   : > { %304 = vadd.xlane.f32.xlu0 %v2020_v24 }
  0x6d   : > { %306 = vadd.xlane.f32.xlu1 %v2023_v25 }
  0x70   : > { %336 = vadd.xlane.f32.xlu0 %v2028_v26 }
  0x71   : > { %338 = vadd.xlane.f32.xlu1 %v2031_v27 }
  0x74   : > { %308 = vadd.xlane.f32.xlu0 %v2036_v28 }
  0x75   : > { %310 = vadd.xlane.f32.xlu1 %v2039_v29 }
  0x78   : > { %340 = vadd.xlane.f32.xlu0 %v2044_v30 }
  0x79   : > { %342 = vadd.xlane.f32.xlu1 %v2047_v31 }
  0xc9   : > { %v281_v32 = vpop.xlane.xlu0 %280 }
  0xca   : > { %v313_v33 = vpop.xlane.xlu1 %312  ;;  %v345_v34 = vmul.f32 0.0078125, %v281_v32 }
  0xcb   : > { %v361_v35 = vmul.f32 0.0078125, %v313_v33 }
  0xcc   : > { %v2052_v36 = vsub.f32 %v1924_v0, %v345_v34 }
  0xcd   : > { %v2055_v37 = vsub.f32 %v1927_v1, %v361_v35  ;;  %v283_v38 = vpop.xlane.xlu0 %282 }
  0xce   : > { %v315_v39 = vpop.xlane.xlu1 %314  ;;  %v346_v40 = vmul.f32 0.0078125, %v283_v38  ;;  %v409_v41 = vmul.f32 %v2052_v36, %v2052_v36 }
  0xcf   : > { %v362_v42 = vmul.f32 0.0078125, %v315_v39  ;;  %v425_v44 = vmul.f32 %v2055_v37, %v2055_v37 }
  0xd0   : > { %v2060_v43 = vsub.f32 %v1932_v2, %v346_v40  ;;  %441 = vadd.xlane.f32.xlu0 %v409_v41 }
  0xd1   : > { %v2065_v45 = vsub.f32 %v1935_v3, %v362_v42  ;;  %v285_v46 = vpop.xlane.xlu0 %284 }
  0xd2   : > { %v287_v47 = vpop.xlane.xlu1 %286  ;;  %v347_v48 = vmul.f32 0.0078125, %v285_v46  ;;  %v410_v49 = vmul.f32 %v2060_v43, %v2060_v43 }
  0xd3   : > { %v348_v50 = vmul.f32 0.0078125, %v287_v47  ;;  %v426_v53 = vmul.f32 %v2065_v45, %v2065_v45 }
  0xd4   : > { %v2070_v51 = vsub.f32 %v1940_v4, %v347_v48  ;;  %473 = vadd.xlane.f32.xlu0 %v425_v44  ;;  %443 = vadd.xlane.f32.xlu1 %v410_v49 }
  0xd5   : > { %v2073_v52 = vsub.f32 %v1943_v5, %v348_v50  ;;  %v317_v54 = vpop.xlane.xlu0 %316 }
  0xd6   : > { %v319_v55 = vpop.xlane.xlu1 %318  ;;  %v363_v56 = vmul.f32 0.0078125, %v317_v54  ;;  %v411_v57 = vmul.f32 %v2070_v51, %v2070_v51 }
  0xd7   : > { %v364_v58 = vmul.f32 0.0078125, %v319_v55  ;;  %v412_v60 = vmul.f32 %v2073_v52, %v2073_v52 }
  0xd8   : > { %v2080_v59 = vsub.f32 %v1948_v6, %v363_v56  ;;  %475 = vadd.xlane.f32.xlu1 %v426_v53  ;;  %445 = vadd.xlane.f32.xlu0 %v411_v57 }
  0xd9   : > { %v2085_v61 = vsub.f32 %v1951_v7, %v364_v58  ;;  %v289_v62 = vpop.xlane.xlu0 %288 }
  0xda   : > { %v291_v63 = vpop.xlane.xlu1 %290  ;;  %v349_v0 = vmul.f32 0.0078125, %v289_v62  ;;  %v427_v1 = vmul.f32 %v2080_v59, %v2080_v59 }
  0xdb   : > { %v350_v2 = vmul.f32 0.0078125, %v291_v63  ;;  %v428_v5 = vmul.f32 %v2085_v61, %v2085_v61 }
  0xdc   : > { %v2090_v3 = vsub.f32 %v1954_v8, %v349_v0  ;;  %447 = vadd.xlane.f32.xlu1 %v412_v60  ;;  %477 = vadd.xlane.f32.xlu0 %v427_v1  ;;  %v1499_v0 = vld [vmem:[%s3059_s2] sm:$0xff]  }
  0xdd   : > { %v2093_v4 = vsub.f32 %v1957_v9, %v350_v2  ;;  %v321_v6 = vpop.xlane.xlu0 %320  ;;  %1385 = vmatprep.subr.bf16.mxu0 %v1499_v0  ;;  %1433 = vmatprep.subr.bf16.mxu1 %v1499_v0 }
  0xde   : > { %v323_v7 = vpop.xlane.xlu1 %322  ;;  %v365_v32 = vmul.f32 0.0078125, %v321_v6  ;;  %v413_v33 = vmul.f32 %v2090_v3, %v2090_v3  ;;  %1386 = vmatpush3.bf16.msra.mxu0 %v1499_v0  ;;  %1441 = vmatpush3.bf16.msra.mxu1 %v1499_v0 }
  0xdf   : > { %v366_v34 = vmul.f32 0.0078125, %v323_v7  ;;  %v414_v8 = vmul.f32 %v2093_v4, %v2093_v4 }
  0xe0   : > { %v2100_v35 = vsub.f32 %v1964_v10, %v365_v32  ;;  %479 = vadd.xlane.f32.xlu1 %v428_v5  ;;  %449 = vadd.xlane.f32.xlu0 %v413_v33  ;;  %v1500_v33 = vld [vmem:[%s3059_s2 + $0x8] sm:$0xff]  }
  0xe1   : > { %v2105_v9 = vsub.f32 %v1967_v11, %v366_v34  ;;  %v293_v38 = vpop.xlane.xlu0 %292  ;;  %1387 = vmatprep.subr.bf16.mxu0 %v1500_v33  ;;  %1434 = vmatprep.subr.bf16.mxu1 %v1500_v33 }
  0xe2   : > { %v295_v39 = vpop.xlane.xlu1 %294  ;;  %v351_v40 = vmul.f32 0.0078125, %v293_v38  ;;  %v429_v41 = vmul.f32 %v2100_v35, %v2100_v35  ;;  %1388 = vmatpush3.bf16.msra.mxu0 %v1500_v33  ;;  %1442 = vmatpush3.bf16.msra.mxu1 %v1500_v33 }
  0xe3   : > { %v352_v42 = vmul.f32 0.0078125, %v295_v39  ;;  %v430_v46 = vmul.f32 %v2105_v9, %v2105_v9 }
  0xe4   : > { %v2110_v44 = vsub.f32 %v1972_v12, %v351_v40  ;;  %451 = vadd.xlane.f32.xlu1 %v414_v8  ;;  %481 = vadd.xlane.f32.xlu0 %v429_v41 }
  0xe5   : > { %v2113_v10 = vsub.f32 %v1975_v13, %v352_v42  ;;  %v325_v11 = vpop.xlane.xlu0 %324  ;;  %v1501_v42 = vld [vmem:[%s3059_s2 + $0x10] sm:$0xff]  }
  0xe6   : > { %v327_v47 = vpop.xlane.xlu1 %326  ;;  %v367_v48 = vmul.f32 0.0078125, %v325_v11  ;;  %v415_v49 = vmul.f32 %v2110_v44, %v2110_v44  ;;  %1389 = vmatprep.subr.bf16.mxu0 %v1501_v42  ;;  %1435 = vmatprep.subr.bf16.mxu1 %v1501_v42 }
  0xe7   : > { %v368_v50 = vmul.f32 0.0078125, %v327_v47  ;;  %v416_v12 = vmul.f32 %v2113_v10, %v2113_v10  ;;  %1390 = vmatpush3.bf16.msra.mxu0 %v1501_v42  ;;  %1443 = vmatpush3.bf16.msra.mxu1 %v1501_v42 }
  0xe8   : > { %v2120_v53 = vsub.f32 %v1980_v14, %v367_v48  ;;  %483 = vadd.xlane.f32.xlu1 %v430_v46  ;;  %453 = vadd.xlane.f32.xlu0 %v415_v49 }
  0xe9   : > { %v2125_v13 = vsub.f32 %v1983_v15, %v368_v50  ;;  %v297_v54 = vpop.xlane.xlu0 %296 }
  0xea   : > { %v299_v55 = vpop.xlane.xlu1 %298  ;;  %v353_v56 = vmul.f32 0.0078125, %v297_v54  ;;  %v431_v57 = vmul.f32 %v2120_v53, %v2120_v53 }
  0xeb   : > { %v354_v58 = vmul.f32 0.0078125, %v299_v55  ;;  %v432_v62 = vmul.f32 %v2125_v13, %v2125_v13 }
  0xec   : > { %v2130_v60 = vsub.f32 %v1988_v16, %v353_v56  ;;  %455 = vadd.xlane.f32.xlu1 %v416_v12  ;;  %485 = vadd.xlane.f32.xlu0 %v431_v57  ;;  %v1502_v12 = vld [vmem:[%s3059_s2 + $0x18] sm:$0xff]  }
  0xed   : > { %v2133_v14 = vsub.f32 %v1991_v17, %v354_v58  ;;  %v329_v15 = vpop.xlane.xlu0 %328  ;;  %1391 = vmatprep.subr.bf16.mxu0 %v1502_v12  ;;  %1436 = vmatprep.subr.bf16.mxu1 %v1502_v12 }
  0xee   : > { %v331_v63 = vpop.xlane.xlu1 %330  ;;  %v369_v1 = vmul.f32 0.0078125, %v329_v15  ;;  %v417_v2 = vmul.f32 %v2130_v60, %v2130_v60  ;;  %1392 = vmatpush3.bf16.msra.mxu0 %v1502_v12  ;;  %v1503_v15 = vld [vmem:[%s3059_s2 + $0x20] sm:$0xff]   ;;  %1444 = vmatpush3.bf16.msra.mxu1 %v1502_v12 }
  0xef   : > { %v370_v16 = vmul.f32 0.0078125, %v331_v63  ;;  %v418_v17 = vmul.f32 %v2133_v14, %v2133_v14  ;;  %1393 = vmatprep.subr.bf16.mxu0 %v1503_v15  ;;  %1437 = vmatprep.subr.bf16.mxu1 %v1503_v15 }
  0xf0   : > { %v2143_v5 = vsub.f32 %v1996_v18, %v369_v1  ;;  %487 = vadd.xlane.f32.xlu1 %v432_v62  ;;  %457 = vadd.xlane.f32.xlu0 %v417_v2  ;;  %v2200_v2 = vld [vmem:[%s3061_s4] ss:$0 sm:$0xff] }
  0xf1   : > { %v2148_v6 = vsub.f32 %v1999_v19, %v370_v16  ;;  %v301_v7 = vpop.xlane.xlu0 %300 }
  0xf2   : > { %v303_v32 = vpop.xlane.xlu1 %302  ;;  %v355_v34 = vmul.f32 0.0078125, %v301_v7  ;;  %v433_v18 = vmul.f32 %v2143_v5, %v2143_v5  ;;  %1394 = vmatpush3.bf16.msra.mxu0 %v1503_v15  ;;  %1445 = vmatpush3.bf16.msra.mxu1 %v1503_v15 }
  0xf3   : > { %v356_v8 = vmul.f32 0.0078125, %v303_v32  ;;  %v434_v39 = vmul.f32 %v2148_v6, %v2148_v6  ;;  %v1504_v32 = vld [vmem:[%s3059_s2 + $0x28] sm:$0xff]  }
  0xf4   : > { %v2156_v38 = vsub.f32 %v2004_v20, %v355_v34  ;;  %459 = vadd.xlane.f32.xlu1 %v418_v17  ;;  %489 = vadd.xlane.f32.xlu0 %v433_v18 }
  0xf5   : > { %v2159_v19 = vsub.f32 %v2007_v21, %v356_v8  ;;  %v333_v40 = vpop.xlane.xlu0 %332  ;;  %1395 = vmatprep.subr.bf16.mxu0 %v1504_v32  ;;  %1438 = vmatprep.subr.bf16.mxu1 %v1504_v32 }
  0xf6   : > { %v335_v41 = vpop.xlane.xlu1 %334  ;;  %v371_v46 = vmul.f32 0.0078125, %v333_v40  ;;  %v419_v20 = vmul.f32 %v2156_v38, %v2156_v38  ;;  %1396 = vmatpush3.bf16.msra.mxu0 %v1504_v32  ;;  %1446 = vmatpush3.bf16.msra.mxu1 %v1504_v32  ;;  %v2240_v32 = vmul.f32 %v2200_v2, %v2055_v37 }
  0xf7   : > { %v372_v11 = vmul.f32 0.0078125, %v335_v41  ;;  %v420_v47 = vmul.f32 %v2159_v19, %v2159_v19 }
  0xf8   : > { %v2169_v21 = vsub.f32 %v2012_v22, %v371_v46  ;;  %491 = vadd.xlane.f32.xlu1 %v434_v39  ;;  %461 = vadd.xlane.f32.xlu0 %v419_v20  ;;  %v1505_v46 = vld [vmem:[%s3059_s2 + $0x30] sm:$0xff]  }
  0xf9   : > { %v2174_v48 = vsub.f32 %v2015_v23, %v372_v11  ;;  %v305_v49 = vpop.xlane.xlu0 %304  ;;  %1397 = vmatprep.subr.bf16.mxu0 %v1505_v46  ;;  %1439 = vmatprep.subr.bf16.mxu1 %v1505_v46 }
  0xfa   : > { %v307_v50 = vpop.xlane.xlu1 %306  ;;  %v357_v54 = vmul.f32 0.0078125, %v305_v49  ;;  %v435_v22 = vmul.f32 %v2169_v21, %v2169_v21  ;;  %1398 = vmatpush3.bf16.msra.mxu0 %v1505_v46  ;;  %1447 = vmatpush3.bf16.msra.mxu1 %v1505_v46 }
  0xfb   : > { %v358_v55 = vmul.f32 0.0078125, %v307_v50  ;;  %v436_v57 = vmul.f32 %v2174_v48, %v2174_v48 }
  0xfc   : > { %v2182_v56 = vsub.f32 %v2020_v24, %v357_v54  ;;  %463 = vadd.xlane.f32.xlu1 %v420_v47  ;;  %493 = vadd.xlane.f32.xlu0 %v435_v22 }
  0xfd   : > { %v2185_v23 = vsub.f32 %v2023_v25, %v358_v55  ;;  %v337_v58 = vpop.xlane.xlu0 %336 }
  0xfe   : > { %3072 = vst [vmem:[#allocation10_spill] sm:$0xff] %v2182_v56  ;;  %v339_v62 = vpop.xlane.xlu1 %338  ;;  %v373_v63 = vmul.f32 0.0078125, %v337_v58  ;;  %v421_v24 = vmul.f32 %v2182_v56, %v2182_v56 }
  0xff   : > { %3073 = vst [vmem:[#allocation11_spill] sm:$0xff] %v2185_v23  ;;  %v374_v0 = vmul.f32 0.0078125, %v339_v62  ;;  %v422_v1 = vmul.f32 %v2185_v23, %v2185_v23 }
 0x100   : > { %v405_v25 = vsub.f32 %v2028_v26, %v373_v63  ;;  %495 = vadd.xlane.f32.xlu1 %v436_v57  ;;  %465 = vadd.xlane.f32.xlu0 %v421_v24 }
 0x101   : > { %v406_v16 = vsub.f32 %v2031_v27, %v374_v0  ;;  %v309_v17 = vpop.xlane.xlu0 %308 }
 0x102   : > { %v311_v7 = vpop.xlane.xlu1 %310  ;;  %v2207_v26 = vmul.f32 %v2200_v2, %v405_v25  ;;  %v359_v33 = vmul.f32 0.0078125, %v309_v17  ;;  %v437_v34 = vmul.f32 %v405_v25, %v405_v25 }
 0x103   : > { %v360_v18 = vmul.f32 0.0078125, %v311_v7  ;;  %v2210_v8 = vmul.f32 %v2200_v2, %v406_v16  ;;  %v438_v40 = vmul.f32 %v406_v16, %v406_v16  ;;  %v2236_v7 = vmul.f32 %v2200_v2, %v2052_v36 }
 0x104   : > { %3074 = vst [vmem:[#allocation12_spill] sm:$0xff] %v2207_v26  ;;  %v391_v27 = vsub.f32 %v2036_v28, %v359_v33  ;;  %467 = vadd.xlane.f32.xlu1 %v422_v1  ;;  %497 = vadd.xlane.f32.xlu0 %v437_v34  ;;  %v2244_v33 = vmul.f32 %v2200_v2, %v2060_v43 }
 0x105   : > { %3075 = vst [vmem:[#allocation13_spill] sm:$0xff] %v2210_v8  ;;  %v392_v39 = vsub.f32 %v2039_v29, %v360_v18  ;;  %v341_v41 = vpop.xlane.xlu0 %340  ;;  %v2250_v18 = vmul.f32 %v2200_v2, %v2065_v45  ;;  %v2258_v36 = vmul.f32 %v2200_v2, %v2073_v52  ;;  %v2268_v45 = vmul.f32 %v2200_v2, %v2085_v61 }
 0x106   : > { %v343_v42 = vpop.xlane.xlu1 %342  ;;  %v2218_v20 = vmul.f32 %v2200_v2, %v391_v27  ;;  %v375_v28 = vmul.f32 0.0078125, %v341_v41  ;;  %v423_v47 = vmul.f32 %v391_v27, %v391_v27  ;;  %v2254_v27 = vmul.f32 %v2200_v2, %v2070_v51 }
 0x107   : > { %v2221_v11 = vmul.f32 %v2200_v2, %v392_v39  ;;  %v376_v49 = vmul.f32 0.0078125, %v343_v42  ;;  %v424_v50 = vmul.f32 %v392_v39, %v392_v39  ;;  %v2264_v41 = vmul.f32 %v2200_v2, %v2080_v59 }
 0x108   : > { %3076 = vst [vmem:[#allocation14_spill] sm:$0xff] %v2218_v20  ;;  %v407_v29 = vsub.f32 %v2044_v30, %v375_v28  ;;  %499 = vadd.xlane.f32.xlu1 %v438_v40  ;;  %469 = vadd.xlane.f32.xlu0 %v423_v47  ;;  %v1506_v30 = vld [vmem:[%s3059_s2 + $0x38] sm:$0xff]   ;;  %v2274_v52 = vmul.f32 %v2200_v2, %v2090_v3 }
 0x109   : > { %3077 = vst [vmem:[#allocation15_spill] sm:$0xff] %v2221_v11  ;;  %v408_v12 = vsub.f32 %v2047_v31, %v376_v49  ;;  %1399 = vmatprep.subr.bf16.mxu0 %v1506_v30  ;;  %1440 = vmatprep.subr.bf16.mxu1 %v1506_v30  ;;  %v2280_v47 = vmul.f32 %v2200_v2, %v2093_v4 }
 0x10a   : > { %v2226_v54 = vmul.f32 %v2200_v2, %v407_v29  ;;  %v439_v22 = vmul.f32 %v407_v29, %v407_v29  ;;  %1400 = vmatpush3.bf16.msra.mxu0 %v1506_v30  ;;  %1448 = vmatpush3.bf16.msra.mxu1 %v1506_v30  ;;  %v2291_v4 = vmul.f32 %v2200_v2, %v2100_v35 }
 0x10b   : > { %v2229_v55 = vmul.f32 %v2200_v2, %v408_v12  ;;  %v440_v57 = vmul.f32 %v408_v12, %v408_v12  ;;  %v2298_v30 = vmul.f32 %v2200_v2, %v2105_v9  ;;  %v2309_v35 = vmul.f32 %v2200_v2, %v2113_v10 }
 0x10c   : > { %3078 = vst [vmem:[#allocation16_spill] sm:$0xff] %v2226_v54  ;;  %471 = vadd.xlane.f32.xlu1 %v424_v50  ;;  %501 = vadd.xlane.f32.xlu0 %v439_v22  ;;  %v2330_v10 = vmul.f32 %v2200_v2, %v2143_v5  ;;  %v2350_v5 = vmul.f32 %v2200_v2, %v2169_v21 }
 0x10d   : > { %3079 = vst [vmem:[#allocation17_spill] sm:$0xff] %v2229_v55 }
 0x10e   : > { %3083 = vst [vmem:[#allocation21_spill] sm:$0xff] %v2330_v10  ;;  %3087 = vst [vmem:[#allocation25_spill] sm:$0xff] %v2350_v5 }
 0x110   : > { %503 = vadd.xlane.f32.xlu1 %v440_v57 }
 0x15d   : > { %v442_v31 = vpop.xlane.xlu0 %441 }
 0x15e   : > { %v505_v58 = vmul.f32 0.007874016, %v442_v31 }
 0x160   : > { %1507 = vrsqrt.f32 %v505_v58  ;;  %vm539_vm0 = vcmp.eq.f32.partialorder %v505_v58, inf  ;;  %v542_v59 = vand.u32 2147483648, %v505_v58  ;;  %vm541_vm2 = vcmp.eq.f32.partialorder %v505_v58, 0.0 }
 0x161   : > { %v444_v62 = vpop.xlane.xlu1 %443  ;;  %v474_v15 = vpop.xlane.xlu0 %473 }
 0x162   : > { %v506_v63 = vmul.f32 0.007874016, %v444_v62  ;;  %v2246_v34 = vmul.f32 0.007874016, %v474_v15  ;;  %v2305_v62 = vmul.f32 %v2200_v2, %v2110_v44  ;;  %v2313_v15 = vmul.f32 %v2200_v2, %v2120_v53 }
 0x163   : > { %v2325_v44 = vmul.f32 %v2200_v2, %v2133_v14  ;;  %v2334_v53 = vmul.f32 %v2200_v2, %v2148_v6  ;;  %v2343_v14 = vmul.f32 %v2200_v2, %v2159_v19  ;;  %v2354_v6 = vmul.f32 %v2200_v2, %v2174_v48 }
 0x164   : > { %1509 = vrsqrt.f32 %v506_v63  ;;  %vm546_vm1 = vcmp.eq.f32.partialorder %v506_v63, inf  ;;  %v549_v49 = vand.u32 2147483648, %v506_v63  ;;  %vm548_vm3 = vcmp.eq.f32.partialorder %v506_v63, 0.0 }
 0x165   : > { %v476_v24 = vpop.xlane.xlu1 %475  ;;  %v446_v0 = vpop.xlane.xlu0 %445  ;;  %1511 = vrsqrt.f32 %v2246_v34  ;;  %3082 = vst [vmem:[#allocation20_spill] sm:$0xff] %v2325_v44  ;;  %3084 = vst [vmem:[#allocation22_spill] sm:$0xff] %v2334_v53  ;;  %vm651_vm4 = vcmp.eq.f32.partialorder %v2246_v34, inf  ;;  %v654_v19 = vand.u32 2147483648, %v2246_v34  ;;  %vm653_vm7 = vcmp.eq.f32.partialorder %v2246_v34, 0.0 }
 0x166   : > { %v2260_v37 = vmul.f32 0.007874016, %v476_v24  ;;  %v2270_v51 = vmul.f32 0.007874016, %v446_v0  ;;  %v2317_v0 = vmul.f32 %v2200_v2, %v2125_v13  ;;  %3086 = vst [vmem:[#allocation24_spill] sm:$0xff] %v2343_v14  ;;  %3088 = vst [vmem:[#allocation26_spill] sm:$0xff] %v2354_v6 }
 0x168   : > { %1513 = vrsqrt.f32 %v2260_v37  ;;  %3080 = vst [vmem:[#allocation18_spill] sm:$0xff] %v2317_v0  ;;  %vm658_vm5 = vcmp.eq.f32.partialorder %v2260_v37, inf  ;;  %vm553_vm6 = vcmp.eq.f32.partialorder %v2270_v51, inf  ;;  %vm660_vm9 = vcmp.eq.f32.partialorder %v2260_v37, 0.0 }
 0x169   : > { %v448_v25 = vpop.xlane.xlu1 %447  ;;  %v478_v1 = vpop.xlane.xlu0 %477  ;;  %1515 = vrsqrt.f32 %v2270_v51  ;;  %vm555_vm14 = vcmp.eq.f32.partialorder %v2270_v51, 0.0 }
 0x16a   : > { %v1508_v16 = vpop.eup %1507  ;;  %v2276_v46 = vmul.f32 0.007874016, %v448_v25  ;;  %v2283_v61 = vmul.f32 0.007874016, %v478_v1  ;;  %v2321_v25 = vmul.f32 %v2200_v2, %v2130_v60  ;;  %v2339_v60 = vmul.f32 %v2200_v2, %v2156_v38 }
 0x16b   : > { %v538_v17 = vmul.f32 %v1508_v16, %v505_v58 }
 0x16c   : > { %1517 = vrsqrt.f32 %v2276_v46  ;;  %3081 = vst [vmem:[#allocation19_spill] sm:$0xff] %v2321_v25  ;;  %3085 = vst [vmem:[#allocation23_spill] sm:$0xff] %v2339_v60  ;;  %vm560_vm8 = vcmp.eq.f32.partialorder %v2276_v46, inf  ;;  %vm665_vm10 = vcmp.eq.f32.partialorder %v2283_v61, inf }
 0x16d   : > { %v480_v39 = vpop.xlane.xlu1 %479  ;;  %v450_v40 = vpop.xlane.xlu0 %449  ;;  %v540_v28 = vsel %vm539_vm0, %v505_v58, %v538_v17  ;;  %1519 = vrsqrt.f32 %v2283_v61 }
 0x16e   : > { %v1510_v43 = vpop.eup %1509  ;;  %v2287_v50 = vmul.f32 0.007874016, %v480_v39  ;;  %v543_v12 = vsel %vm541_vm2, %v542_v59, %v540_v28  ;;  %v2294_v57 = vmul.f32 0.007874016, %v450_v40 }
 0x16f   : > { %v545_v42 = vmul.f32 %v1510_v43, %v506_v63  ;;  %v761_v24 = vadd.f32 1e-06, %v543_v12  ;;  %v1512_v17 = vpop.eup %1511 }
 0x170   : > { %1521 = vrsqrt.f32 %v2287_v50  ;;  %v650_v59 = vmul.f32 %v1512_v17, %v2246_v34  ;;  %vm672_vm11 = vcmp.eq.f32.partialorder %v2287_v50, inf  ;;  %vm567_vm12 = vcmp.eq.f32.partialorder %v2294_v57, inf }
 0x171   : > { %v452_v29 = vpop.xlane.xlu1 %451  ;;  %v482_v3 = vpop.xlane.xlu0 %481  ;;  %v547_v22 = vsel %vm546_vm1, %v506_v63, %v545_v42  ;;  %1523 = vrsqrt.f32 %v2294_v57  ;;  %vm562_vm1 = vcmp.eq.f32.partialorder %v2276_v46, 0.0 }
 0x172   : > { %v2301_v31 = vmul.f32 0.007874016, %v452_v29  ;;  %v550_v58 = vsel %vm548_vm3, %v549_v49, %v547_v22  ;;  %v2346_v1 = vmul.f32 0.007874016, %v482_v3  ;;  %v1514_v21 = vpop.eup %1513  ;;  %v652_v49 = vsel %vm651_vm4, %v2246_v34, %v650_v59 }
 0x173   : > { %v762_v13 = vadd.f32 1e-06, %v550_v58  ;;  %v1516_v43 = vpop.eup %1515  ;;  %v657_v58 = vmul.f32 %v1514_v21, %v2260_v37 }
 0x174   : > { %1525 = vrsqrt.f32 %v2301_v31  ;;  %vm574_vm13 = vcmp.eq.f32.partialorder %v2301_v31, inf  ;;  %vm679_vm15 = vcmp.eq.f32.partialorder %v2346_v1, inf }
 0x175   : > { %v484_v63 = vpop.xlane.xlu1 %483  ;;  %v454_v9 = vpop.xlane.xlu0 %453  ;;  %1527 = vrcp.f32 %v761_v24  ;;  %v552_v24 = vmul.f32 %v1516_v43, %v2270_v51 }
 0x176   : > { %v2360_v40 = vmul.f32 0.007874016, %v484_v63  ;;  %v2364_v2 = vmul.f32 0.007874016, %v454_v9  ;;  %1529 = vrcp.f32 %v762_v13  ;;  %v1518_v28 = vpop.eup %1517 }
 0x177   : > { %1531 = vrsqrt.f32 %v2346_v1  ;;  %v1520_v22 = vpop.eup %1519  ;;  %v2407_v48 = vsel %vm553_vm6, %v2270_v51, %v552_v24  ;;  %v655_v24 = vsel %vm653_vm7, %v654_v19, %v652_v49  ;;  %vm667_vm7 = vcmp.eq.f32.partialorder %v2283_v61, 0.0 }
 0x178   : > { %1533 = vrsqrt.f32 %v2360_v40  ;;  %vm686_vm0 = vcmp.eq.f32.partialorder %v2360_v40, inf  ;;  %vm581_vm2 = vcmp.eq.f32.partialorder %v2364_v2, inf }
 0x179   : > { %v456_v38 = vpop.xlane.xlu1 %455  ;;  %v486_v16 = vpop.xlane.xlu0 %485  ;;  %1535 = vrsqrt.f32 %v2364_v2 }
 0x17a   : > { %v2369_v42 = vmul.f32 0.007874016, %v456_v38  ;;  %v2375_v29 = vmul.f32 0.007874016, %v486_v16  ;;  %v1522_v38 = vpop.eup %1521  ;;  %v559_v16 = vmul.f32 %v1518_v28, %v2276_v46 }
 0x17b   : > { %v1524_v21 = vpop.eup %1523 }
 0x17c   : > { %1537 = vrsqrt.f32 %v2369_v42  ;;  %v566_v59 = vmul.f32 %v1524_v21, %v2294_v57  ;;  %vm588_vm3 = vcmp.eq.f32.partialorder %v2369_v42, inf  ;;  %vm693_vm4 = vcmp.eq.f32.partialorder %v2375_v29, inf }
 0x17d   : > { %v488_v3 = vpop.xlane.xlu1 %487  ;;  %v458_v12 = vpop.xlane.xlu0 %457  ;;  %1539 = vrsqrt.f32 %v2375_v29 }
 0x17e   : > { %v2380_v9 = vmul.f32 0.007874016, %v488_v3  ;;  %v2389_v17 = vmul.f32 0.007874016, %v458_v12  ;;  %v664_v3 = vmul.f32 %v1520_v22, %v2283_v61  ;;  %v1526_v28 = vpop.eup %1525  ;;  %v659_v22 = vsel %vm658_vm5, %v2260_v37, %v657_v58 }
 0x17f   : > { %v1528_v43 = vpop.eup %1527  ;;  %v671_v58 = vmul.f32 %v1522_v38, %v2287_v50  ;;  %v3089_v38 = vand.u32 2147483648, %v2260_v37  ;;  %v573_v34 = vmul.f32 %v1526_v28, %v2301_v31  ;;  %v777_v28 = vadd.f32 1e-06, %v655_v24 }
 0x180   : > { %1541 = vrsqrt.f32 %v2380_v9  ;;  %v1530_v39 = vpop.eup %1529  ;;  %v864_v49 = vmul.f32 %v1528_v43, %v2236_v7  ;;  %vm700_vm5 = vcmp.eq.f32.partialorder %v2380_v9, inf  ;;  %vm595_vm6 = vcmp.eq.f32.partialorder %v2389_v17, inf }
 0x181   : > { %v460_v63 = vpop.xlane.xlu1 %459  ;;  %v490_v13 = vpop.xlane.xlu0 %489  ;;  %1543 = vrsqrt.f32 %v2389_v17  ;;  %v662_v20 = vsel %vm660_vm9, %v3089_v38, %v659_v22  ;;  %v865_v37 = vmul.f32 %v1530_v39, %v2244_v33  ;;  %v2462_v39 = vsel %vm567_vm12, %v2294_v57, %v566_v59 }
 0x182   : > { %v2399_v12 = vmul.f32 0.007874016, %v460_v63  ;;  %v2411_v55 = vmul.f32 0.007874016, %v490_v13  ;;  %v2417_v63 = vsel %vm560_vm8, %v2276_v46, %v559_v16  ;;  %v2427_v13 = vsel %vm665_vm10, %v2283_v61, %v664_v3  ;;  %v1532_v8 = vpop.eup %1531  ;;  %v2449_v3 = vld [vmem:[%s3062_s5] ss:$0 sm:$0xff] }
 0x183   : > { %v1534_v22 = vpop.eup %1533  ;;  %v778_v43 = vadd.f32 1e-06, %v662_v20  ;;  %v678_v24 = vmul.f32 %v1532_v8, %v2346_v1  ;;  %v2472_v20 = vsel %vm574_vm13, %v2301_v31, %v573_v34  ;;  %v903_v8 = vadd.f32 %v2449_v3, %v864_v49 }
 0x184   : > { %1545 = vrsqrt.f32 %v2399_v12  ;;  %v1536_v33 = vpop.eup %1535  ;;  %v904_v59 = vadd.f32 %v2449_v3, %v865_v37  ;;  %vm674_vm8 = vcmp.eq.f32.partialorder %v2287_v50, 0.0  ;;  %vm602_vm9 = vcmp.eq.f32.partialorder %v2399_v12, inf }
 0x185   : > { %v492_v54 = vpop.xlane.xlu1 %491  ;;  %v462_v11 = vpop.xlane.xlu0 %461  ;;  %1547 = vrsqrt.f32 %v2411_v55  ;;  %v2489_v49 = vsel %vm679_vm15, %v2346_v1, %v678_v24  ;;  %v580_v37 = vmul.f32 %v1536_v33, %v2364_v2  ;;  %vm707_vm10 = vcmp.eq.f32.partialorder %v2411_v55, inf }
 0x186   : > { %v2438_v19 = vmul.f32 0.007874016, %v492_v54  ;;  %v2443_v21 = vmul.f32 0.007874016, %v462_v11  ;;  %v2454_v54 = vsel %vm672_vm11, %v2287_v50, %v671_v58  ;;  %v1538_v11 = vpop.eup %1537  ;;  %v685_v58 = vmul.f32 %v1534_v22, %v2360_v40 }
 0x187   : > { %v1540_v16 = vpop.eup %1539  ;;  %v935_v5 = vpack.c.bf16 %v904_v59, %v903_v8  ;;  %v587_v8 = vmul.f32 %v1538_v11, %v2369_v42  ;;  %vm569_vm12 = vcmp.eq.f32.partialorder %v2294_v57, 0.0 }
 0x188   : > { %1549 = vrsqrt.f32 %v2438_v19  ;;  %v692_v24 = vmul.f32 %v1540_v16, %v2375_v29  ;;  %v2506_v33 = vsel %vm686_vm0, %v2360_v40, %v685_v58  ;;  %vm714_vm11 = vcmp.eq.f32.partialorder %v2438_v19, inf }
 0x189   : > { %v464_v38 = vpop.xlane.xlu1 %463  ;;  %v494_v7 = vpop.xlane.xlu0 %493  ;;  %1551 = vrsqrt.f32 %v2443_v21  ;;  %1401 = vmatprep.mubr.bf16.mxu0 %v935_v5  ;;  %v3091_v5 = vand.u32 2147483648, %v2276_v46  ;;  %v2532_v46 = vsel %vm588_vm3, %v2369_v42, %v587_v8  ;;  %vm609_vm13 = vcmp.eq.f32.partialorder %v2443_v21, inf }
 0x18a   : > { %v2479_v26 = vmul.f32 0.007874016, %v464_v38  ;;  %v2481_v23 = vmul.f32 0.007874016, %v494_v7  ;;  %1553 = vrcp.f32 %v777_v28  ;;  %v1542_v6 = vpop.eup %1541  ;;  %v3090_v7 = vand.u32 2147483648, %v2270_v51 }
 0x18b   : > { %1555 = vrcp.f32 %v778_v43  ;;  %v1544_v43 = vpop.eup %1543  ;;  %v699_v51 = vmul.f32 %v1542_v6, %v2380_v9  ;;  %v564_v58 = vsel %vm562_vm1, %v3091_v5, %v2417_v63  ;;  %v2524_v6 = vsel %vm581_vm2, %v2364_v2, %v580_v37 }
 0x18c   : > { %1557 = vrsqrt.f32 %v2479_v26  ;;  %v557_v38 = vsel %vm555_vm14, %v3090_v7, %v2407_v48  ;;  %v2537_v63 = vsel %vm693_vm4, %v2375_v29, %v692_v24  ;;  %v764_v5 = vadd.f32 1e-06, %v564_v58 }
 0x18d   : > { %v496_v22 = vpop.xlane.xlu1 %495  ;;  %v466_v28 = vpop.xlane.xlu0 %465  ;;  %1559 = vrsqrt.f32 %v2481_v23  ;;  %v763_v59 = vadd.f32 1e-06, %v557_v38  ;;  %vm616_vm14 = vcmp.eq.f32.partialorder %v2479_v26, inf  ;;  %vm721_vm15 = vcmp.eq.f32.partialorder %v2481_v23, inf }
 0x18e   : > { %v2511_v7 = vmul.f32 0.007874016, %v496_v22  ;;  %v1546_v11 = vpop.eup %1545  ;;  %v2514_v16 = vmul.f32 0.007874016, %v466_v28  ;;  %v594_v22 = vmul.f32 %v1544_v43, %v2389_v17  ;;  %v2546_v43 = vsel %vm700_vm5, %v2380_v9, %v699_v51 }
 0x18f   : > { %v1548_v34 = vpop.eup %1547  ;;  %v601_v8 = vmul.f32 %v1546_v11, %v2399_v12  ;;  %vm576_vm0 = vcmp.eq.f32.partialorder %v2301_v31, 0.0  ;;  %vm681_vm1 = vcmp.eq.f32.partialorder %v2346_v1, 0.0  ;;  %vm688_vm4 = vcmp.eq.f32.partialorder %v2360_v40, 0.0 }
 0x190   : > { %1561 = vrsqrt.f32 %v2511_v7  ;;  %v706_v37 = vmul.f32 %v1548_v34, %v2411_v55  ;;  %v2559_v51 = vsel %vm595_vm6, %v2389_v17, %v594_v22  ;;  %v3093_v34 = vand.u32 2147483648, %v2287_v50 }
 0x191   : > { %v468_v28 = vpop.xlane.xlu1 %467  ;;  %v498_v56 = vpop.xlane.xlu0 %497  ;;  %1563 = vrsqrt.f32 %v2514_v16  ;;  %vm728_vm2 = vcmp.eq.f32.partialorder %v2511_v7, inf  ;;  %vm623_vm3 = vcmp.eq.f32.partialorder %v2514_v16, inf  ;;  %vm583_vm6 = vcmp.eq.f32.partialorder %v2364_v2, 0.0 }
 0x192   : > { %v1550_v38 = vpop.eup %1549  ;;  %1565 = vrcp.f32 %v763_v59  ;;  %v2552_v14 = vmul.f32 0.007874016, %v468_v28  ;;  %v2554_v60 = vmul.f32 0.007874016, %v498_v56  ;;  %v3092_v59 = vand.u32 2147483648, %v2283_v61 }
 0x193   : > { %v1552_v48 = vpop.eup %1551  ;;  %1567 = vrcp.f32 %v764_v5  ;;  %v713_v11 = vmul.f32 %v1550_v38, %v2438_v19  ;;  %v2584_v61 = vsel %vm602_vm9, %v2399_v12, %v601_v8 }
 0x194   : > { %v1554_v53 = vpop.eup %1553  ;;  %1569 = vrsqrt.f32 %v2552_v14  ;;  %v669_v22 = vsel %vm667_vm7, %v3092_v59, %v2427_v13  ;;  %v608_v13 = vmul.f32 %v1552_v48, %v2443_v21  ;;  %vm630_vm5 = vcmp.eq.f32.partialorder %v2552_v14, inf }
 0x195   : > { %v1556_v58 = vpop.eup %1555  ;;  %v880_v56 = vmul.f32 %v1554_v53, %v2240_v32  ;;  %1571 = vrsqrt.f32 %v2554_v60  ;;  %v676_v32 = vsel %vm674_vm8, %v3093_v34, %v2454_v54  ;;  %v500_v53 = vpop.xlane.xlu1 %499  ;;  %v779_v34 = vadd.f32 1e-06, %v669_v22 }
 0x196   : > { %v1558_v28 = vpop.eup %1557  ;;  %v881_v5 = vmul.f32 %v1556_v58, %v2250_v18  ;;  %v470_v24 = vpop.xlane.xlu0 %469  ;;  %v2589_v18 = vsel %vm707_vm10, %v2411_v55, %v706_v37  ;;  %v780_v59 = vadd.f32 1e-06, %v676_v32  ;;  %v2599_v37 = vmul.f32 0.007874016, %v500_v53 }
 0x197   : > { %v1560_v10 = vpop.eup %1559  ;;  %v615_v50 = vmul.f32 %v1558_v28, %v2479_v26  ;;  %v919_v54 = vadd.f32 %v2449_v3, %v880_v56  ;;  %v2601_v44 = vmul.f32 0.007874016, %v470_v24  ;;  %v2606_v38 = vsel %vm714_vm11, %v2438_v19, %v713_v11 }
 0x198   : > { %v920_v58 = vadd.f32 %v2449_v3, %v881_v5  ;;  %v720_v8 = vmul.f32 %v1560_v10, %v2481_v23  ;;  %1573 = vrcp.f32 %v779_v34  ;;  %v2614_v24 = vsel %vm609_vm13, %v2443_v21, %v608_v13 }
 0x199   : > { %1575 = vrcp.f32 %v780_v59  ;;  %v3094_v11 = vand.u32 2147483648, %v2294_v57  ;;  %vm735_vm7 = vcmp.eq.f32.partialorder %v2554_v60, inf  ;;  %v472_v53 = vpop.xlane.xlu1 %471  ;;  %vm590_vm8 = vcmp.eq.f32.partialorder %v2369_v42, 0.0 }
 0x19a   : > { %v1562_v48 = vpop.eup %1561  ;;  %v943_v28 = vpack.c.bf16 %v920_v58, %v919_v54  ;;  %1577 = vrsqrt.f32 %v2599_v37  ;;  %v502_v13 = vpop.xlane.xlu0 %501  ;;  %v2631_v57 = vsel %vm616_vm14, %v2479_v26, %v615_v50  ;;  %v2648_v25 = vmul.f32 0.007874016, %v472_v53 }
 0x19b   : > { %v1564_v10 = vpop.eup %1563  ;;  %v571_v22 = vsel %vm569_vm12, %v3094_v11, %v2462_v39  ;;  %v2636_v39 = vsel %vm721_vm15, %v2481_v23, %v720_v8  ;;  %v727_v58 = vmul.f32 %v1562_v48, %v2511_v7  ;;  %1579 = vrsqrt.f32 %v2601_v44 }
 0x19c   : > { %1417 = vmatprep.mubr.bf16.mxu1 %v943_v28  ;;  %v1566_v54 = vpop.eup %1565  ;;  %v622_v59 = vmul.f32 %v1564_v10, %v2514_v16  ;;  %v3095_v11 = vand.u32 2147483648, %v2301_v31  ;;  %v765_v32 = vadd.f32 1e-06, %v571_v22  ;;  %v2650_v48 = vmul.f32 0.007874016, %v502_v13 }
 0x19d   : > { %v1568_v34 = vpop.eup %1567  ;;  %v866_v28 = vmul.f32 %v1566_v54, %v2254_v27  ;;  %vm742_vm9 = vcmp.eq.f32.partialorder %v2599_v37, inf  ;;  %v745_v54 = vand.u32 2147483648, %v2599_v37  ;;  %vm695_vm10 = vcmp.eq.f32.partialorder %v2375_v29, 0.0  ;;  %v504_v53 = vpop.xlane.xlu1 %503 }
 0x19e   : > { %v578_v50 = vsel %vm576_vm0, %v3095_v11, %v2472_v20  ;;  %v1570_v5 = vpop.eup %1569  ;;  %v867_v8 = vmul.f32 %v1568_v34, %v2258_v36  ;;  %1581 = vrcp.f32 %v765_v32  ;;  %vm702_vm11 = vcmp.eq.f32.partialorder %v2380_v9, 0.0 }
 0x19f   : > { %v766_v56 = vadd.f32 1e-06, %v578_v50  ;;  %v1572_v0 = vpop.eup %1571  ;;  %v905_v10 = vadd.f32 %v2449_v3, %v866_v28  ;;  %v629_v27 = vmul.f32 %v1570_v5, %v2552_v14  ;;  %v3096_v20 = vand.u32 2147483648, %v2346_v1 }
 0x1a0   : > { %v906_v36 = vadd.f32 %v2449_v3, %v867_v8  ;;  %v734_v31 = vmul.f32 %v1572_v0, %v2554_v60  ;;  %v2668_v5 = vsel %vm728_vm2, %v2511_v7, %v727_v58  ;;  %vm637_vm12 = vcmp.eq.f32.partialorder %v2601_v44, inf }
 0x1a1   : > { %1583 = vrcp.f32 %v766_v56  ;;  %v683_v22 = vsel %vm681_vm1, %v3096_v20, %v2489_v49  ;;  %v640_v32 = vand.u32 2147483648, %v2601_v44  ;;  %vm597_vm13 = vcmp.eq.f32.partialorder %v2389_v17, 0.0 }
 0x1a2   : > { %1585 = vrsqrt.f32 %v2648_v25  ;;  %vm604_vm14 = vcmp.eq.f32.partialorder %v2399_v12, 0.0  ;;  %vm709_vm15 = vcmp.eq.f32.partialorder %v2411_v55, 0.0  ;;  %v2679_v0 = vsel %vm623_vm3, %v2514_v16, %v622_v59  ;;  %v1574_v56 = vpop.eup %1573 }
 0x1a3   : > { %v936_v1 = vpack.c.bf16 %v906_v36, %v905_v10  ;;  %v2684_v49 = vsel %vm630_vm5, %v2552_v14, %v629_v27  ;;  %1587 = vrsqrt.f32 %v2650_v48  ;;  %v2690_v13 = vsel %vm735_vm7, %v2554_v60, %v734_v31  ;;  %v1576_v11 = vpop.eup %1575 }
 0x1a4   : > { %v647_v58 = vand.u32 2147483648, %v2648_v25  ;;  %v3097_v34 = vand.u32 2147483648, %v2360_v40  ;;  %v781_v28 = vadd.f32 1e-06, %v683_v22  ;;  %v882_v50 = vmul.f32 %v1574_v56, %v2264_v41  ;;  %v1578_v31 = vpop.eup %1577 }
 0x1a5   : > { %1402 = vmatmul.mubr.bf16.vlgmr.msra.gmra.mrb[0].mxu0 %v936_v1  ;;  %v2699_v10 = vmul.f32 0.007874016, %v504_v53  ;;  %v3098_v27 = vand.u32 2147483648, %v2364_v2  ;;  %vm716_vm0 = vcmp.eq.f32.partialorder %v2438_v19, 0.0  ;;  %v883_v40 = vmul.f32 %v1576_v11, %v2268_v45  ;;  %v1580_v22 = vpop.eup %1579 }
 0x1a6   : > { %v690_v59 = vsel %vm688_vm4, %v3097_v34, %v2506_v33  ;;  %vm644_vm1 = vcmp.eq.f32.partialorder %v2648_v25, inf  ;;  %1589 = vrcp.f32 %v781_v28  ;;  %v3099_v41 = vand.u32 2147483648, %v2369_v42 }
 0x1a7   : > { %v782_v8 = vadd.f32 1e-06, %v690_v59  ;;  %v585_v36 = vsel %vm583_vm6, %v3098_v27, %v2524_v6  ;;  %v741_v53 = vmul.f32 %v1578_v31, %v2599_v37  ;;  %vm749_vm2 = vcmp.eq.f32.partialorder %v2650_v48, inf }
 0x1a8   : > { %v592_v33 = vsel %vm590_vm8, %v3099_v41, %v2532_v46  ;;  %v767_v20 = vadd.f32 1e-06, %v585_v36  ;;  %v752_v2 = vand.u32 2147483648, %v2650_v48  ;;  %vm611_vm3 = vcmp.eq.f32.partialorder %v2443_v21, 0.0  ;;  %v1582_v34 = vpop.eup %1581 }
 0x1a9   : > { %1591 = vrcp.f32 %v782_v8  ;;  %vm618_vm4 = vcmp.eq.f32.partialorder %v2479_v26, 0.0  ;;  %v921_v45 = vadd.f32 %v2449_v3, %v882_v50  ;;  %v922_v6 = vadd.f32 %v2449_v3, %v883_v40 }
 0x1aa   : > { %v636_v42 = vmul.f32 %v1580_v22, %v2601_v44  ;;  %1593 = vrsqrt.f32 %v2699_v10  ;;  %v2726_v46 = vsel %vm742_vm9, %v2599_v37, %v741_v53  ;;  %v759_v1 = vand.u32 2147483648, %v2699_v10 }
 0x1ab   : > { %v768_v56 = vadd.f32 1e-06, %v592_v33  ;;  %1595 = vrcp.f32 %v767_v20  ;;  %vm723_vm5 = vcmp.eq.f32.partialorder %v2481_v23, 0.0  ;;  %vm730_vm6 = vcmp.eq.f32.partialorder %v2511_v7, 0.0  ;;  %v1584_v36 = vpop.eup %1583 }
 0x1ac   : > { %v944_v59 = vpack.c.bf16 %v922_v6, %v921_v45  ;;  %v2734_v28 = vsel %vm637_vm12, %v2601_v44, %v636_v42  ;;  %v3100_v11 = vand.u32 2147483648, %v2375_v29  ;;  %v3101_v8 = vand.u32 2147483648, %v2380_v9  ;;  %v1586_v33 = vpop.eup %1585 }
 0x1ad   : > { %v868_v31 = vmul.f32 %v1582_v34, %v2274_v52  ;;  %1597 = vrcp.f32 %v768_v56  ;;  %vm625_vm7 = vcmp.eq.f32.partialorder %v2514_v16, 0.0  ;;  %v869_v20 = vmul.f32 %v1584_v36, %v2280_v47  ;;  %v1588_v22 = vpop.eup %1587 }
 0x1ae   : > { %v697_v50 = vsel %vm695_vm10, %v3100_v11, %v2537_v63  ;;  %v704_v27 = vsel %vm702_vm11, %v3101_v8, %v2546_v43  ;;  %1418 = vmatmul.mubr.bf16.vlgmr.msra.gmra.mrb[0].mxu1 %v944_v59  ;;  %vm756_vm8 = vcmp.eq.f32.partialorder %v2699_v10, inf  ;;  %v3102_v29 = vand.u32 2147483648, %v2389_v17 }
 0x1af   : > { %v783_v40 = vadd.f32 1e-06, %v697_v50  ;;  %v784_v41 = vadd.f32 1e-06, %v704_v27  ;;  %v3103_v52 = vand.u32 2147483648, %v2399_v12  ;;  %v3104_v43 = vand.u32 2147483648, %v2411_v55 }
 0x1b0   : > { %v599_v9 = vsel %vm597_vm13, %v3102_v29, %v2559_v51  ;;  %v907_v53 = vadd.f32 %v2449_v3, %v868_v31  ;;  %v643_v45 = vmul.f32 %v1586_v33, %v2648_v25  ;;  %vm632_vm9 = vcmp.eq.f32.partialorder %v2552_v14, 0.0  ;;  %v1590_v56 = vpop.eup %1589 }
 0x1b1   : > { %v606_v63 = vsel %vm604_vm14, %v3103_v52, %v2584_v61  ;;  %v711_v47 = vsel %vm709_vm15, %v3104_v43, %v2589_v18  ;;  %1599 = vrcp.f32 %v783_v40  ;;  %v769_v17 = vadd.f32 1e-06, %v599_v9 }
 0x1b2   : > { %vm737_vm10 = vcmp.eq.f32.partialorder %v2554_v60, 0.0  ;;  %v908_v12 = vadd.f32 %v2449_v3, %v869_v20  ;;  %v748_v51 = vmul.f32 %v1588_v22, %v2650_v48  ;;  %1601 = vrcp.f32 %v784_v41 }
 0x1b3   : > { %v770_v61 = vadd.f32 1e-06, %v606_v63  ;;  %vm744_vm11 = vcmp.eq.f32.partialorder %v2599_v37, 0.0  ;;  %v2775_v55 = vsel %vm644_vm1, %v2648_v25, %v643_v45  ;;  %1603 = vrcp.f32 %v769_v17  ;;  %v1592_v50 = vpop.eup %1591 }
 0x1b4   : > { %v3105_v18 = vand.u32 2147483648, %v2438_v19  ;;  %v785_v42 = vadd.f32 1e-06, %v711_v47  ;;  %v937_v34 = vpack.c.bf16 %v908_v12, %v907_v53  ;;  %v2785_v59 = vsel %vm749_vm2, %v2650_v48, %v748_v51  ;;  %v1594_v31 = vpop.eup %1593 }
 0x1b5   : > { %1605 = vrcp.f32 %v770_v61  ;;  %v884_v8 = vmul.f32 %v1590_v56, %v2291_v4  ;;  %v3106_v27 = vand.u32 2147483648, %v2443_v21  ;;  %vm639_vm12 = vcmp.eq.f32.partialorder %v2601_v44, 0.0  ;;  %v1596_v33 = vpop.eup %1595 }
 0x1b6   : > { %v718_v6 = vsel %vm716_vm0, %v3105_v18, %v2606_v38  ;;  %1607 = vrcp.f32 %v785_v42  ;;  %v3107_v38 = vand.u32 2147483648, %v2479_v26  ;;  %1405 = vmatprep.mubr.bf16.mxu0 %v937_v34  ;;  %v885_v40 = vmul.f32 %v1592_v50, %v2298_v30  ;;  %v3113_v18 = vld [vmem:[#allocation18_spill] sm:$0xff] }
 0x1b7   : > { %v786_v11 = vadd.f32 1e-06, %v718_v6  ;;  %v613_v19 = vsel %vm611_vm3, %v3106_v27, %v2614_v24  ;;  %vm646_vm13 = vcmp.eq.f32.partialorder %v2648_v25, 0.0  ;;  %v923_v21 = vadd.f32 %v2449_v3, %v884_v8  ;;  %v1598_v63 = vpop.eup %1597  ;;  %v3115_v27 = vld [vmem:[#allocation20_spill] sm:$0xff] }
 0x1b8   : > { %v620_v36 = vsel %vm618_vm4, %v3107_v38, %v2631_v57  ;;  %v771_v4 = vadd.f32 1e-06, %v613_v19  ;;  %v755_v24 = vmul.f32 %v1594_v31, %v2699_v10  ;;  %v3108_v26 = vand.u32 2147483648, %v2481_v23  ;;  %v3116_v38 = vld [vmem:[#allocation21_spill] sm:$0xff] }
 0x1b9   : > { %1609 = vrcp.f32 %v786_v11  ;;  %v772_v41 = vadd.f32 1e-06, %v620_v36  ;;  %v3109_v20 = vand.u32 2147483648, %v2511_v7  ;;  %v924_v29 = vadd.f32 %v2449_v3, %v885_v40  ;;  %v3114_v11 = vld [vmem:[#allocation19_spill] sm:$0xff] }
 0x1ba   : > { %v725_v57 = vsel %vm723_vm5, %v3108_v26, %v2636_v39  ;;  %v870_v9 = vmul.f32 %v1596_v33, %v2305_v62  ;;  %1611 = vrcp.f32 %v771_v4  ;;  %vm751_vm14 = vcmp.eq.f32.partialorder %v2650_v48, 0.0 }
 0x1bb   : > { %v732_v30 = vsel %vm730_vm6, %v3109_v20, %v2668_v5  ;;  %v787_v52 = vadd.f32 1e-06, %v725_v57  ;;  %v757_v23 = vsel %vm756_vm8, %v2699_v10, %v755_v24  ;;  %vm758_vm15 = vcmp.eq.f32.partialorder %v2699_v10, 0.0  ;;  %v1600_v22 = vpop.eup %1599  ;;  %v3118_v57 = vld [vmem:[#allocation23_spill] sm:$0xff]  ;;  %v1635_v10 = vld [vmem:[%s3061_s4] ss:$0 sm:$0xff] }
 0x1bc   : > { %1613 = vrcp.f32 %v772_v41  ;;  %v788_v39 = vadd.f32 1e-06, %v732_v30  ;;  %v3110_v7 = vand.u32 2147483648, %v2514_v16  ;;  %v945_v62 = vpack.c.bf16 %v924_v29, %v923_v21  ;;  %v3117_v41 = vld [vmem:[#allocation22_spill] sm:$0xff]  ;;  %v3119_v29 = vld [vmem:[#allocation24_spill] sm:$0xff] }
 0x1bd   : > { %v871_v43 = vmul.f32 %v1598_v63, %v2309_v35  ;;  %v909_v47 = vadd.f32 %v2449_v3, %v870_v9  ;;  %1615 = vrcp.f32 %v787_v52  ;;  %v3111_v53 = vand.u32 2147483648, %v2552_v14 }
 0x1be   : > { %v627_v5 = vsel %vm625_vm7, %v3110_v7, %v2679_v0  ;;  %1617 = vrcp.f32 %v788_v39  ;;  %v3112_v12 = vand.u32 2147483648, %v2554_v60  ;;  %v1602_v0 = vpop.eup %1601  ;;  %1421 = vmatprep.mubr.bf16.mxu1 %v945_v62  ;;  %v886_v51 = vmul.f32 %v1600_v22, %v2313_v15  ;;  %v3122_v62 = vld [vmem:[#allocation26_spill] sm:$0xff]  ;;  %v3123_v22 = vld [vmem:[#allocation11_spill] sm:$0xff] }
 0x1bf   : > { %v634_v45 = vsel %vm632_vm9, %v3111_v53, %v2684_v49  ;;  %v773_v17 = vadd.f32 1e-06, %v627_v5  ;;  %v910_v35 = vadd.f32 %v2449_v3, %v871_v43  ;;  %v746_v14 = vsel %vm744_vm11, %v745_v54, %v2726_v46  ;;  %v1604_v49 = vpop.eup %1603 }
 0x1c0   : > { %v739_v16 = vsel %vm737_vm10, %v3112_v12, %v2690_v13  ;;  %v774_v61 = vadd.f32 1e-06, %v634_v45  ;;  %v887_v6 = vmul.f32 %v1602_v0, %v3113_v18  ;;  %v790_v60 = vadd.f32 1e-06, %v746_v14  ;;  %v1606_v13 = vpop.eup %1605 }
 0x1c1   : > { %1619 = vrcp.f32 %v773_v17  ;;  %v789_v42 = vadd.f32 1e-06, %v739_v16  ;;  %v938_v56 = vpack.c.bf16 %v910_v35, %v909_v47  ;;  %v925_v34 = vadd.f32 %v2449_v3, %v886_v51  ;;  %v1608_v15 = vpop.eup %1607 }
 0x1c2   : > { %v872_v50 = vmul.f32 %v1604_v49, %v3114_v11  ;;  %1621 = vrcp.f32 %v774_v61  ;;  %v926_v8 = vadd.f32 %v2449_v3, %v887_v6  ;;  %v873_v19 = vmul.f32 %v1606_v13, %v3115_v27  ;;  %v3124_v49 = vld [vmem:[#allocation12_spill] sm:$0xff] }
 0x1c3   : > { %1623 = vrcp.f32 %v789_v42  ;;  %v641_v37 = vsel %vm639_vm12, %v640_v32, %v2734_v28  ;;  %v1610_v54 = vpop.eup %1609  ;;  %1406 = vmatmul.mubr.bf16.gmra.mrb[4].mxu0 %v938_v56  ;;  %v888_v36 = vmul.f32 %v1608_v15, %v3116_v38  ;;  %v648_v31 = vsel %vm646_vm13, %v647_v58, %v2775_v55 }
 0x1c4   : > { %v911_v46 = vadd.f32 %v2449_v3, %v872_v50  ;;  %1625 = vrcp.f32 %v790_v60  ;;  %v946_v40 = vpack.c.bf16 %v926_v8, %v925_v34  ;;  %v912_v4 = vadd.f32 %v2449_v3, %v873_v19  ;;  %v1612_v32 = vpop.eup %1611  ;;  %v3125_v60 = vld [vmem:[#allocation13_spill] sm:$0xff]  ;;  %v3126_v8 = vld [vmem:[#allocation14_spill] sm:$0xff] }
 0x1c5   : > { %v889_v33 = vmul.f32 %v1610_v54, %v3117_v41  ;;  %v775_v44 = vadd.f32 1e-06, %v641_v37  ;;  %v927_v28 = vadd.f32 %v2449_v3, %v888_v36  ;;  %v776_v21 = vadd.f32 1e-06, %v648_v31  ;;  %v3127_v37 = vld [vmem:[#allocation15_spill] sm:$0xff]  ;;  %v3129_v41 = vld [vmem:[#allocation17_spill] sm:$0xff] }
 0x1c6   : > { %v753_v24 = vsel %vm751_vm14, %v752_v2, %v2785_v59  ;;  %v760_v25 = vsel %vm758_vm15, %v759_v1, %v757_v23  ;;  %v1614_v58 = vpop.eup %1613  ;;  %1422 = vmatmul.mubr.bf16.gmra.mrb[4].mxu1 %v946_v40  ;;  %v939_v55 = vpack.c.bf16 %v912_v4, %v911_v46  ;;  %v874_v20 = vmul.f32 %v1612_v32, %v3118_v57  ;;  %v3120_v1 = vld [vmem:[#allocation10_spill] sm:$0xff]  ;;  %v3121_v23 = vld [vmem:[#allocation25_spill] sm:$0xff]  ;;  %v3128_v40 = vld [vmem:[#allocation16_spill] sm:$0xff] }
 0x1c7   : > { %v928_v26 = vadd.f32 %v2449_v3, %v889_v33  ;;  %1627 = vrcp.f32 %v775_v44  ;;  %v1616_v30 = vpop.eup %1615  ;;  %v875_v9 = vmul.f32 %v1614_v58, %v3119_v29  ;;  %v791_v52 = vadd.f32 1e-06, %v753_v24  ;;  %v2904_v24 = vld [vmem:[%s3060_s3] ss:$0 sm:$0xff] }
 0x1c8   : > { %1629 = vrcp.f32 %v776_v21  ;;  %v792_v48 = vadd.f32 1e-06, %v760_v25  ;;  %v1618_v2 = vpop.eup %1617  ;;  %v844_v59 = vmul.f32 %v1635_v10, %v3120_v1  ;;  %1409 = vmatprep.mubr.bf16.mxu0 %v939_v55  ;;  %v890_v39 = vmul.f32 %v1616_v30, %v3121_v23  ;;  %v1639_v1 = vld [vmem:[%s1917_s30 + $0x8] sm:$0xff] }
 0x1c9   : > { %v947_v63 = vpack.c.bf16 %v928_v26, %v927_v28  ;;  %v913_v7 = vadd.f32 %v2449_v3, %v874_v20  ;;  %v914_v5 = vadd.f32 %v2449_v3, %v875_v9  ;;  %v891_v43 = vmul.f32 %v1618_v2, %v3122_v62  ;;  %v1636_v20 = vld [vmem:[%s1917_s30 + $0x10] sm:$0xff]  ;;  %v1637_v9 = vld [vmem:[%s1917_s30] sm:$0xff]  ;;  %v1638_v2 = vld [vmem:[%s1917_s30 + $0x18] sm:$0xff] }
 0x1ca   : > { %1631 = vrcp.f32 %v791_v52  ;;  %v845_v53 = vmul.f32 %v1635_v10, %v3123_v22  ;;  %v929_v12 = vadd.f32 %v2449_v3, %v890_v39  ;;  %v1640_v62 = vld [vmem:[%s1917_s30 + $0x90] sm:$0xff] }
 0x1cb   : > { %v1620_v47 = vpop.eup %1619  ;;  %1425 = vmatprep.mubr.bf16.mxu1 %v947_v63  ;;  %1633 = vrcp.f32 %v792_v48  ;;  %v940_v17 = vpack.c.bf16 %v914_v5, %v913_v7  ;;  %v930_v16 = vadd.f32 %v2449_v3, %v891_v43 }
 0x1cc   : > { %v1622_v45 = vpop.eup %1621  ;;  %v876_v0 = vmul.f32 %v1620_v47, %v844_v59 }
 0x1cd   : > { %v1624_v35 = vpop.eup %1623  ;;  %v877_v51 = vmul.f32 %v1622_v45, %v845_v53  ;;  %1410 = vmatmul.mubr.bf16.gmra.mrb[8].mxu0 %v940_v17  ;;  %v948_v14 = vpack.c.bf16 %v930_v16, %v929_v12  ;;  %v1641_v53 = vld [vmem:[%s1917_s30 + $0x80] sm:$0xff]  ;;  %v1642_v12 = vld [vmem:[%s1917_s30 + $0x98] sm:$0xff] }
 0x1ce   : > { %v1626_v61 = vpop.eup %1625  ;;  %v892_v18 = vmul.f32 %v1624_v35, %v3124_v49  ;;  %v915_v6 = vadd.f32 %v2449_v3, %v876_v0  ;;  %v1643_v0 = vld [vmem:[%s1917_s30 + $0x88] sm:$0xff] }
 0x1cf   : > { %v916_v42 = vadd.f32 %v2449_v3, %v877_v51  ;;  %v893_v13 = vmul.f32 %v1626_v61, %v3125_v60  ;;  %1426 = vmatmul.mubr.bf16.gmra.mrb[8].mxu1 %v948_v14 }
 0x1d0   : > { %v931_v11 = vadd.f32 %v2449_v3, %v892_v18 }
 0x1d1   : > { %v1628_v56 = vpop.eup %1627  ;;  %v941_v34 = vpack.c.bf16 %v916_v42, %v915_v6  ;;  %v932_v50 = vadd.f32 %v2449_v3, %v893_v13  ;;  %v1644_v6 = vld [vmem:[%s1917_s30 + $0x30] sm:$0xff] }
 0x1d2   : > { %v1630_v15 = vpop.eup %1629  ;;  %v878_v27 = vmul.f32 %v1628_v56, %v3126_v8 }
 0x1d3   : > { %1413 = vmatprep.mubr.bf16.mxu0 %v941_v34  ;;  %v949_v19 = vpack.c.bf16 %v932_v50, %v931_v11  ;;  %v879_v54 = vmul.f32 %v1630_v15, %v3127_v37  ;;  %v1645_v34 = vld [vmem:[%s1917_s30 + $0x20] sm:$0xff] }
 0x1d4   : > { %v1632_v46 = vpop.eup %1631  ;;  %v917_v36 = vadd.f32 %v2449_v3, %v878_v27  ;;  %v1646_v27 = vld [vmem:[%s1917_s30 + $0x38] sm:$0xff] }
 0x1d5   : > { %v1634_v38 = vpop.eup %1633  ;;  %1429 = vmatprep.mubr.bf16.mxu1 %v949_v19  ;;  %v918_v31 = vadd.f32 %v2449_v3, %v879_v54  ;;  %v894_v4 = vmul.f32 %v1632_v46, %v3128_v40  ;;  %v1647_v46 = vld [vmem:[%s1917_s30 + $0x28] sm:$0xff] }
 0x1d6   : > { %v895_v33 = vmul.f32 %v1634_v38, %v3129_v41  ;;  %v1649_v41 = vld [vmem:[%s1917_s30 + $0xa0] sm:$0xff] }
 0x1d7   : > { %v942_v44 = vpack.c.bf16 %v918_v31, %v917_v36  ;;  %v933_v32 = vadd.f32 %v2449_v3, %v894_v4  ;;  %v1648_v36 = vld [vmem:[%s1917_s30 + $0xb0] sm:$0xff] }
 0x1d8   : > { %v934_v28 = vadd.f32 %v2449_v3, %v895_v33 }
 0x1d9   : > { %1414 = vmatmul.mubr.bf16.gmra.mrb[12].mxu0 %v942_v44 }
 0x1da   : > { %v950_v21 = vpack.c.bf16 %v934_v28, %v933_v32  ;;  %v1650_v32 = vld [vmem:[%s1917_s30 + $0xb8] sm:$0xff] }
 0x1dc   : > { %1430 = vmatmul.mubr.bf16.gmra.mrb[12].mxu1 %v950_v21  ;;  %v1651_v21 = vld [vmem:[%s1917_s30 + $0xa8] sm:$0xff] }
 0x278   : > { %v1403_v25 = vpop.f32.mrb[0].mxu0 }
 0x279   : > { %v1065_v58 = vadd.f32 %v1403_v25, %v2904_v24  ;;  %v1056_v55 = vpop.f32.mrb[1].mxu0 }
 0x27a   : > { %v1057_v26 = vadd.f32 %v2904_v24, %v1056_v55  ;;  %v1404_v57 = vpop.f32.mrb[2].mxu0 }
 0x27b   : > { %v1185_v3 = vadd.f32 %v1636_v20, %v1065_v58  ;;  %v1068_v30 = vadd.f32 %v1404_v57, %v2904_v24  ;;  %v1059_v29 = vpop.f32.mrb[3].mxu0 }
 0x27c   : > { %v1183_v52 = vadd.f32 %v1637_v9, %v1057_v26  ;;  %v1060_v48 = vadd.f32 %v2904_v24, %v1059_v29 }
 0x27d   : > { %1217 = vst [vmem:[%s2914_s20 + $0x10] sm:$0xff] %v1185_v3  ;;  %v1186_v10 = vadd.f32 %v1638_v2, %v1068_v30  ;;  %v1652_v30 = vld [vmem:[%s1917_s30 + $0x50] sm:$0xff] }
 0x27e   : > { %1215 = vst [vmem:[%s2914_s20] sm:$0xff] %v1183_v52  ;;  %v1184_v59 = vadd.f32 %v1639_v1, %v1060_v48 }
 0x27f   : > { %1218 = vst [vmem:[%s2914_s20 + $0x18] sm:$0xff] %v1186_v10  ;;  %v1653_v10 = vld [vmem:[%s1917_s30 + $0x40] sm:$0xff] }
 0x280   : > { %1216 = vst [vmem:[%s2914_s20 + $0x8] sm:$0xff] %v1184_v59 }
 0x281   : > { %v1419_v63 = vpop.f32.mrb[0].mxu1 }
 0x282   : > { %v1129_v23 = vadd.f32 %v1419_v63, %v2904_v24  ;;  %v1120_v39 = vpop.f32.mrb[1].mxu1 }
 0x283   : > { %v1121_v7 = vadd.f32 %v2904_v24, %v1120_v39  ;;  %v1420_v5 = vpop.f32.mrb[2].mxu1  ;;  %v1654_v39 = vld [vmem:[%s1917_s30 + $0x58] sm:$0xff] }
 0x284   : > { %v1201_v43 = vadd.f32 %v1640_v62, %v1129_v23  ;;  %v1132_v47 = vadd.f32 %v1420_v5, %v2904_v24  ;;  %v1123_v22 = vpop.f32.mrb[3].mxu1  ;;  %v1655_v5 = vld [vmem:[%s1917_s30 + $0xd0] sm:$0xff] }
 0x285   : > { %v1199_v45 = vadd.f32 %v1641_v53, %v1121_v7  ;;  %v1124_v17 = vadd.f32 %v2904_v24, %v1123_v22  ;;  %v1656_v22 = vld [vmem:[%s1917_s30 + $0x48] sm:$0xff] }
 0x286   : > { %1233 = vst [vmem:[%s2914_s20 + $0x90] sm:$0xff] %v1201_v43  ;;  %v1202_v16 = vadd.f32 %v1642_v12, %v1132_v47 }
 0x287   : > { %1231 = vst [vmem:[%s2914_s20 + $0x80] sm:$0xff] %v1199_v45  ;;  %v1200_v35 = vadd.f32 %v1643_v0, %v1124_v17  ;;  %v1657_v45 = vld [vmem:[%s1917_s30 + $0xc0] sm:$0xff] }
 0x288   : > { %1234 = vst [vmem:[%s2914_s20 + $0x98] sm:$0xff] %v1202_v16  ;;  %v1658_v16 = vld [vmem:[%s1917_s30 + $0xd8] sm:$0xff] }
 0x289   : > { %1232 = vst [vmem:[%s2914_s20 + $0x88] sm:$0xff] %v1200_v35  ;;  %v1659_v35 = vld [vmem:[%s1917_s30 + $0xc8] sm:$0xff] }
 0x296   : > { %v1407_v51 = vpop.f32.mrb[4].mxu0 }
 0x297   : > { %v1081_v61 = vadd.f32 %v1407_v51, %v2904_v24  ;;  %v1072_v14 = vpop.f32.mrb[5].mxu0 }
 0x298   : > { %v1073_v49 = vadd.f32 %v2904_v24, %v1072_v14  ;;  %v1408_v18 = vpop.f32.mrb[6].mxu0 }
 0x299   : > { %v1189_v42 = vadd.f32 %v1644_v6, %v1081_v61  ;;  %v1084_v60 = vadd.f32 %v1408_v18, %v2904_v24  ;;  %v1075_v13 = vpop.f32.mrb[7].mxu0  ;;  %v1423_v56 = vpop.f32.mrb[4].mxu1 }
 0x29a   : > { %v1187_v11 = vadd.f32 %v1645_v34, %v1073_v49  ;;  %v1076_v50 = vadd.f32 %v2904_v24, %v1075_v13  ;;  %v1145_v15 = vadd.f32 %v1423_v56, %v2904_v24  ;;  %v1136_v8 = vpop.f32.mrb[5].mxu1 }
 0x29b   : > { %1221 = vst [vmem:[%s2914_s20 + $0x30] sm:$0xff] %v1189_v42  ;;  %v1190_v19 = vadd.f32 %v1646_v27, %v1084_v60  ;;  %v1137_v37 = vadd.f32 %v2904_v24, %v1136_v8  ;;  %v1424_v54 = vpop.f32.mrb[6].mxu1  ;;  %v1660_v42 = vld [vmem:[%s1917_s30 + $0x70] sm:$0xff] }
 0x29c   : > { %1219 = vst [vmem:[%s2914_s20 + $0x20] sm:$0xff] %v1187_v11  ;;  %v1188_v38 = vadd.f32 %v1647_v46, %v1076_v50  ;;  %v1205_v31 = vadd.f32 %v1648_v36, %v1145_v15  ;;  %v1148_v40 = vadd.f32 %v1424_v54, %v2904_v24  ;;  %v1139_v4 = vpop.f32.mrb[7].mxu1  ;;  %v1661_v11 = vld [vmem:[%s1917_s30 + $0x60] sm:$0xff] }
 0x29d   : > { %1222 = vst [vmem:[%s2914_s20 + $0x38] sm:$0xff] %v1190_v19  ;;  %v1203_v33 = vadd.f32 %v1649_v41, %v1137_v37  ;;  %v1140_v44 = vadd.f32 %v2904_v24, %v1139_v4  ;;  %v1662_v19 = vld [vmem:[%s1917_s30 + $0x78] sm:$0xff] }
 0x29e   : > { %1220 = vst [vmem:[%s2914_s20 + $0x28] sm:$0xff] %v1188_v38  ;;  %1237 = vst [vmem:[%s2914_s20 + $0xb0] sm:$0xff] %v1205_v31  ;;  %v1206_v28 = vadd.f32 %v1650_v32, %v1148_v40  ;;  %v1663_v38 = vld [vmem:[%s1917_s30 + $0x68] sm:$0xff]  ;;  %v1664_v31 = vld [vmem:[%s1917_s30 + $0xf0] sm:$0xff] }
 0x29f   : > { %1235 = vst [vmem:[%s2914_s20 + $0xa0] sm:$0xff] %v1203_v33  ;;  %v1204_v25 = vadd.f32 %v1651_v21, %v1140_v44  ;;  %v1665_v33 = vld [vmem:[%s1917_s30 + $0xe0] sm:$0xff] }
 0x2a0   : > { %1238 = vst [vmem:[%s2914_s20 + $0xb8] sm:$0xff] %v1206_v28  ;;  %v1411_v58 = vpop.f32.mrb[8].mxu0  ;;  %v1666_v28 = vld [vmem:[%s1917_s30 + $0xf8] sm:$0xff] }
 0x2a1   : > { %1236 = vst [vmem:[%s2914_s20 + $0xa8] sm:$0xff] %v1204_v25  ;;  %v1097_v55 = vadd.f32 %v1411_v58, %v2904_v24  ;;  %v1088_v26 = vpop.f32.mrb[9].mxu0  ;;  %v1667_v25 = vld [vmem:[%s1917_s30 + $0xe8] sm:$0xff] }
 0x2a2   : > { %v1089_v57 = vadd.f32 %v2904_v24, %v1088_v26  ;;  %v1412_v20 = vpop.f32.mrb[10].mxu0  ;;  %v1427_v3 = vpop.f32.mrb[8].mxu1 }
 0x2a3   : > { %v1193_v29 = vadd.f32 %v1652_v30, %v1097_v55  ;;  %v1100_v9 = vadd.f32 %v1412_v20, %v2904_v24  ;;  %v1091_v52 = vpop.f32.mrb[11].mxu0  ;;  %v1161_v48 = vadd.f32 %v1427_v3, %v2904_v24  ;;  %v1152_v2 = vpop.f32.mrb[9].mxu1 }
 0x2a4   : > { %v1191_v1 = vadd.f32 %v1653_v10, %v1089_v57  ;;  %v1092_v59 = vadd.f32 %v2904_v24, %v1091_v52  ;;  %v1153_v63 = vadd.f32 %v2904_v24, %v1152_v2  ;;  %v1428_v23 = vpop.f32.mrb[10].mxu1 }
 0x2a5   : > { %1225 = vst [vmem:[%s2914_s20 + $0x50] sm:$0xff] %v1193_v29  ;;  %v1194_v7 = vadd.f32 %v1654_v39, %v1100_v9  ;;  %v1209_v62 = vadd.f32 %v1655_v5, %v1161_v48  ;;  %v1164_v43 = vadd.f32 %v1428_v23, %v2904_v24  ;;  %v1155_v47 = vpop.f32.mrb[11].mxu1 }
 0x2a6   : > { %1223 = vst [vmem:[%s2914_s20 + $0x40] sm:$0xff] %v1191_v1  ;;  %v1192_v53 = vadd.f32 %v1656_v22, %v1092_v59  ;;  %v1207_v17 = vadd.f32 %v1657_v45, %v1153_v63  ;;  %v1156_v12 = vadd.f32 %v2904_v24, %v1155_v47 }
 0x2a7   : > { %1226 = vst [vmem:[%s2914_s20 + $0x58] sm:$0xff] %v1194_v7  ;;  %1241 = vst [vmem:[%s2914_s20 + $0xd0] sm:$0xff] %v1209_v62  ;;  %v1210_v0 = vadd.f32 %v1658_v16, %v1164_v43 }
 0x2a8   : > { %1224 = vst [vmem:[%s2914_s20 + $0x48] sm:$0xff] %v1192_v53  ;;  %1239 = vst [vmem:[%s2914_s20 + $0xc0] sm:$0xff] %v1207_v17  ;;  %v1208_v51 = vadd.f32 %v1659_v35, %v1156_v12 }
 0x2a9   : > { %1242 = vst [vmem:[%s2914_s20 + $0xd8] sm:$0xff] %v1210_v0 }
 0x2aa   : > { %1240 = vst [vmem:[%s2914_s20 + $0xc8] sm:$0xff] %v1208_v51 }
 0x2ac   : > { %v1415_v61 = vpop.f32.mrb[12].mxu0 }
 0x2ad   : > { %v1113_v14 = vadd.f32 %v1415_v61, %v2904_v24  ;;  %v1104_v49 = vpop.f32.mrb[13].mxu0 }
 0x2ae   : > { %v1105_v18 = vadd.f32 %v2904_v24, %v1104_v49  ;;  %v1416_v6 = vpop.f32.mrb[14].mxu0 }
 0x2af   : > { %v1197_v60 = vadd.f32 %v1660_v42, %v1113_v14  ;;  %v1116_v13 = vadd.f32 %v1416_v6, %v2904_v24  ;;  %v1107_v56 = vpop.f32.mrb[15].mxu0  ;;  %v1431_v34 = vpop.f32.mrb[12].mxu1 }
 0x2b0   : > { %v1195_v50 = vadd.f32 %v1661_v11, %v1105_v18  ;;  %v1108_v15 = vadd.f32 %v2904_v24, %v1107_v56  ;;  %v1177_v8 = vadd.f32 %v1431_v34, %v2904_v24  ;;  %v1168_v27 = vpop.f32.mrb[13].mxu1 }
 0x2b1   : > { %1229 = vst [vmem:[%s2914_s20 + $0x70] sm:$0xff] %v1197_v60  ;;  %v1198_v37 = vadd.f32 %v1662_v19, %v1116_v13  ;;  %v1169_v54 = vadd.f32 %v2904_v24, %v1168_v27  ;;  %v1432_v46 = vpop.f32.mrb[14].mxu1 }
 0x2b2   : > { %1227 = vst [vmem:[%s2914_s20 + $0x60] sm:$0xff] %v1195_v50  ;;  %v1196_v36 = vadd.f32 %v1663_v38, %v1108_v15  ;;  %v1213_v40 = vadd.f32 %v1664_v31, %v1177_v8  ;;  %v1180_v4 = vadd.f32 %v1432_v46, %v2904_v24  ;;  %v1171_v41 = vpop.f32.mrb[15].mxu1 }
 0x2b3   : > { %1230 = vst [vmem:[%s2914_s20 + $0x78] sm:$0xff] %v1198_v37  ;;  %v1211_v44 = vadd.f32 %v1665_v33, %v1169_v54  ;;  %v1172_v32 = vadd.f32 %v2904_v24, %v1171_v41 }
 0x2b4   : > { %1228 = vst [vmem:[%s2914_s20 + $0x68] sm:$0xff] %v1196_v36  ;;  %1245 = vst [vmem:[%s2914_s20 + $0xf0] sm:$0xff] %v1213_v40  ;;  %v1214_v21 = vadd.f32 %v1666_v28, %v1180_v4 }
 0x2b5   : > { %1243 = vst [vmem:[%s2914_s20 + $0xe0] sm:$0xff] %v1211_v44  ;;  %v1212_v58 = vadd.f32 %v1667_v25, %v1172_v32 }
 0x2b6   : > { %1246 = vst [vmem:[%s2914_s20 + $0xf8] sm:$0xff] %v1214_v21 }
 0x2b7   : > { %1244 = vst [vmem:[%s2914_s20 + $0xe8] sm:$0xff] %v1212_v58 }
 0x2b8   : > { %1711 = shalt.err (!%p1708_p2)
}
 0x2b9   : > { %s1712_s30 = scalar_lea.hbm %s3007_s15, 4096  ;;  %s1716_s14 = scalar_lea.hbm %s3063_s6, 8192 }
 0x2ba   : > { %p1713_p4 = scmp.ne.s32.totalorder %s3007_s15, %s1712_s30  ;;  %p1717_p9 = scmp.lt.u32.totalorder %s3007_s15, %s3063_s6 }
 0x2bb   : > { %p1718_p1 = scmp.lt.u32.totalorder %s1716_s14, %s1712_s30  ;;  %p1720_p6 = scmp.lt.u32.totalorder %s1712_s30, %s3007_s15 }
 0x2bc   : > { %p1714_p5 = pnand %p1713_p4, %p3130_p11 }
 0x2bd   : > { %p1719_p3 = por %p1718_p1, %p1717_p9 }
 0x2be   : > { %p1715_p7 = pneg %p1714_p5 }
 0x2bf   : > { %p1721_p12 = por %p1720_p6, %p1719_p3 }
 0x2c1   : > { %p1722_p13 = pnand %p1721_p12, %p1715_p7 }
 0x2c3   : > { %1725 = shalt.err (!%p1722_p13)
}
 0x2c4   : > { %s1770_s27 = smov 128   ;;  %s1771_s24 = smov 8  }
 0x2c5   : > { %1451 = dma.vmem_to_hbm [thread:$0]  (%p3130_p11), %s3009_s28, 4096, %s3007_s15, %s1248_s17, %s1770_s27, %s1770_s27, %s1771_s24  }
 0x2c6 PF: > { %s1276_s7 = sand.u32 1, %s1752_s0   ;;  %p3131_p8 = scmp.ne.s32.totalorder %s3070_s9, 0 }
 0x2c7   : > { %p3132_p10 = scmp.ge.s32.totalorder %s1764_s23, 2  ;;  %s1277_s18 = scalar_lea.sflag [#allocation6], %s1276_s7 }
 0x2c9   : > { %p1458_p0 = pnand %p3132_p10, %p3131_p8 }
 0x2cb   : > { %1747 = dma.done.wait (!%p1458_p0), %s1277_s18, 4096  }
 0x2cc   : > { %1749 = vsyncadd (!%p1458_p0), %s1277_s18, 4294963200  ;;  %p20_p2 = scmp.ge.s32.totalorder %s1832_s26, 4   ;;  %s3133_s0 = smov %s1756_s21 }
 0x2cd   : > { %s3134_s21 = smov %s1760_s22  ;;  %s3135_s22 = smov %s1844_s29 }
 0x2ce   : > { %s3136_s23 = smov %s1832_s26  ;;  %22 = sbr.rel (!%p20_p2) target bundleno = 5 (0x5), region = 85 }
 0x2d5   :  { %1282 = vsyncpa [#allocation5], 1 }
 0x2d6   :  { %1284 = vsyncpa [#allocation5 + $0x1], 1 }
 0x2d7   :  { %1285 = vsyncpa [#allocation6], 1 }
 0x2d8   :  { %1287 = vsyncpa [#allocation6 + $0x1], 1 }

</bundles_post_ra>
